<compile_context>
chip_gen: v7x
topology: tpu7x:2x2x1
jax: 0.10.0
libtpu: 0.0.40
codegen_flags: <defaults>
</compile_context>

<pallas_src>
import functools

import jax
import jax.numpy as jnp
from jax.experimental import pallas as pl
from jax.experimental.pallas import tpu as pltpu

_EPS = 1e-5


# ---------------------------------------------------------------------------
# BN folding (inference affine)
# ---------------------------------------------------------------------------
def _fold_bn(p):
    scale = p["gamma"] / jnp.sqrt(p["var"] + _EPS)
    bias = p["beta"] - p["mean"] * scale
    return scale, bias


# ---------------------------------------------------------------------------
# Pallas kernel: the entire EmbeddingCNN forward for one image per grid step
# ---------------------------------------------------------------------------
def _pool_selectors(w):
    """(w//2, w) exact 0/1 bf16 matrices selecting even / odd columns."""
    ow = w // 2
    rows = jax.lax.broadcasted_iota(jnp.int32, (ow, w), 0)
    cols = jax.lax.broadcasted_iota(jnp.int32, (ow, w), 1)
    sel_e = (cols == 2 * rows).astype(jnp.bfloat16)
    sel_o = (cols == 2 * rows + 1).astype(jnp.bfloat16)
    return sel_e, sel_o


def _fused_cnn_kernel(layer_dims, feature_size, x_ref, *refs):
    """Runs every conv+BN+ReLU+pool layer and the final GEMM for ONE image.

    layer_dims: static tuple of (H, W, Cin, Cout) per 3x3 conv layer.
    refs layout: [wmat_i, scale_i, bias_i]*L, wf, fscale, fbias, o_ref,
                 pad_scratch_0..pad_scratch_{L-1}.
    """
    num_layers = len(layer_dims)
    w_refs = refs[: 3 * num_layers]
    wf_ref, sf_ref, bf_ref = refs[3 * num_layers: 3 * num_layers + 3]
    o_ref = refs[3 * num_layers + 3]
    pad_refs = refs[3 * num_layers + 4:]

    # Stage the input image into the layer-0 padded scratch (zero halo).
    h0, w0, _, _ = layer_dims[0]
    pad_refs[0][...] = jnp.zeros(pad_refs[0].shape, jnp.float32)
    pad_refs[0][1:h0 + 1, 1:w0 + 1, :] = x_ref[0].astype(jnp.float32)

    acc = jnp.zeros((1, feature_size), jnp.float32)     # fused final-GEMM accumulator

    for li, (h, w, cin, cout) in enumerate(layer_dims):
        oh, ow = h // 2, w // 2
        wmat = w_refs[3 * li][...]                       # (9*cin, cout) bf16
        scale = w_refs[3 * li + 1][...]                  # (1, cout) f32
        bias = w_refs[3 * li + 2][...]                   # (1, cout) f32
        pad_in = pad_refs[li]
        last = li == num_layers - 1
        if not last:
            pad_out = pad_refs[li + 1]
            pad_out[...] = jnp.zeros(pad_out.shape, jnp.float32)
        sel_e, sel_o = _pool_selectors(w)

        for r in range(oh):                              # static unroll (pooled rows)
            relu_rows = []
            for py in range(2):                          # the 2 conv rows feeding pool row r
                y = 2 * r + py
                taps = []
                for ky in range(3):
                    row = pad_in[y + ky]                 # (w+2, cin) f32, static index
                    for kx in range(3):
                        taps.append(row[kx:kx + w, :])   # (w, cin) shifted tap
                patch = jnp.concatenate(taps, axis=-1).astype(jnp.bfloat16)    # (w, 9*cin)
                z = jnp.dot(patch, wmat, preferred_element_type=jnp.float32)   # (w, cout)
                relu_rows.append(jnp.maximum(z * scale + bias, 0.0))           # BN + ReLU
            # 2x2 max-pool: rows via elementwise max, columns via selection matmuls
            # (bf16 cast commutes with max, so this matches pool-then-cast exactly).
            m = jnp.maximum(relu_rows[0], relu_rows[1]).astype(jnp.bfloat16)   # (w, cout)
            pooled = jnp.maximum(
                jnp.dot(sel_e, m, preferred_element_type=jnp.float32),
                jnp.dot(sel_o, m, preferred_element_type=jnp.float32))         # (ow, cout)
            if not last:
                pad_out[r + 1, 1:ow + 1, :] = pooled     # feed next layer's padded input
            else:
                # Final conv (kernel == remaining spatial size) fused as a GEMM epilogue.
                flat = jnp.concatenate(
                    [pooled[x:x + 1, :] for x in range(ow)], axis=-1
                ).astype(jnp.bfloat16)                                          # (1, ow*cout)
                wrow = wf_ref[r * ow * cout:(r + 1) * ow * cout, :]             # (ow*cout, F)
                acc = acc + jnp.dot(flat, wrow, preferred_element_type=jnp.float32)

    out = jnp.maximum(acc * sf_ref[...] + bf_ref[...], 0.0)                    # final BN+ReLU
    o_ref[0] = out.astype(o_ref.dtype)


# ---------------------------------------------------------------------------
# Wrapper: parameter flattening + pallas_call
# ---------------------------------------------------------------------------
def embedding_cnn_forward(x_nchw, conv_params, final_params):
    """x_nchw: (N, 1, H, W) float32 (PyTorch NCHW) -> (N, feature_size) float32."""
    n, cin0, hh, ww = x_nchw.shape
    assert cin0 == 1 and hh % 2 == 0 and ww % 2 == 0
    x = jnp.transpose(x_nchw, (0, 2, 3, 1)).astype(jnp.float32)    # NHWC

    layer_dims = []
    inputs = [x]
    in_specs = [pl.BlockSpec((1, hh, ww, 1), lambda b: (b, 0, 0, 0))]
    scratch_shapes = []
    flops = 0
    bytes_accessed = x.size * 4
    h, w, cin = hh, ww, 1
    for p in conv_params:
        cout = p["w"].shape[-1]
        assert h % 2 == 0 and w % 2 == 0 and p["w"].shape == (3, 3, cin, cout)
        layer_dims.append((h, w, cin, cout))
        scale, bias = _fold_bn(p)
        wmat = p["w"].reshape(9 * cin, cout).astype(jnp.bfloat16)  # (ky,kx,ci)-major rows
        inputs += [wmat,
                   scale.reshape(1, cout).astype(jnp.float32),
                   bias.reshape(1, cout).astype(jnp.float32)]
        in_specs += [pl.BlockSpec((9 * cin, cout), lambda b: (0, 0)),
                     pl.BlockSpec((1, cout), lambda b: (0, 0)),
                     pl.BlockSpec((1, cout), lambda b: (0, 0))]
        scratch_shapes.append(pltpu.VMEM((h + 2, w + 2, cin), jnp.float32))
        flops += 2 * n * h * w * (9 * cin) * cout
        bytes_accessed += wmat.size * 2 + 8 * cout
        h, w, cin = h // 2, w // 2, cout

    feat = final_params["w"].shape[-1]
    assert final_params["w"].shape == (h, w, cin, feat)
    fscale, fbias = _fold_bn(final_params)
    wf = final_params["w"].reshape(h * w * cin, feat).astype(jnp.bfloat16)
    inputs += [wf,
               fscale.reshape(1, feat).astype(jnp.float32),
               fbias.reshape(1, feat).astype(jnp.float32)]
    in_specs += [pl.BlockSpec((h * w * cin, feat), lambda b: (0, 0)),
                 pl.BlockSpec((1, feat), lambda b: (0, 0)),
                 pl.BlockSpec((1, feat), lambda b: (0, 0))]
    flops += 2 * n * (h * w * cin) * feat
    bytes_accessed += wf.size * 2 + 8 * feat + n * feat * 4

    kernel = functools.partial(_fused_cnn_kernel, tuple(layer_dims), feat)
    out = pl.pallas_call(
        kernel,
        out_shape=jax.ShapeDtypeStruct((n, 1, feat), jnp.float32),
        grid=(n,),
        in_specs=in_specs,
        out_specs=pl.BlockSpec((1, 1, feat), lambda b: (b, 0, 0)),
        scratch_shapes=scratch_shapes,
        compiler_params=pltpu.CompilerParams(dimension_semantics=("parallel",)),
        cost_estimate=pl.CostEstimate(flops=flops, transcendentals=0,
                                      bytes_accessed=bytes_accessed),
    )(*inputs)
    return out.reshape(n, feat)


# ---------------------------------------------------------------------------
# Parameter init (matches the PyTorch module layout) + pure-JAX references
# ---------------------------------------------------------------------------
def init_params(key, image_size, cnn_feature_size, cnn_hidden_dim, cnn_num_layers):
    conv_params = []
    dim = cnn_hidden_dim
    in_c = 1
    size = image_size
    for i in range(cnn_num_layers):
        if i == 0:
            out_c = dim
        else:
            out_c = dim * 2
            dim *= 2
        key, k1, k2, k3, k4, k5 = jax.random.split(key, 6)
        conv_params.append(dict(
            w=0.1 * jax.random.normal(k1, (3, 3, in_c, out_c), jnp.float32),
            gamma=1.0 + 0.1 * jax.random.normal(k2, (out_c,), jnp.float32),
            beta=0.1 * jax.random.normal(k3, (out_c,), jnp.float32),
            mean=0.1 * jax.random.normal(k4, (out_c,), jnp.float32),
            var=1.0 + 0.1 * jnp.abs(jax.random.normal(k5, (out_c,), jnp.float32)),
        ))
        in_c = out_c
        size //= 2
    key, k1, k2, k3, k4, k5 = jax.random.split(key, 6)
    final_params = dict(
        w=0.05 * jax.random.normal(k1, (size, size, in_c, cnn_feature_size), jnp.float32),
        gamma=1.0 + 0.1 * jax.random.normal(k2, (cnn_feature_size,), jnp.float32),
        beta=0.1 * jax.random.normal(k3, (cnn_feature_size,), jnp.float32),
        mean=0.1 * jax.random.normal(k4, (cnn_feature_size,), jnp.float32),
        var=1.0 + 0.1 * jnp.abs(jax.random.normal(k5, (cnn_feature_size,), jnp.float32)),
    )
    return conv_params, final_params


def reference_forward(x_nchw, conv_params, final_params, *, compute_dtype=jnp.float32):
    x = jnp.transpose(x_nchw, (0, 2, 3, 1)).astype(compute_dtype)
    dn = ("NHWC", "HWIO", "NHWC")
    for p in conv_params:
        y = jax.lax.conv_general_dilated(
            x, p["w"].astype(compute_dtype), (1, 1), ((1, 1), (1, 1)),
            dimension_numbers=dn, preferred_element_type=jnp.float32)
        scale, bias = _fold_bn(p)
        y = jnp.maximum(y * scale + bias, 0.0)
        y = jax.lax.reduce_window(y, -jnp.inf, jax.lax.max,
                                  (1, 2, 2, 1), (1, 2, 2, 1), "VALID")
        x = y.astype(compute_dtype)
    y = jax.lax.conv_general_dilated(
        x, final_params["w"].astype(compute_dtype), (1, 1), "VALID",
        dimension_numbers=dn, preferred_element_type=jnp.float32)   # (N, 1, 1, F)
    scale, bias = _fold_bn(final_params)
    y = jnp.maximum(y * scale + bias, 0.0)
    return y.reshape(y.shape[0], -1).astype(jnp.float32)


if __name__ == "__main__":
    image_size, feature_size, hidden_dim, num_layers = 16, 32, 4, 2
    key = jax.random.PRNGKey(0)
    k_params, k_x = jax.random.split(key)
    conv_params, final_params = init_params(
        k_params, image_size, feature_size, hidden_dim, num_layers)

    x = jax.random.normal(k_x, (2, 1, image_size, image_size), jnp.float32)

    fwd = jax.jit(lambda xx: embedding_cnn_forward(xx, conv_params, final_params))
    out = jax.block_until_ready(fwd(x))
    assert out.shape == (2, feature_size), out.shape

    # Tight check against a reference using the same bf16-operand / f32-accum recipe.
    ref_mixed = reference_forward(x, conv_params, final_params,
                                  compute_dtype=jnp.bfloat16)
    err_mixed = float(jnp.max(jnp.abs(out - ref_mixed)))
    assert jnp.allclose(out, ref_mixed, atol=2e-3, rtol=2e-3), err_mixed

    # Sanity check against the pure-f32 module semantics (bf16 operand error).
    ref_f32 = reference_forward(x, conv_params, final_params,
                                compute_dtype=jnp.float32)
    err_f32 = float(jnp.max(jnp.abs(out - ref_f32)))
    assert jnp.allclose(out, ref_f32, atol=0.1, rtol=0.1), err_f32

    print("KERNEL_OK")
</pallas_src>

<mosaic_0001>
module attributes {stable_mosaic.version = 11 : i64} {
  func.func @_fused_cnn_kernel(%arg0: i32, %arg1: memref<1x16x16x1xf32, #tpu.memory_space<vmem>>, %arg2: memref<9x4xbf16, #tpu.memory_space<vmem>>, %arg3: memref<1x4xf32, #tpu.memory_space<vmem>>, %arg4: memref<1x4xf32, #tpu.memory_space<vmem>>, %arg5: memref<36x8xbf16, #tpu.memory_space<vmem>>, %arg6: memref<1x8xf32, #tpu.memory_space<vmem>>, %arg7: memref<1x8xf32, #tpu.memory_space<vmem>>, %arg8: memref<128x32xbf16, #tpu.memory_space<vmem>>, %arg9: memref<1x32xf32, #tpu.memory_space<vmem>>, %arg10: memref<1x32xf32, #tpu.memory_space<vmem>>, %arg11: memref<1x1x32xf32, #tpu.memory_space<vmem>>, %arg12: memref<18x18x1xf32, #tpu.memory_space<vmem>>, %arg13: memref<10x10x4xf32, #tpu.memory_space<vmem>>) attributes {dimension_semantics = [#tpu.dimension_semantics<parallel>], iteration_bounds = array<i64: 2>, scalar_prefetch = 0 : i64, scratch_operands = 2 : i64, tpu.core_type = #tpu.core_type<tc>, window_params = [{transform_indices = @transform_0, window_bounds = array<i64: 1, 16, 16, 1>}, {pipeline_mode = #tpu.pipeline_mode<synchronous>, transform_indices = @transform_1, window_bounds = array<i64: 9, 4>}, {pipeline_mode = #tpu.pipeline_mode<synchronous>, transform_indices = @transform_2, window_bounds = array<i64: 1, 4>}, {pipeline_mode = #tpu.pipeline_mode<synchronous>, transform_indices = @transform_3, window_bounds = array<i64: 1, 4>}, {pipeline_mode = #tpu.pipeline_mode<synchronous>, transform_indices = @transform_4, window_bounds = array<i64: 36, 8>}, {pipeline_mode = #tpu.pipeline_mode<synchronous>, transform_indices = @transform_5, window_bounds = array<i64: 1, 8>}, {pipeline_mode = #tpu.pipeline_mode<synchronous>, transform_indices = @transform_6, window_bounds = array<i64: 1, 8>}, {pipeline_mode = #tpu.pipeline_mode<synchronous>, transform_indices = @transform_7, window_bounds = array<i64: 128, 32>}, {pipeline_mode = #tpu.pipeline_mode<synchronous>, transform_indices = @transform_8, window_bounds = array<i64: 1, 32>}, {pipeline_mode = #tpu.pipeline_mode<synchronous>, transform_indices = @transform_9, window_bounds = array<i64: 1, 32>}, {transform_indices = @transform_10, window_bounds = array<i64: 1, 1, 32>}]} {
    %cst = arith.constant 0.000000e+00 : f32
    %0 = vector.broadcast %cst : f32 to vector<18x18x1xf32>
    %c0 = arith.constant 0 : index
    %c0_0 = arith.constant 0 : index
    %c0_1 = arith.constant 0 : index
    %1 = vector.load %arg12[%c0, %c0_0, %c0_1] : memref<18x18x1xf32, #tpu.memory_space<vmem>>, vector<18x18x1xf32>
    tpu.vector_store %arg12[%c0, %c0_0, %c0_1], %0 {strides = array<i32>} : memref<18x18x1xf32, #tpu.memory_space<vmem>>, vector<18x18x1xf32>,
    %c0_2 = arith.constant 0 : index
    %c0_3 = arith.constant 0 : index
    %c0_4 = arith.constant 0 : index
    %c0_5 = arith.constant 0 : index
    %2 = vector.load %arg1[%c0_2, %c0_3, %c0_4, %c0_5] : memref<1x16x16x1xf32, #tpu.memory_space<vmem>>, vector<1x16x16x1xf32>
    %3 = vector.shape_cast %2 : vector<1x16x16x1xf32> to vector<16x16x1xf32>
    %c1 = arith.constant 1 : index
    %c1_6 = arith.constant 1 : index
    %c0_7 = arith.constant 0 : index
    %4 = vector.load %arg12[%c1, %c1_6, %c0_7] : memref<18x18x1xf32, #tpu.memory_space<vmem>>, vector<16x16x1xf32>
    tpu.vector_store %arg12[%c1, %c1_6, %c0_7], %3 {strides = array<i32>} : memref<18x18x1xf32, #tpu.memory_space<vmem>>, vector<16x16x1xf32>,
    %cst_8 = arith.constant 0.000000e+00 : f32
    %5 = vector.broadcast %cst_8 : f32 to vector<1x32xf32>
    %c0_9 = arith.constant 0 : index
    %c0_10 = arith.constant 0 : index
    %6 = vector.load %arg2[%c0_9, %c0_10] : memref<9x4xbf16, #tpu.memory_space<vmem>>, vector<9x4xbf16>
    %c0_11 = arith.constant 0 : index
    %c0_12 = arith.constant 0 : index
    %7 = vector.load %arg3[%c0_11, %c0_12] : memref<1x4xf32, #tpu.memory_space<vmem>>, vector<1x4xf32>
    %c0_13 = arith.constant 0 : index
    %c0_14 = arith.constant 0 : index
    %8 = vector.load %arg4[%c0_13, %c0_14] : memref<1x4xf32, #tpu.memory_space<vmem>>, vector<1x4xf32>
    %cst_15 = arith.constant 0.000000e+00 : f32
    %9 = vector.broadcast %cst_15 : f32 to vector<10x10x4xf32>
    %c0_16 = arith.constant 0 : index
    %c0_17 = arith.constant 0 : index
    %c0_18 = arith.constant 0 : index
    %10 = vector.load %arg13[%c0_16, %c0_17, %c0_18] : memref<10x10x4xf32, #tpu.memory_space<vmem>>, vector<10x10x4xf32>
    tpu.vector_store %arg13[%c0_16, %c0_17, %c0_18], %9 {strides = array<i32>} : memref<10x10x4xf32, #tpu.memory_space<vmem>>, vector<10x10x4xf32>,
    %11 = tpu.iota {dimensions = array<i32: 0>} : vector<8x16xi32>
    %12 = tpu.iota {dimensions = array<i32: 1>} : vector<8x16xi32>
    %c2_i32 = arith.constant 2 : i32
    %13 = vector.broadcast %c2_i32 : i32 to vector<8x16xi32>
    %14 = arith.muli %13, %11 : vector<8x16xi32>
    %15 = arith.cmpi eq, %12, %14 : vector<8x16xi32>
    %16 = arith.extui %15 : vector<8x16xi1> to vector<8x16xi32>
    %17 = arith.sitofp %16 : vector<8x16xi32> to vector<8x16xf32>
    %18 = arith.truncf %17 : vector<8x16xf32> to vector<8x16xbf16>
    %c2_i32_19 = arith.constant 2 : i32
    %19 = vector.broadcast %c2_i32_19 : i32 to vector<8x16xi32>
    %20 = arith.muli %19, %11 : vector<8x16xi32>
    %c1_i32 = arith.constant 1 : i32
    %21 = vector.broadcast %c1_i32 : i32 to vector<8x16xi32>
    %22 = arith.addi %20, %21 : vector<8x16xi32>
    %23 = arith.cmpi eq, %12, %22 : vector<8x16xi32>
    %24 = arith.extui %23 : vector<8x16xi1> to vector<8x16xi32>
    %25 = arith.sitofp %24 : vector<8x16xi32> to vector<8x16xf32>
    %26 = arith.truncf %25 : vector<8x16xf32> to vector<8x16xbf16>
    %c0_20 = arith.constant 0 : index
    %c0_21 = arith.constant 0 : index
    %c0_22 = arith.constant 0 : index
    %27 = vector.load %arg12[%c0_20, %c0_21, %c0_22] : memref<18x18x1xf32, #tpu.memory_space<vmem>>, vector<1x18x1xf32>
    %28 = vector.shape_cast %27 : vector<1x18x1xf32> to vector<18x1xf32>
    %29 = vector.extract_strided_slice %28 {offsets = [0, 0], sizes = [16, 1], strides = [1, 1]} : vector<18x1xf32> to vector<16x1xf32>
    %30 = vector.extract_strided_slice %28 {offsets = [1, 0], sizes = [16, 1], strides = [1, 1]} : vector<18x1xf32> to vector<16x1xf32>
    %31 = vector.extract_strided_slice %28 {offsets = [2, 0], sizes = [16, 1], strides = [1, 1]} : vector<18x1xf32> to vector<16x1xf32>
    %c1_23 = arith.constant 1 : index
    %c0_24 = arith.constant 0 : index
    %c0_25 = arith.constant 0 : index
    %32 = vector.load %arg12[%c1_23, %c0_24, %c0_25] : memref<18x18x1xf32, #tpu.memory_space<vmem>>, vector<1x18x1xf32>
    %33 = vector.shape_cast %32 : vector<1x18x1xf32> to vector<18x1xf32>
    %34 = vector.extract_strided_slice %33 {offsets = [0, 0], sizes = [16, 1], strides = [1, 1]} : vector<18x1xf32> to vector<16x1xf32>
    %35 = vector.extract_strided_slice %33 {offsets = [1, 0], sizes = [16, 1], strides = [1, 1]} : vector<18x1xf32> to vector<16x1xf32>
    %36 = vector.extract_strided_slice %33 {offsets = [2, 0], sizes = [16, 1], strides = [1, 1]} : vector<18x1xf32> to vector<16x1xf32>
    %c2 = arith.constant 2 : index
    %c0_26 = arith.constant 0 : index
    %c0_27 = arith.constant 0 : index
    %37 = vector.load %arg12[%c2, %c0_26, %c0_27] : memref<18x18x1xf32, #tpu.memory_space<vmem>>, vector<1x18x1xf32>
    %38 = vector.shape_cast %37 : vector<1x18x1xf32> to vector<18x1xf32>
    %39 = vector.extract_strided_slice %38 {offsets = [0, 0], sizes = [16, 1], strides = [1, 1]} : vector<18x1xf32> to vector<16x1xf32>
    %40 = vector.extract_strided_slice %38 {offsets = [1, 0], sizes = [16, 1], strides = [1, 1]} : vector<18x1xf32> to vector<16x1xf32>
    %41 = vector.extract_strided_slice %38 {offsets = [2, 0], sizes = [16, 1], strides = [1, 1]} : vector<18x1xf32> to vector<16x1xf32>
    %42 = tpu.concatenate %29, %30, %31, %34, %35, %36, %39, %40, %41 in 1 : vector<16x1xf32>, vector<16x1xf32>, vector<16x1xf32>, vector<16x1xf32>, vector<16x1xf32>, vector<16x1xf32>, vector<16x1xf32>, vector<16x1xf32>, vector<16x1xf32> -> vector<16x9xf32>
    %43 = arith.truncf %42 : vector<16x9xf32> to vector<16x9xbf16>
    %cst_28 = arith.constant dense<0.000000e+00> : vector<16x4xf32>
    %44 = tpu.matmul %43, %6, %cst_28 {dimension_numbers = #tpu.dot_dimension_numbers<[1], [0], [0], [1], [0, 0, 1, 1], [], []>} : vector<16x9xbf16>, vector<9x4xbf16>, vector<16x4xf32> -> vector<16x4xf32>
    %45 = vector.broadcast %7 : vector<1x4xf32> to vector<16x4xf32>
    %46 = arith.mulf %44, %45 : vector<16x4xf32>
    %47 = vector.broadcast %8 : vector<1x4xf32> to vector<16x4xf32>
    %48 = arith.addf %46, %47 : vector<16x4xf32>
    %cst_29 = arith.constant 0.000000e+00 : f32
    %49 = vector.broadcast %cst_29 : f32 to vector<16x4xf32>
    %50 = arith.maximumf %48, %49 : vector<16x4xf32>
    %c1_30 = arith.constant 1 : index
    %c0_31 = arith.constant 0 : index
    %c0_32 = arith.constant 0 : index
    %51 = vector.load %arg12[%c1_30, %c0_31, %c0_32] : memref<18x18x1xf32, #tpu.memory_space<vmem>>, vector<1x18x1xf32>
    %52 = vector.shape_cast %51 : vector<1x18x1xf32> to vector<18x1xf32>
    %53 = vector.extract_strided_slice %52 {offsets = [0, 0], sizes = [16, 1], strides = [1, 1]} : vector<18x1xf32> to vector<16x1xf32>
    %54 = vector.extract_strided_slice %52 {offsets = [1, 0], sizes = [16, 1], strides = [1, 1]} : vector<18x1xf32> to vector<16x1xf32>
    %55 = vector.extract_strided_slice %52 {offsets = [2, 0], sizes = [16, 1], strides = [1, 1]} : vector<18x1xf32> to vector<16x1xf32>
    %c2_33 = arith.constant 2 : index
    %c0_34 = arith.constant 0 : index
    %c0_35 = arith.constant 0 : index
    %56 = vector.load %arg12[%c2_33, %c0_34, %c0_35] : memref<18x18x1xf32, #tpu.memory_space<vmem>>, vector<1x18x1xf32>
    %57 = vector.shape_cast %56 : vector<1x18x1xf32> to vector<18x1xf32>
    %58 = vector.extract_strided_slice %57 {offsets = [0, 0], sizes = [16, 1], strides = [1, 1]} : vector<18x1xf32> to vector<16x1xf32>
    %59 = vector.extract_strided_slice %57 {offsets = [1, 0], sizes = [16, 1], strides = [1, 1]} : vector<18x1xf32> to vector<16x1xf32>
    %60 = vector.extract_strided_slice %57 {offsets = [2, 0], sizes = [16, 1], strides = [1, 1]} : vector<18x1xf32> to vector<16x1xf32>
    %c3 = arith.constant 3 : index
    %c0_36 = arith.constant 0 : index
    %c0_37 = arith.constant 0 : index
    %61 = vector.load %arg12[%c3, %c0_36, %c0_37] : memref<18x18x1xf32, #tpu.memory_space<vmem>>, vector<1x18x1xf32>
    %62 = vector.shape_cast %61 : vector<1x18x1xf32> to vector<18x1xf32>
    %63 = vector.extract_strided_slice %62 {offsets = [0, 0], sizes = [16, 1], strides = [1, 1]} : vector<18x1xf32> to vector<16x1xf32>
    %64 = vector.extract_strided_slice %62 {offsets = [1, 0], sizes = [16, 1], strides = [1, 1]} : vector<18x1xf32> to vector<16x1xf32>
    %65 = vector.extract_strided_slice %62 {offsets = [2, 0], sizes = [16, 1], strides = [1, 1]} : vector<18x1xf32> to vector<16x1xf32>
    %66 = tpu.concatenate %53, %54, %55, %58, %59, %60, %63, %64, %65 in 1 : vector<16x1xf32>, vector<16x1xf32>, vector<16x1xf32>, vector<16x1xf32>, vector<16x1xf32>, vector<16x1xf32>, vector<16x1xf32>, vector<16x1xf32>, vector<16x1xf32> -> vector<16x9xf32>
    %67 = arith.truncf %66 : vector<16x9xf32> to vector<16x9xbf16>
    %cst_38 = arith.constant dense<0.000000e+00> : vector<16x4xf32>
    %68 = tpu.matmul %67, %6, %cst_38 {dimension_numbers = #tpu.dot_dimension_numbers<[1], [0], [0], [1], [0, 0, 1, 1], [], []>} : vector<16x9xbf16>, vector<9x4xbf16>, vector<16x4xf32> -> vector<16x4xf32>
    %69 = vector.broadcast %7 : vector<1x4xf32> to vector<16x4xf32>
    %70 = arith.mulf %68, %69 : vector<16x4xf32>
    %71 = vector.broadcast %8 : vector<1x4xf32> to vector<16x4xf32>
    %72 = arith.addf %70, %71 : vector<16x4xf32>
    %cst_39 = arith.constant 0.000000e+00 : f32
    %73 = vector.broadcast %cst_39 : f32 to vector<16x4xf32>
    %74 = arith.maximumf %72, %73 : vector<16x4xf32>
    %75 = arith.maximumf %50, %74 : vector<16x4xf32>
    %76 = arith.truncf %75 : vector<16x4xf32> to vector<16x4xbf16>
    %cst_40 = arith.constant dense<0.000000e+00> : vector<8x4xf32>
    %77 = tpu.matmul %18, %76, %cst_40 {dimension_numbers = #tpu.dot_dimension_numbers<[1], [0], [0], [1], [0, 0, 1, 1], [], []>} : vector<8x16xbf16>, vector<16x4xbf16>, vector<8x4xf32> -> vector<8x4xf32>
    %cst_41 = arith.constant dense<0.000000e+00> : vector<8x4xf32>
    %78 = tpu.matmul %26, %76, %cst_41 {dimension_numbers = #tpu.dot_dimension_numbers<[1], [0], [0], [1], [0, 0, 1, 1], [], []>} : vector<8x16xbf16>, vector<16x4xbf16>, vector<8x4xf32> -> vector<8x4xf32>
    %79 = arith.maximumf %77, %78 : vector<8x4xf32>
    %c1_42 = arith.constant 1 : index
    %c1_43 = arith.constant 1 : index
    %c0_44 = arith.constant 0 : index
    %80 = vector.load %arg13[%c1_42, %c1_43, %c0_44] : memref<10x10x4xf32, #tpu.memory_space<vmem>>, vector<1x8x4xf32>
    %81 = vector.shape_cast %80 : vector<1x8x4xf32> to vector<8x4xf32>
    %82 = vector.shape_cast %79 : vector<8x4xf32> to vector<1x8x4xf32>
    tpu.vector_store %arg13[%c1_42, %c1_43, %c0_44], %82 {strides = array<i32>} : memref<10x10x4xf32, #tpu.memory_space<vmem>>, vector<1x8x4xf32>,
    %c2_45 = arith.constant 2 : index
    %c0_46 = arith.constant 0 : index
    %c0_47 = arith.constant 0 : index
    %83 = vector.load %arg12[%c2_45, %c0_46, %c0_47] : memref<18x18x1xf32, #tpu.memory_space<vmem>>, vector<1x18x1xf32>
    %84 = vector.shape_cast %83 : vector<1x18x1xf32> to vector<18x1xf32>
    %85 = vector.extract_strided_slice %84 {offsets = [0, 0], sizes = [16, 1], strides = [1, 1]} : vector<18x1xf32> to vector<16x1xf32>
    %86 = vector.extract_strided_slice %84 {offsets = [1, 0], sizes = [16, 1], strides = [1, 1]} : vector<18x1xf32> to vector<16x1xf32>
    %87 = vector.extract_strided_slice %84 {offsets = [2, 0], sizes = [16, 1], strides = [1, 1]} : vector<18x1xf32> to vector<16x1xf32>
    %c3_48 = arith.constant 3 : index
    %c0_49 = arith.constant 0 : index
    %c0_50 = arith.constant 0 : index
    %88 = vector.load %arg12[%c3_48, %c0_49, %c0_50] : memref<18x18x1xf32, #tpu.memory_space<vmem>>, vector<1x18x1xf32>
    %89 = vector.shape_cast %88 : vector<1x18x1xf32> to vector<18x1xf32>
    %90 = vector.extract_strided_slice %89 {offsets = [0, 0], sizes = [16, 1], strides = [1, 1]} : vector<18x1xf32> to vector<16x1xf32>
    %91 = vector.extract_strided_slice %89 {offsets = [1, 0], sizes = [16, 1], strides = [1, 1]} : vector<18x1xf32> to vector<16x1xf32>
    %92 = vector.extract_strided_slice %89 {offsets = [2, 0], sizes = [16, 1], strides = [1, 1]} : vector<18x1xf32> to vector<16x1xf32>
    %c4 = arith.constant 4 : index
    %c0_51 = arith.constant 0 : index
    %c0_52 = arith.constant 0 : index
    %93 = vector.load %arg12[%c4, %c0_51, %c0_52] : memref<18x18x1xf32, #tpu.memory_space<vmem>>, vector<1x18x1xf32>
    %94 = vector.shape_cast %93 : vector<1x18x1xf32> to vector<18x1xf32>
    %95 = vector.extract_strided_slice %94 {offsets = [0, 0], sizes = [16, 1], strides = [1, 1]} : vector<18x1xf32> to vector<16x1xf32>
    %96 = vector.extract_strided_slice %94 {offsets = [1, 0], sizes = [16, 1], strides = [1, 1]} : vector<18x1xf32> to vector<16x1xf32>
    %97 = vector.extract_strided_slice %94 {offsets = [2, 0], sizes = [16, 1], strides = [1, 1]} : vector<18x1xf32> to vector<16x1xf32>
    %98 = tpu.concatenate %85, %86, %87, %90, %91, %92, %95, %96, %97 in 1 : vector<16x1xf32>, vector<16x1xf32>, vector<16x1xf32>, vector<16x1xf32>, vector<16x1xf32>, vector<16x1xf32>, vector<16x1xf32>, vector<16x1xf32>, vector<16x1xf32> -> vector<16x9xf32>
    %99 = arith.truncf %98 : vector<16x9xf32> to vector<16x9xbf16>
    %cst_53 = arith.constant dense<0.000000e+00> : vector<16x4xf32>
    %100 = tpu.matmul %99, %6, %cst_53 {dimension_numbers = #tpu.dot_dimension_numbers<[1], [0], [0], [1], [0, 0, 1, 1], [], []>} : vector<16x9xbf16>, vector<9x4xbf16>, vector<16x4xf32> -> vector<16x4xf32>
    %101 = vector.broadcast %7 : vector<1x4xf32> to vector<16x4xf32>
    %102 = arith.mulf %100, %101 : vector<16x4xf32>
    %103 = vector.broadcast %8 : vector<1x4xf32> to vector<16x4xf32>
    %104 = arith.addf %102, %103 : vector<16x4xf32>
    %cst_54 = arith.constant 0.000000e+00 : f32
    %105 = vector.broadcast %cst_54 : f32 to vector<16x4xf32>
    %106 = arith.maximumf %104, %105 : vector<16x4xf32>
    %c3_55 = arith.constant 3 : index
    %c0_56 = arith.constant 0 : index
    %c0_57 = arith.constant 0 : index
    %107 = vector.load %arg12[%c3_55, %c0_56, %c0_57] : memref<18x18x1xf32, #tpu.memory_space<vmem>>, vector<1x18x1xf32>
    %108 = vector.shape_cast %107 : vector<1x18x1xf32> to vector<18x1xf32>
    %109 = vector.extract_strided_slice %108 {offsets = [0, 0], sizes = [16, 1], strides = [1, 1]} : vector<18x1xf32> to vector<16x1xf32>
    %110 = vector.extract_strided_slice %108 {offsets = [1, 0], sizes = [16, 1], strides = [1, 1]} : vector<18x1xf32> to vector<16x1xf32>
    %111 = vector.extract_strided_slice %108 {offsets = [2, 0], sizes = [16, 1], strides = [1, 1]} : vector<18x1xf32> to vector<16x1xf32>
    %c4_58 = arith.constant 4 : index
    %c0_59 = arith.constant 0 : index
    %c0_60 = arith.constant 0 : index
    %112 = vector.load %arg12[%c4_58, %c0_59, %c0_60] : memref<18x18x1xf32, #tpu.memory_space<vmem>>, vector<1x18x1xf32>
    %113 = vector.shape_cast %112 : vector<1x18x1xf32> to vector<18x1xf32>
    %114 = vector.extract_strided_slice %113 {offsets = [0, 0], sizes = [16, 1], strides = [1, 1]} : vector<18x1xf32> to vector<16x1xf32>
    %115 = vector.extract_strided_slice %113 {offsets = [1, 0], sizes = [16, 1], strides = [1, 1]} : vector<18x1xf32> to vector<16x1xf32>
    %116 = vector.extract_strided_slice %113 {offsets = [2, 0], sizes = [16, 1], strides = [1, 1]} : vector<18x1xf32> to vector<16x1xf32>
    %c5 = arith.constant 5 : index
    %c0_61 = arith.constant 0 : index
    %c0_62 = arith.constant 0 : index
    %117 = vector.load %arg12[%c5, %c0_61, %c0_62] : memref<18x18x1xf32, #tpu.memory_space<vmem>>, vector<1x18x1xf32>
    %118 = vector.shape_cast %117 : vector<1x18x1xf32> to vector<18x1xf32>
    %119 = vector.extract_strided_slice %118 {offsets = [0, 0], sizes = [16, 1], strides = [1, 1]} : vector<18x1xf32> to vector<16x1xf32>
    %120 = vector.extract_strided_slice %118 {offsets = [1, 0], sizes = [16, 1], strides = [1, 1]} : vector<18x1xf32> to vector<16x1xf32>
    %121 = vector.extract_strided_slice %118 {offsets = [2, 0], sizes = [16, 1], strides = [1, 1]} : vector<18x1xf32> to vector<16x1xf32>
    %122 = tpu.concatenate %109, %110, %111, %114, %115, %116, %119, %120, %121 in 1 : vector<16x1xf32>, vector<16x1xf32>, vector<16x1xf32>, vector<16x1xf32>, vector<16x1xf32>, vector<16x1xf32>, vector<16x1xf32>, vector<16x1xf32>, vector<16x1xf32> -> vector<16x9xf32>
    %123 = arith.truncf %122 : vector<16x9xf32> to vector<16x9xbf16>
    %cst_63 = arith.constant dense<0.000000e+00> : vector<16x4xf32>
    %124 = tpu.matmul %123, %6, %cst_63 {dimension_numbers = #tpu.dot_dimension_numbers<[1], [0], [0], [1], [0, 0, 1, 1], [], []>} : vector<16x9xbf16>, vector<9x4xbf16>, vector<16x4xf32> -> vector<16x4xf32>
    %125 = vector.broadcast %7 : vector<1x4xf32> to vector<16x4xf32>
    %126 = arith.mulf %124, %125 : vector<16x4xf32>
    %127 = vector.broadcast %8 : vector<1x4xf32> to vector<16x4xf32>
    %128 = arith.addf %126, %127 : vector<16x4xf32>
    %cst_64 = arith.constant 0.000000e+00 : f32
    %129 = vector.broadcast %cst_64 : f32 to vector<16x4xf32>
    %130 = arith.maximumf %128, %129 : vector<16x4xf32>
    %131 = arith.maximumf %106, %130 : vector<16x4xf32>
    %132 = arith.truncf %131 : vector<16x4xf32> to vector<16x4xbf16>
    %cst_65 = arith.constant dense<0.000000e+00> : vector<8x4xf32>
    %133 = tpu.matmul %18, %132, %cst_65 {dimension_numbers = #tpu.dot_dimension_numbers<[1], [0], [0], [1], [0, 0, 1, 1], [], []>} : vector<8x16xbf16>, vector<16x4xbf16>, vector<8x4xf32> -> vector<8x4xf32>
    %cst_66 = arith.constant dense<0.000000e+00> : vector<8x4xf32>
    %134 = tpu.matmul %26, %132, %cst_66 {dimension_numbers = #tpu.dot_dimension_numbers<[1], [0], [0], [1], [0, 0, 1, 1], [], []>} : vector<8x16xbf16>, vector<16x4xbf16>, vector<8x4xf32> -> vector<8x4xf32>
    %135 = arith.maximumf %133, %134 : vector<8x4xf32>
    %c2_67 = arith.constant 2 : index
    %c1_68 = arith.constant 1 : index
    %c0_69 = arith.constant 0 : index
    %136 = vector.load %arg13[%c2_67, %c1_68, %c0_69] : memref<10x10x4xf32, #tpu.memory_space<vmem>>, vector<1x8x4xf32>
    %137 = vector.shape_cast %136 : vector<1x8x4xf32> to vector<8x4xf32>
    %138 = vector.shape_cast %135 : vector<8x4xf32> to vector<1x8x4xf32>
    tpu.vector_store %arg13[%c2_67, %c1_68, %c0_69], %138 {strides = array<i32>} : memref<10x10x4xf32, #tpu.memory_space<vmem>>, vector<1x8x4xf32>,
    %c4_70 = arith.constant 4 : index
    %c0_71 = arith.constant 0 : index
    %c0_72 = arith.constant 0 : index
    %139 = vector.load %arg12[%c4_70, %c0_71, %c0_72] : memref<18x18x1xf32, #tpu.memory_space<vmem>>, vector<1x18x1xf32>
    %140 = vector.shape_cast %139 : vector<1x18x1xf32> to vector<18x1xf32>
    %141 = vector.extract_strided_slice %140 {offsets = [0, 0], sizes = [16, 1], strides = [1, 1]} : vector<18x1xf32> to vector<16x1xf32>
    %142 = vector.extract_strided_slice %140 {offsets = [1, 0], sizes = [16, 1], strides = [1, 1]} : vector<18x1xf32> to vector<16x1xf32>
    %143 = vector.extract_strided_slice %140 {offsets = [2, 0], sizes = [16, 1], strides = [1, 1]} : vector<18x1xf32> to vector<16x1xf32>
    %c5_73 = arith.constant 5 : index
    %c0_74 = arith.constant 0 : index
    %c0_75 = arith.constant 0 : index
    %144 = vector.load %arg12[%c5_73, %c0_74, %c0_75] : memref<18x18x1xf32, #tpu.memory_space<vmem>>, vector<1x18x1xf32>
    %145 = vector.shape_cast %144 : vector<1x18x1xf32> to vector<18x1xf32>
    %146 = vector.extract_strided_slice %145 {offsets = [0, 0], sizes = [16, 1], strides = [1, 1]} : vector<18x1xf32> to vector<16x1xf32>
    %147 = vector.extract_strided_slice %145 {offsets = [1, 0], sizes = [16, 1], strides = [1, 1]} : vector<18x1xf32> to vector<16x1xf32>
    %148 = vector.extract_strided_slice %145 {offsets = [2, 0], sizes = [16, 1], strides = [1, 1]} : vector<18x1xf32> to vector<16x1xf32>
    %c6 = arith.constant 6 : index
    %c0_76 = arith.constant 0 : index
    %c0_77 = arith.constant 0 : index
    %149 = vector.load %arg12[%c6, %c0_76, %c0_77] : memref<18x18x1xf32, #tpu.memory_space<vmem>>, vector<1x18x1xf32>
    %150 = vector.shape_cast %149 : vector<1x18x1xf32> to vector<18x1xf32>
    %151 = vector.extract_strided_slice %150 {offsets = [0, 0], sizes = [16, 1], strides = [1, 1]} : vector<18x1xf32> to vector<16x1xf32>
    %152 = vector.extract_strided_slice %150 {offsets = [1, 0], sizes = [16, 1], strides = [1, 1]} : vector<18x1xf32> to vector<16x1xf32>
    %153 = vector.extract_strided_slice %150 {offsets = [2, 0], sizes = [16, 1], strides = [1, 1]} : vector<18x1xf32> to vector<16x1xf32>
    %154 = tpu.concatenate %141, %142, %143, %146, %147, %148, %151, %152, %153 in 1 : vector<16x1xf32>, vector<16x1xf32>, vector<16x1xf32>, vector<16x1xf32>, vector<16x1xf32>, vector<16x1xf32>, vector<16x1xf32>, vector<16x1xf32>, vector<16x1xf32> -> vector<16x9xf32>
    %155 = arith.truncf %154 : vector<16x9xf32> to vector<16x9xbf16>
    %cst_78 = arith.constant dense<0.000000e+00> : vector<16x4xf32>
    %156 = tpu.matmul %155, %6, %cst_78 {dimension_numbers = #tpu.dot_dimension_numbers<[1], [0], [0], [1], [0, 0, 1, 1], [], []>} : vector<16x9xbf16>, vector<9x4xbf16>, vector<16x4xf32> -> vector<16x4xf32>
    %157 = vector.broadcast %7 : vector<1x4xf32> to vector<16x4xf32>
    %158 = arith.mulf %156, %157 : vector<16x4xf32>
    %159 = vector.broadcast %8 : vector<1x4xf32> to vector<16x4xf32>
    %160 = arith.addf %158, %159 : vector<16x4xf32>
    %cst_79 = arith.constant 0.000000e+00 : f32
    %161 = vector.broadcast %cst_79 : f32 to vector<16x4xf32>
    %162 = arith.maximumf %160, %161 : vector<16x4xf32>
    %c5_80 = arith.constant 5 : index
    %c0_81 = arith.constant 0 : index
    %c0_82 = arith.constant 0 : index
    %163 = vector.load %arg12[%c5_80, %c0_81, %c0_82] : memref<18x18x1xf32, #tpu.memory_space<vmem>>, vector<1x18x1xf32>
    %164 = vector.shape_cast %163 : vector<1x18x1xf32> to vector<18x1xf32>
    %165 = vector.extract_strided_slice %164 {offsets = [0, 0], sizes = [16, 1], strides = [1, 1]} : vector<18x1xf32> to vector<16x1xf32>
    %166 = vector.extract_strided_slice %164 {offsets = [1, 0], sizes = [16, 1], strides = [1, 1]} : vector<18x1xf32> to vector<16x1xf32>
    %167 = vector.extract_strided_slice %164 {offsets = [2, 0], sizes = [16, 1], strides = [1, 1]} : vector<18x1xf32> to vector<16x1xf32>
    %c6_83 = arith.constant 6 : index
    %c0_84 = arith.constant 0 : index
    %c0_85 = arith.constant 0 : index
    %168 = vector.load %arg12[%c6_83, %c0_84, %c0_85] : memref<18x18x1xf32, #tpu.memory_space<vmem>>, vector<1x18x1xf32>
    %169 = vector.shape_cast %168 : vector<1x18x1xf32> to vector<18x1xf32>
    %170 = vector.extract_strided_slice %169 {offsets = [0, 0], sizes = [16, 1], strides = [1, 1]} : vector<18x1xf32> to vector<16x1xf32>
    %171 = vector.extract_strided_slice %169 {offsets = [1, 0], sizes = [16, 1], strides = [1, 1]} : vector<18x1xf32> to vector<16x1xf32>
    %172 = vector.extract_strided_slice %169 {offsets = [2, 0], sizes = [16, 1], strides = [1, 1]} : vector<18x1xf32> to vector<16x1xf32>
    %c7 = arith.constant 7 : index
    %c0_86 = arith.constant 0 : index
    %c0_87 = arith.constant 0 : index
    %173 = vector.load %arg12[%c7, %c0_86, %c0_87] : memref<18x18x1xf32, #tpu.memory_space<vmem>>, vector<1x18x1xf32>
    %174 = vector.shape_cast %173 : vector<1x18x1xf32> to vector<18x1xf32>
    %175 = vector.extract_strided_slice %174 {offsets = [0, 0], sizes = [16, 1], strides = [1, 1]} : vector<18x1xf32> to vector<16x1xf32>
    %176 = vector.extract_strided_slice %174 {offsets = [1, 0], sizes = [16, 1], strides = [1, 1]} : vector<18x1xf32> to vector<16x1xf32>
    %177 = vector.extract_strided_slice %174 {offsets = [2, 0], sizes = [16, 1], strides = [1, 1]} : vector<18x1xf32> to vector<16x1xf32>
    %178 = tpu.concatenate %165, %166, %167, %170, %171, %172, %175, %176, %177 in 1 : vector<16x1xf32>, vector<16x1xf32>, vector<16x1xf32>, vector<16x1xf32>, vector<16x1xf32>, vector<16x1xf32>, vector<16x1xf32>, vector<16x1xf32>, vector<16x1xf32> -> vector<16x9xf32>
    %179 = arith.truncf %178 : vector<16x9xf32> to vector<16x9xbf16>
    %cst_88 = arith.constant dense<0.000000e+00> : vector<16x4xf32>
    %180 = tpu.matmul %179, %6, %cst_88 {dimension_numbers = #tpu.dot_dimension_numbers<[1], [0], [0], [1], [0, 0, 1, 1], [], []>} : vector<16x9xbf16>, vector<9x4xbf16>, vector<16x4xf32> -> vector<16x4xf32>
    %181 = vector.broadcast %7 : vector<1x4xf32> to vector<16x4xf32>
    %182 = arith.mulf %180, %181 : vector<16x4xf32>
    %183 = vector.broadcast %8 : vector<1x4xf32> to vector<16x4xf32>
    %184 = arith.addf %182, %183 : vector<16x4xf32>
    %cst_89 = arith.constant 0.000000e+00 : f32
    %185 = vector.broadcast %cst_89 : f32 to vector<16x4xf32>
    %186 = arith.maximumf %184, %185 : vector<16x4xf32>
    %187 = arith.maximumf %162, %186 : vector<16x4xf32>
    %188 = arith.truncf %187 : vector<16x4xf32> to vector<16x4xbf16>
    %cst_90 = arith.constant dense<0.000000e+00> : vector<8x4xf32>
    %189 = tpu.matmul %18, %188, %cst_90 {dimension_numbers = #tpu.dot_dimension_numbers<[1], [0], [0], [1], [0, 0, 1, 1], [], []>} : vector<8x16xbf16>, vector<16x4xbf16>, vector<8x4xf32> -> vector<8x4xf32>
    %cst_91 = arith.constant dense<0.000000e+00> : vector<8x4xf32>
    %190 = tpu.matmul %26, %188, %cst_91 {dimension_numbers = #tpu.dot_dimension_numbers<[1], [0], [0], [1], [0, 0, 1, 1], [], []>} : vector<8x16xbf16>, vector<16x4xbf16>, vector<8x4xf32> -> vector<8x4xf32>
    %191 = arith.maximumf %189, %190 : vector<8x4xf32>
    %c3_92 = arith.constant 3 : index
    %c1_93 = arith.constant 1 : index
    %c0_94 = arith.constant 0 : index
    %192 = vector.load %arg13[%c3_92, %c1_93, %c0_94] : memref<10x10x4xf32, #tpu.memory_space<vmem>>, vector<1x8x4xf32>
    %193 = vector.shape_cast %192 : vector<1x8x4xf32> to vector<8x4xf32>
    %194 = vector.shape_cast %191 : vector<8x4xf32> to vector<1x8x4xf32>
    tpu.vector_store %arg13[%c3_92, %c1_93, %c0_94], %194 {strides = array<i32>} : memref<10x10x4xf32, #tpu.memory_space<vmem>>, vector<1x8x4xf32>,
    %c6_95 = arith.constant 6 : index
    %c0_96 = arith.constant 0 : index
    %c0_97 = arith.constant 0 : index
    %195 = vector.load %arg12[%c6_95, %c0_96, %c0_97] : memref<18x18x1xf32, #tpu.memory_space<vmem>>, vector<1x18x1xf32>
    %196 = vector.shape_cast %195 : vector<1x18x1xf32> to vector<18x1xf32>
    %197 = vector.extract_strided_slice %196 {offsets = [0, 0], sizes = [16, 1], strides = [1, 1]} : vector<18x1xf32> to vector<16x1xf32>
    %198 = vector.extract_strided_slice %196 {offsets = [1, 0], sizes = [16, 1], strides = [1, 1]} : vector<18x1xf32> to vector<16x1xf32>
    %199 = vector.extract_strided_slice %196 {offsets = [2, 0], sizes = [16, 1], strides = [1, 1]} : vector<18x1xf32> to vector<16x1xf32>
    %c7_98 = arith.constant 7 : index
    %c0_99 = arith.constant 0 : index
    %c0_100 = arith.constant 0 : index
    %200 = vector.load %arg12[%c7_98, %c0_99, %c0_100] : memref<18x18x1xf32, #tpu.memory_space<vmem>>, vector<1x18x1xf32>
    %201 = vector.shape_cast %200 : vector<1x18x1xf32> to vector<18x1xf32>
    %202 = vector.extract_strided_slice %201 {offsets = [0, 0], sizes = [16, 1], strides = [1, 1]} : vector<18x1xf32> to vector<16x1xf32>
    %203 = vector.extract_strided_slice %201 {offsets = [1, 0], sizes = [16, 1], strides = [1, 1]} : vector<18x1xf32> to vector<16x1xf32>
    %204 = vector.extract_strided_slice %201 {offsets = [2, 0], sizes = [16, 1], strides = [1, 1]} : vector<18x1xf32> to vector<16x1xf32>
    %c8 = arith.constant 8 : index
    %c0_101 = arith.constant 0 : index
    %c0_102 = arith.constant 0 : index
    %205 = vector.load %arg12[%c8, %c0_101, %c0_102] : memref<18x18x1xf32, #tpu.memory_space<vmem>>, vector<1x18x1xf32>
    %206 = vector.shape_cast %205 : vector<1x18x1xf32> to vector<18x1xf32>
    %207 = vector.extract_strided_slice %206 {offsets = [0, 0], sizes = [16, 1], strides = [1, 1]} : vector<18x1xf32> to vector<16x1xf32>
    %208 = vector.extract_strided_slice %206 {offsets = [1, 0], sizes = [16, 1], strides = [1, 1]} : vector<18x1xf32> to vector<16x1xf32>
    %209 = vector.extract_strided_slice %206 {offsets = [2, 0], sizes = [16, 1], strides = [1, 1]} : vector<18x1xf32> to vector<16x1xf32>
    %210 = tpu.concatenate %197, %198, %199, %202, %203, %204, %207, %208, %209 in 1 : vector<16x1xf32>, vector<16x1xf32>, vector<16x1xf32>, vector<16x1xf32>, vector<16x1xf32>, vector<16x1xf32>, vector<16x1xf32>, vector<16x1xf32>, vector<16x1xf32> -> vector<16x9xf32>
    %211 = arith.truncf %210 : vector<16x9xf32> to vector<16x9xbf16>
    %cst_103 = arith.constant dense<0.000000e+00> : vector<16x4xf32>
    %212 = tpu.matmul %211, %6, %cst_103 {dimension_numbers = #tpu.dot_dimension_numbers<[1], [0], [0], [1], [0, 0, 1, 1], [], []>} : vector<16x9xbf16>, vector<9x4xbf16>, vector<16x4xf32> -> vector<16x4xf32>
    %213 = vector.broadcast %7 : vector<1x4xf32> to vector<16x4xf32>
    %214 = arith.mulf %212, %213 : vector<16x4xf32>
    %215 = vector.broadcast %8 : vector<1x4xf32> to vector<16x4xf32>
    %216 = arith.addf %214, %215 : vector<16x4xf32>
    %cst_104 = arith.constant 0.000000e+00 : f32
    %217 = vector.broadcast %cst_104 : f32 to vector<16x4xf32>
    %218 = arith.maximumf %216, %217 : vector<16x4xf32>
    %c7_105 = arith.constant 7 : index
    %c0_106 = arith.constant 0 : index
    %c0_107 = arith.constant 0 : index
    %219 = vector.load %arg12[%c7_105, %c0_106, %c0_107] : memref<18x18x1xf32, #tpu.memory_space<vmem>>, vector<1x18x1xf32>
    %220 = vector.shape_cast %219 : vector<1x18x1xf32> to vector<18x1xf32>
    %221 = vector.extract_strided_slice %220 {offsets = [0, 0], sizes = [16, 1], strides = [1, 1]} : vector<18x1xf32> to vector<16x1xf32>
    %222 = vector.extract_strided_slice %220 {offsets = [1, 0], sizes = [16, 1], strides = [1, 1]} : vector<18x1xf32> to vector<16x1xf32>
    %223 = vector.extract_strided_slice %220 {offsets = [2, 0], sizes = [16, 1], strides = [1, 1]} : vector<18x1xf32> to vector<16x1xf32>
    %c8_108 = arith.constant 8 : index
    %c0_109 = arith.constant 0 : index
    %c0_110 = arith.constant 0 : index
    %224 = vector.load %arg12[%c8_108, %c0_109, %c0_110] : memref<18x18x1xf32, #tpu.memory_space<vmem>>, vector<1x18x1xf32>
    %225 = vector.shape_cast %224 : vector<1x18x1xf32> to vector<18x1xf32>
    %226 = vector.extract_strided_slice %225 {offsets = [0, 0], sizes = [16, 1], strides = [1, 1]} : vector<18x1xf32> to vector<16x1xf32>
    %227 = vector.extract_strided_slice %225 {offsets = [1, 0], sizes = [16, 1], strides = [1, 1]} : vector<18x1xf32> to vector<16x1xf32>
    %228 = vector.extract_strided_slice %225 {offsets = [2, 0], sizes = [16, 1], strides = [1, 1]} : vector<18x1xf32> to vector<16x1xf32>
    %c9 = arith.constant 9 : index
    %c0_111 = arith.constant 0 : index
    %c0_112 = arith.constant 0 : index
    %229 = vector.load %arg12[%c9, %c0_111, %c0_112] : memref<18x18x1xf32, #tpu.memory_space<vmem>>, vector<1x18x1xf32>
    %230 = vector.shape_cast %229 : vector<1x18x1xf32> to vector<18x1xf32>
    %231 = vector.extract_strided_slice %230 {offsets = [0, 0], sizes = [16, 1], strides = [1, 1]} : vector<18x1xf32> to vector<16x1xf32>
    %232 = vector.extract_strided_slice %230 {offsets = [1, 0], sizes = [16, 1], strides = [1, 1]} : vector<18x1xf32> to vector<16x1xf32>
    %233 = vector.extract_strided_slice %230 {offsets = [2, 0], sizes = [16, 1], strides = [1, 1]} : vector<18x1xf32> to vector<16x1xf32>
    %234 = tpu.concatenate %221, %222, %223, %226, %227, %228, %231, %232, %233 in 1 : vector<16x1xf32>, vector<16x1xf32>, vector<16x1xf32>, vector<16x1xf32>, vector<16x1xf32>, vector<16x1xf32>, vector<16x1xf32>, vector<16x1xf32>, vector<16x1xf32> -> vector<16x9xf32>
    %235 = arith.truncf %234 : vector<16x9xf32> to vector<16x9xbf16>
    %cst_113 = arith.constant dense<0.000000e+00> : vector<16x4xf32>
    %236 = tpu.matmul %235, %6, %cst_113 {dimension_numbers = #tpu.dot_dimension_numbers<[1], [0], [0], [1], [0, 0, 1, 1], [], []>} : vector<16x9xbf16>, vector<9x4xbf16>, vector<16x4xf32> -> vector<16x4xf32>
    %237 = vector.broadcast %7 : vector<1x4xf32> to vector<16x4xf32>
    %238 = arith.mulf %236, %237 : vector<16x4xf32>
    %239 = vector.broadcast %8 : vector<1x4xf32> to vector<16x4xf32>
    %240 = arith.addf %238, %239 : vector<16x4xf32>
    %cst_114 = arith.constant 0.000000e+00 : f32
    %241 = vector.broadcast %cst_114 : f32 to vector<16x4xf32>
    %242 = arith.maximumf %240, %241 : vector<16x4xf32>
    %243 = arith.maximumf %218, %242 : vector<16x4xf32>
    %244 = arith.truncf %243 : vector<16x4xf32> to vector<16x4xbf16>
    %cst_115 = arith.constant dense<0.000000e+00> : vector<8x4xf32>
    %245 = tpu.matmul %18, %244, %cst_115 {dimension_numbers = #tpu.dot_dimension_numbers<[1], [0], [0], [1], [0, 0, 1, 1], [], []>} : vector<8x16xbf16>, vector<16x4xbf16>, vector<8x4xf32> -> vector<8x4xf32>
    %cst_116 = arith.constant dense<0.000000e+00> : vector<8x4xf32>
    %246 = tpu.matmul %26, %244, %cst_116 {dimension_numbers = #tpu.dot_dimension_numbers<[1], [0], [0], [1], [0, 0, 1, 1], [], []>} : vector<8x16xbf16>, vector<16x4xbf16>, vector<8x4xf32> -> vector<8x4xf32>
    %247 = arith.maximumf %245, %246 : vector<8x4xf32>
    %c4_117 = arith.constant 4 : index
    %c1_118 = arith.constant 1 : index
    %c0_119 = arith.constant 0 : index
    %248 = vector.load %arg13[%c4_117, %c1_118, %c0_119] : memref<10x10x4xf32, #tpu.memory_space<vmem>>, vector<1x8x4xf32>
    %249 = vector.shape_cast %248 : vector<1x8x4xf32> to vector<8x4xf32>
    %250 = vector.shape_cast %247 : vector<8x4xf32> to vector<1x8x4xf32>
    tpu.vector_store %arg13[%c4_117, %c1_118, %c0_119], %250 {strides = array<i32>} : memref<10x10x4xf32, #tpu.memory_space<vmem>>, vector<1x8x4xf32>,
    %c8_120 = arith.constant 8 : index
    %c0_121 = arith.constant 0 : index
    %c0_122 = arith.constant 0 : index
    %251 = vector.load %arg12[%c8_120, %c0_121, %c0_122] : memref<18x18x1xf32, #tpu.memory_space<vmem>>, vector<1x18x1xf32>
    %252 = vector.shape_cast %251 : vector<1x18x1xf32> to vector<18x1xf32>
    %253 = vector.extract_strided_slice %252 {offsets = [0, 0], sizes = [16, 1], strides = [1, 1]} : vector<18x1xf32> to vector<16x1xf32>
    %254 = vector.extract_strided_slice %252 {offsets = [1, 0], sizes = [16, 1], strides = [1, 1]} : vector<18x1xf32> to vector<16x1xf32>
    %255 = vector.extract_strided_slice %252 {offsets = [2, 0], sizes = [16, 1], strides = [1, 1]} : vector<18x1xf32> to vector<16x1xf32>
    %c9_123 = arith.constant 9 : index
    %c0_124 = arith.constant 0 : index
    %c0_125 = arith.constant 0 : index
    %256 = vector.load %arg12[%c9_123, %c0_124, %c0_125] : memref<18x18x1xf32, #tpu.memory_space<vmem>>, vector<1x18x1xf32>
    %257 = vector.shape_cast %256 : vector<1x18x1xf32> to vector<18x1xf32>
    %258 = vector.extract_strided_slice %257 {offsets = [0, 0], sizes = [16, 1], strides = [1, 1]} : vector<18x1xf32> to vector<16x1xf32>
    %259 = vector.extract_strided_slice %257 {offsets = [1, 0], sizes = [16, 1], strides = [1, 1]} : vector<18x1xf32> to vector<16x1xf32>
    %260 = vector.extract_strided_slice %257 {offsets = [2, 0], sizes = [16, 1], strides = [1, 1]} : vector<18x1xf32> to vector<16x1xf32>
    %c10 = arith.constant 10 : index
    %c0_126 = arith.constant 0 : index
    %c0_127 = arith.constant 0 : index
    %261 = vector.load %arg12[%c10, %c0_126, %c0_127] : memref<18x18x1xf32, #tpu.memory_space<vmem>>, vector<1x18x1xf32>
    %262 = vector.shape_cast %261 : vector<1x18x1xf32> to vector<18x1xf32>
    %263 = vector.extract_strided_slice %262 {offsets = [0, 0], sizes = [16, 1], strides = [1, 1]} : vector<18x1xf32> to vector<16x1xf32>
    %264 = vector.extract_strided_slice %262 {offsets = [1, 0], sizes = [16, 1], strides = [1, 1]} : vector<18x1xf32> to vector<16x1xf32>
    %265 = vector.extract_strided_slice %262 {offsets = [2, 0], sizes = [16, 1], strides = [1, 1]} : vector<18x1xf32> to vector<16x1xf32>
    %266 = tpu.concatenate %253, %254, %255, %258, %259, %260, %263, %264, %265 in 1 : vector<16x1xf32>, vector<16x1xf32>, vector<16x1xf32>, vector<16x1xf32>, vector<16x1xf32>, vector<16x1xf32>, vector<16x1xf32>, vector<16x1xf32>, vector<16x1xf32> -> vector<16x9xf32>
    %267 = arith.truncf %266 : vector<16x9xf32> to vector<16x9xbf16>
    %cst_128 = arith.constant dense<0.000000e+00> : vector<16x4xf32>
    %268 = tpu.matmul %267, %6, %cst_128 {dimension_numbers = #tpu.dot_dimension_numbers<[1], [0], [0], [1], [0, 0, 1, 1], [], []>} : vector<16x9xbf16>, vector<9x4xbf16>, vector<16x4xf32> -> vector<16x4xf32>
    %269 = vector.broadcast %7 : vector<1x4xf32> to vector<16x4xf32>
    %270 = arith.mulf %268, %269 : vector<16x4xf32>
    %271 = vector.broadcast %8 : vector<1x4xf32> to vector<16x4xf32>
    %272 = arith.addf %270, %271 : vector<16x4xf32>
    %cst_129 = arith.constant 0.000000e+00 : f32
    %273 = vector.broadcast %cst_129 : f32 to vector<16x4xf32>
    %274 = arith.maximumf %272, %273 : vector<16x4xf32>
    %c9_130 = arith.constant 9 : index
    %c0_131 = arith.constant 0 : index
    %c0_132 = arith.constant 0 : index
    %275 = vector.load %arg12[%c9_130, %c0_131, %c0_132] : memref<18x18x1xf32, #tpu.memory_space<vmem>>, vector<1x18x1xf32>
    %276 = vector.shape_cast %275 : vector<1x18x1xf32> to vector<18x1xf32>
    %277 = vector.extract_strided_slice %276 {offsets = [0, 0], sizes = [16, 1], strides = [1, 1]} : vector<18x1xf32> to vector<16x1xf32>
    %278 = vector.extract_strided_slice %276 {offsets = [1, 0], sizes = [16, 1], strides = [1, 1]} : vector<18x1xf32> to vector<16x1xf32>
    %279 = vector.extract_strided_slice %276 {offsets = [2, 0], sizes = [16, 1], strides = [1, 1]} : vector<18x1xf32> to vector<16x1xf32>
    %c10_133 = arith.constant 10 : index
    %c0_134 = arith.constant 0 : index
    %c0_135 = arith.constant 0 : index
    %280 = vector.load %arg12[%c10_133, %c0_134, %c0_135] : memref<18x18x1xf32, #tpu.memory_space<vmem>>, vector<1x18x1xf32>
    %281 = vector.shape_cast %280 : vector<1x18x1xf32> to vector<18x1xf32>
    %282 = vector.extract_strided_slice %281 {offsets = [0, 0], sizes = [16, 1], strides = [1, 1]} : vector<18x1xf32> to vector<16x1xf32>
    %283 = vector.extract_strided_slice %281 {offsets = [1, 0], sizes = [16, 1], strides = [1, 1]} : vector<18x1xf32> to vector<16x1xf32>
    %284 = vector.extract_strided_slice %281 {offsets = [2, 0], sizes = [16, 1], strides = [1, 1]} : vector<18x1xf32> to vector<16x1xf32>
    %c11 = arith.constant 11 : index
    %c0_136 = arith.constant 0 : index
    %c0_137 = arith.constant 0 : index
    %285 = vector.load %arg12[%c11, %c0_136, %c0_137] : memref<18x18x1xf32, #tpu.memory_space<vmem>>, vector<1x18x1xf32>
    %286 = vector.shape_cast %285 : vector<1x18x1xf32> to vector<18x1xf32>
    %287 = vector.extract_strided_slice %286 {offsets = [0, 0], sizes = [16, 1], strides = [1, 1]} : vector<18x1xf32> to vector<16x1xf32>
    %288 = vector.extract_strided_slice %286 {offsets = [1, 0], sizes = [16, 1], strides = [1, 1]} : vector<18x1xf32> to vector<16x1xf32>
    %289 = vector.extract_strided_slice %286 {offsets = [2, 0], sizes = [16, 1], strides = [1, 1]} : vector<18x1xf32> to vector<16x1xf32>
    %290 = tpu.concatenate %277, %278, %279, %282, %283, %284, %287, %288, %289 in 1 : vector<16x1xf32>, vector<16x1xf32>, vector<16x1xf32>, vector<16x1xf32>, vector<16x1xf32>, vector<16x1xf32>, vector<16x1xf32>, vector<16x1xf32>, vector<16x1xf32> -> vector<16x9xf32>
    %291 = arith.truncf %290 : vector<16x9xf32> to vector<16x9xbf16>
    %cst_138 = arith.constant dense<0.000000e+00> : vector<16x4xf32>
    %292 = tpu.matmul %291, %6, %cst_138 {dimension_numbers = #tpu.dot_dimension_numbers<[1], [0], [0], [1], [0, 0, 1, 1], [], []>} : vector<16x9xbf16>, vector<9x4xbf16>, vector<16x4xf32> -> vector<16x4xf32>
    %293 = vector.broadcast %7 : vector<1x4xf32> to vector<16x4xf32>
    %294 = arith.mulf %292, %293 : vector<16x4xf32>
    %295 = vector.broadcast %8 : vector<1x4xf32> to vector<16x4xf32>
    %296 = arith.addf %294, %295 : vector<16x4xf32>
    %cst_139 = arith.constant 0.000000e+00 : f32
    %297 = vector.broadcast %cst_139 : f32 to vector<16x4xf32>
    %298 = arith.maximumf %296, %297 : vector<16x4xf32>
    %299 = arith.maximumf %274, %298 : vector<16x4xf32>
    %300 = arith.truncf %299 : vector<16x4xf32> to vector<16x4xbf16>
    %cst_140 = arith.constant dense<0.000000e+00> : vector<8x4xf32>
    %301 = tpu.matmul %18, %300, %cst_140 {dimension_numbers = #tpu.dot_dimension_numbers<[1], [0], [0], [1], [0, 0, 1, 1], [], []>} : vector<8x16xbf16>, vector<16x4xbf16>, vector<8x4xf32> -> vector<8x4xf32>
    %cst_141 = arith.constant dense<0.000000e+00> : vector<8x4xf32>
    %302 = tpu.matmul %26, %300, %cst_141 {dimension_numbers = #tpu.dot_dimension_numbers<[1], [0], [0], [1], [0, 0, 1, 1], [], []>} : vector<8x16xbf16>, vector<16x4xbf16>, vector<8x4xf32> -> vector<8x4xf32>
    %303 = arith.maximumf %301, %302 : vector<8x4xf32>
    %c5_142 = arith.constant 5 : index
    %c1_143 = arith.constant 1 : index
    %c0_144 = arith.constant 0 : index
    %304 = vector.load %arg13[%c5_142, %c1_143, %c0_144] : memref<10x10x4xf32, #tpu.memory_space<vmem>>, vector<1x8x4xf32>
    %305 = vector.shape_cast %304 : vector<1x8x4xf32> to vector<8x4xf32>
    %306 = vector.shape_cast %303 : vector<8x4xf32> to vector<1x8x4xf32>
    tpu.vector_store %arg13[%c5_142, %c1_143, %c0_144], %306 {strides = array<i32>} : memref<10x10x4xf32, #tpu.memory_space<vmem>>, vector<1x8x4xf32>,
    %c10_145 = arith.constant 10 : index
    %c0_146 = arith.constant 0 : index
    %c0_147 = arith.constant 0 : index
    %307 = vector.load %arg12[%c10_145, %c0_146, %c0_147] : memref<18x18x1xf32, #tpu.memory_space<vmem>>, vector<1x18x1xf32>
    %308 = vector.shape_cast %307 : vector<1x18x1xf32> to vector<18x1xf32>
    %309 = vector.extract_strided_slice %308 {offsets = [0, 0], sizes = [16, 1], strides = [1, 1]} : vector<18x1xf32> to vector<16x1xf32>
    %310 = vector.extract_strided_slice %308 {offsets = [1, 0], sizes = [16, 1], strides = [1, 1]} : vector<18x1xf32> to vector<16x1xf32>
    %311 = vector.extract_strided_slice %308 {offsets = [2, 0], sizes = [16, 1], strides = [1, 1]} : vector<18x1xf32> to vector<16x1xf32>
    %c11_148 = arith.constant 11 : index
    %c0_149 = arith.constant 0 : index
    %c0_150 = arith.constant 0 : index
    %312 = vector.load %arg12[%c11_148, %c0_149, %c0_150] : memref<18x18x1xf32, #tpu.memory_space<vmem>>, vector<1x18x1xf32>
    %313 = vector.shape_cast %312 : vector<1x18x1xf32> to vector<18x1xf32>
    %314 = vector.extract_strided_slice %313 {offsets = [0, 0], sizes = [16, 1], strides = [1, 1]} : vector<18x1xf32> to vector<16x1xf32>
    %315 = vector.extract_strided_slice %313 {offsets = [1, 0], sizes = [16, 1], strides = [1, 1]} : vector<18x1xf32> to vector<16x1xf32>
    %316 = vector.extract_strided_slice %313 {offsets = [2, 0], sizes = [16, 1], strides = [1, 1]} : vector<18x1xf32> to vector<16x1xf32>
    %c12 = arith.constant 12 : index
    %c0_151 = arith.constant 0 : index
    %c0_152 = arith.constant 0 : index
    %317 = vector.load %arg12[%c12, %c0_151, %c0_152] : memref<18x18x1xf32, #tpu.memory_space<vmem>>, vector<1x18x1xf32>
    %318 = vector.shape_cast %317 : vector<1x18x1xf32> to vector<18x1xf32>
    %319 = vector.extract_strided_slice %318 {offsets = [0, 0], sizes = [16, 1], strides = [1, 1]} : vector<18x1xf32> to vector<16x1xf32>
    %320 = vector.extract_strided_slice %318 {offsets = [1, 0], sizes = [16, 1], strides = [1, 1]} : vector<18x1xf32> to vector<16x1xf32>
    %321 = vector.extract_strided_slice %318 {offsets = [2, 0], sizes = [16, 1], strides = [1, 1]} : vector<18x1xf32> to vector<16x1xf32>
    %322 = tpu.concatenate %309, %310, %311, %314, %315, %316, %319, %320, %321 in 1 : vector<16x1xf32>, vector<16x1xf32>, vector<16x1xf32>, vector<16x1xf32>, vector<16x1xf32>, vector<16x1xf32>, vector<16x1xf32>, vector<16x1xf32>, vector<16x1xf32> -> vector<16x9xf32>
    %323 = arith.truncf %322 : vector<16x9xf32> to vector<16x9xbf16>
    %cst_153 = arith.constant dense<0.000000e+00> : vector<16x4xf32>
    %324 = tpu.matmul %323, %6, %cst_153 {dimension_numbers = #tpu.dot_dimension_numbers<[1], [0], [0], [1], [0, 0, 1, 1], [], []>} : vector<16x9xbf16>, vector<9x4xbf16>, vector<16x4xf32> -> vector<16x4xf32>
    %325 = vector.broadcast %7 : vector<1x4xf32> to vector<16x4xf32>
    %326 = arith.mulf %324, %325 : vector<16x4xf32>
    %327 = vector.broadcast %8 : vector<1x4xf32> to vector<16x4xf32>
    %328 = arith.addf %326, %327 : vector<16x4xf32>
    %cst_154 = arith.constant 0.000000e+00 : f32
    %329 = vector.broadcast %cst_154 : f32 to vector<16x4xf32>
    %330 = arith.maximumf %328, %329 : vector<16x4xf32>
    %c11_155 = arith.constant 11 : index
    %c0_156 = arith.constant 0 : index
    %c0_157 = arith.constant 0 : index
    %331 = vector.load %arg12[%c11_155, %c0_156, %c0_157] : memref<18x18x1xf32, #tpu.memory_space<vmem>>, vector<1x18x1xf32>
    %332 = vector.shape_cast %331 : vector<1x18x1xf32> to vector<18x1xf32>
    %333 = vector.extract_strided_slice %332 {offsets = [0, 0], sizes = [16, 1], strides = [1, 1]} : vector<18x1xf32> to vector<16x1xf32>
    %334 = vector.extract_strided_slice %332 {offsets = [1, 0], sizes = [16, 1], strides = [1, 1]} : vector<18x1xf32> to vector<16x1xf32>
    %335 = vector.extract_strided_slice %332 {offsets = [2, 0], sizes = [16, 1], strides = [1, 1]} : vector<18x1xf32> to vector<16x1xf32>
    %c12_158 = arith.constant 12 : index
    %c0_159 = arith.constant 0 : index
    %c0_160 = arith.constant 0 : index
    %336 = vector.load %arg12[%c12_158, %c0_159, %c0_160] : memref<18x18x1xf32, #tpu.memory_space<vmem>>, vector<1x18x1xf32>
    %337 = vector.shape_cast %336 : vector<1x18x1xf32> to vector<18x1xf32>
    %338 = vector.extract_strided_slice %337 {offsets = [0, 0], sizes = [16, 1], strides = [1, 1]} : vector<18x1xf32> to vector<16x1xf32>
    %339 = vector.extract_strided_slice %337 {offsets = [1, 0], sizes = [16, 1], strides = [1, 1]} : vector<18x1xf32> to vector<16x1xf32>
    %340 = vector.extract_strided_slice %337 {offsets = [2, 0], sizes = [16, 1], strides = [1, 1]} : vector<18x1xf32> to vector<16x1xf32>
    %c13 = arith.constant 13 : index
    %c0_161 = arith.constant 0 : index
    %c0_162 = arith.constant 0 : index
    %341 = vector.load %arg12[%c13, %c0_161, %c0_162] : memref<18x18x1xf32, #tpu.memory_space<vmem>>, vector<1x18x1xf32>
    %342 = vector.shape_cast %341 : vector<1x18x1xf32> to vector<18x1xf32>
    %343 = vector.extract_strided_slice %342 {offsets = [0, 0], sizes = [16, 1], strides = [1, 1]} : vector<18x1xf32> to vector<16x1xf32>
    %344 = vector.extract_strided_slice %342 {offsets = [1, 0], sizes = [16, 1], strides = [1, 1]} : vector<18x1xf32> to vector<16x1xf32>
    %345 = vector.extract_strided_slice %342 {offsets = [2, 0], sizes = [16, 1], strides = [1, 1]} : vector<18x1xf32> to vector<16x1xf32>
    %346 = tpu.concatenate %333, %334, %335, %338, %339, %340, %343, %344, %345 in 1 : vector<16x1xf32>, vector<16x1xf32>, vector<16x1xf32>, vector<16x1xf32>, vector<16x1xf32>, vector<16x1xf32>, vector<16x1xf32>, vector<16x1xf32>, vector<16x1xf32> -> vector<16x9xf32>
    %347 = arith.truncf %346 : vector<16x9xf32> to vector<16x9xbf16>
    %cst_163 = arith.constant dense<0.000000e+00> : vector<16x4xf32>
    %348 = tpu.matmul %347, %6, %cst_163 {dimension_numbers = #tpu.dot_dimension_numbers<[1], [0], [0], [1], [0, 0, 1, 1], [], []>} : vector<16x9xbf16>, vector<9x4xbf16>, vector<16x4xf32> -> vector<16x4xf32>
    %349 = vector.broadcast %7 : vector<1x4xf32> to vector<16x4xf32>
    %350 = arith.mulf %348, %349 : vector<16x4xf32>
    %351 = vector.broadcast %8 : vector<1x4xf32> to vector<16x4xf32>
    %352 = arith.addf %350, %351 : vector<16x4xf32>
    %cst_164 = arith.constant 0.000000e+00 : f32
    %353 = vector.broadcast %cst_164 : f32 to vector<16x4xf32>
    %354 = arith.maximumf %352, %353 : vector<16x4xf32>
    %355 = arith.maximumf %330, %354 : vector<16x4xf32>
    %356 = arith.truncf %355 : vector<16x4xf32> to vector<16x4xbf16>
    %cst_165 = arith.constant dense<0.000000e+00> : vector<8x4xf32>
    %357 = tpu.matmul %18, %356, %cst_165 {dimension_numbers = #tpu.dot_dimension_numbers<[1], [0], [0], [1], [0, 0, 1, 1], [], []>} : vector<8x16xbf16>, vector<16x4xbf16>, vector<8x4xf32> -> vector<8x4xf32>
    %cst_166 = arith.constant dense<0.000000e+00> : vector<8x4xf32>
    %358 = tpu.matmul %26, %356, %cst_166 {dimension_numbers = #tpu.dot_dimension_numbers<[1], [0], [0], [1], [0, 0, 1, 1], [], []>} : vector<8x16xbf16>, vector<16x4xbf16>, vector<8x4xf32> -> vector<8x4xf32>
    %359 = arith.maximumf %357, %358 : vector<8x4xf32>
    %c6_167 = arith.constant 6 : index
    %c1_168 = arith.constant 1 : index
    %c0_169 = arith.constant 0 : index
    %360 = vector.load %arg13[%c6_167, %c1_168, %c0_169] : memref<10x10x4xf32, #tpu.memory_space<vmem>>, vector<1x8x4xf32>
    %361 = vector.shape_cast %360 : vector<1x8x4xf32> to vector<8x4xf32>
    %362 = vector.shape_cast %359 : vector<8x4xf32> to vector<1x8x4xf32>
    tpu.vector_store %arg13[%c6_167, %c1_168, %c0_169], %362 {strides = array<i32>} : memref<10x10x4xf32, #tpu.memory_space<vmem>>, vector<1x8x4xf32>,
    %c12_170 = arith.constant 12 : index
    %c0_171 = arith.constant 0 : index
    %c0_172 = arith.constant 0 : index
    %363 = vector.load %arg12[%c12_170, %c0_171, %c0_172] : memref<18x18x1xf32, #tpu.memory_space<vmem>>, vector<1x18x1xf32>
    %364 = vector.shape_cast %363 : vector<1x18x1xf32> to vector<18x1xf32>
    %365 = vector.extract_strided_slice %364 {offsets = [0, 0], sizes = [16, 1], strides = [1, 1]} : vector<18x1xf32> to vector<16x1xf32>
    %366 = vector.extract_strided_slice %364 {offsets = [1, 0], sizes = [16, 1], strides = [1, 1]} : vector<18x1xf32> to vector<16x1xf32>
    %367 = vector.extract_strided_slice %364 {offsets = [2, 0], sizes = [16, 1], strides = [1, 1]} : vector<18x1xf32> to vector<16x1xf32>
    %c13_173 = arith.constant 13 : index
    %c0_174 = arith.constant 0 : index
    %c0_175 = arith.constant 0 : index
    %368 = vector.load %arg12[%c13_173, %c0_174, %c0_175] : memref<18x18x1xf32, #tpu.memory_space<vmem>>, vector<1x18x1xf32>
    %369 = vector.shape_cast %368 : vector<1x18x1xf32> to vector<18x1xf32>
    %370 = vector.extract_strided_slice %369 {offsets = [0, 0], sizes = [16, 1], strides = [1, 1]} : vector<18x1xf32> to vector<16x1xf32>
    %371 = vector.extract_strided_slice %369 {offsets = [1, 0], sizes = [16, 1], strides = [1, 1]} : vector<18x1xf32> to vector<16x1xf32>
    %372 = vector.extract_strided_slice %369 {offsets = [2, 0], sizes = [16, 1], strides = [1, 1]} : vector<18x1xf32> to vector<16x1xf32>
    %c14 = arith.constant 14 : index
    %c0_176 = arith.constant 0 : index
    %c0_177 = arith.constant 0 : index
    %373 = vector.load %arg12[%c14, %c0_176, %c0_177] : memref<18x18x1xf32, #tpu.memory_space<vmem>>, vector<1x18x1xf32>
    %374 = vector.shape_cast %373 : vector<1x18x1xf32> to vector<18x1xf32>
    %375 = vector.extract_strided_slice %374 {offsets = [0, 0], sizes = [16, 1], strides = [1, 1]} : vector<18x1xf32> to vector<16x1xf32>
    %376 = vector.extract_strided_slice %374 {offsets = [1, 0], sizes = [16, 1], strides = [1, 1]} : vector<18x1xf32> to vector<16x1xf32>
    %377 = vector.extract_strided_slice %374 {offsets = [2, 0], sizes = [16, 1], strides = [1, 1]} : vector<18x1xf32> to vector<16x1xf32>
    %378 = tpu.concatenate %365, %366, %367, %370, %371, %372, %375, %376, %377 in 1 : vector<16x1xf32>, vector<16x1xf32>, vector<16x1xf32>, vector<16x1xf32>, vector<16x1xf32>, vector<16x1xf32>, vector<16x1xf32>, vector<16x1xf32>, vector<16x1xf32> -> vector<16x9xf32>
    %379 = arith.truncf %378 : vector<16x9xf32> to vector<16x9xbf16>
    %cst_178 = arith.constant dense<0.000000e+00> : vector<16x4xf32>
    %380 = tpu.matmul %379, %6, %cst_178 {dimension_numbers = #tpu.dot_dimension_numbers<[1], [0], [0], [1], [0, 0, 1, 1], [], []>} : vector<16x9xbf16>, vector<9x4xbf16>, vector<16x4xf32> -> vector<16x4xf32>
    %381 = vector.broadcast %7 : vector<1x4xf32> to vector<16x4xf32>
    %382 = arith.mulf %380, %381 : vector<16x4xf32>
    %383 = vector.broadcast %8 : vector<1x4xf32> to vector<16x4xf32>
    %384 = arith.addf %382, %383 : vector<16x4xf32>
    %cst_179 = arith.constant 0.000000e+00 : f32
    %385 = vector.broadcast %cst_179 : f32 to vector<16x4xf32>
    %386 = arith.maximumf %384, %385 : vector<16x4xf32>
    %c13_180 = arith.constant 13 : index
    %c0_181 = arith.constant 0 : index
    %c0_182 = arith.constant 0 : index
    %387 = vector.load %arg12[%c13_180, %c0_181, %c0_182] : memref<18x18x1xf32, #tpu.memory_space<vmem>>, vector<1x18x1xf32>
    %388 = vector.shape_cast %387 : vector<1x18x1xf32> to vector<18x1xf32>
    %389 = vector.extract_strided_slice %388 {offsets = [0, 0], sizes = [16, 1], strides = [1, 1]} : vector<18x1xf32> to vector<16x1xf32>
    %390 = vector.extract_strided_slice %388 {offsets = [1, 0], sizes = [16, 1], strides = [1, 1]} : vector<18x1xf32> to vector<16x1xf32>
    %391 = vector.extract_strided_slice %388 {offsets = [2, 0], sizes = [16, 1], strides = [1, 1]} : vector<18x1xf32> to vector<16x1xf32>
    %c14_183 = arith.constant 14 : index
    %c0_184 = arith.constant 0 : index
    %c0_185 = arith.constant 0 : index
    %392 = vector.load %arg12[%c14_183, %c0_184, %c0_185] : memref<18x18x1xf32, #tpu.memory_space<vmem>>, vector<1x18x1xf32>
    %393 = vector.shape_cast %392 : vector<1x18x1xf32> to vector<18x1xf32>
    %394 = vector.extract_strided_slice %393 {offsets = [0, 0], sizes = [16, 1], strides = [1, 1]} : vector<18x1xf32> to vector<16x1xf32>
    %395 = vector.extract_strided_slice %393 {offsets = [1, 0], sizes = [16, 1], strides = [1, 1]} : vector<18x1xf32> to vector<16x1xf32>
    %396 = vector.extract_strided_slice %393 {offsets = [2, 0], sizes = [16, 1], strides = [1, 1]} : vector<18x1xf32> to vector<16x1xf32>
    %c15 = arith.constant 15 : index
    %c0_186 = arith.constant 0 : index
    %c0_187 = arith.constant 0 : index
    %397 = vector.load %arg12[%c15, %c0_186, %c0_187] : memref<18x18x1xf32, #tpu.memory_space<vmem>>, vector<1x18x1xf32>
    %398 = vector.shape_cast %397 : vector<1x18x1xf32> to vector<18x1xf32>
    %399 = vector.extract_strided_slice %398 {offsets = [0, 0], sizes = [16, 1], strides = [1, 1]} : vector<18x1xf32> to vector<16x1xf32>
    %400 = vector.extract_strided_slice %398 {offsets = [1, 0], sizes = [16, 1], strides = [1, 1]} : vector<18x1xf32> to vector<16x1xf32>
    %401 = vector.extract_strided_slice %398 {offsets = [2, 0], sizes = [16, 1], strides = [1, 1]} : vector<18x1xf32> to vector<16x1xf32>
    %402 = tpu.concatenate %389, %390, %391, %394, %395, %396, %399, %400, %401 in 1 : vector<16x1xf32>, vector<16x1xf32>, vector<16x1xf32>, vector<16x1xf32>, vector<16x1xf32>, vector<16x1xf32>, vector<16x1xf32>, vector<16x1xf32>, vector<16x1xf32> -> vector<16x9xf32>
    %403 = arith.truncf %402 : vector<16x9xf32> to vector<16x9xbf16>
    %cst_188 = arith.constant dense<0.000000e+00> : vector<16x4xf32>
    %404 = tpu.matmul %403, %6, %cst_188 {dimension_numbers = #tpu.dot_dimension_numbers<[1], [0], [0], [1], [0, 0, 1, 1], [], []>} : vector<16x9xbf16>, vector<9x4xbf16>, vector<16x4xf32> -> vector<16x4xf32>
    %405 = vector.broadcast %7 : vector<1x4xf32> to vector<16x4xf32>
    %406 = arith.mulf %404, %405 : vector<16x4xf32>
    %407 = vector.broadcast %8 : vector<1x4xf32> to vector<16x4xf32>
    %408 = arith.addf %406, %407 : vector<16x4xf32>
    %cst_189 = arith.constant 0.000000e+00 : f32
    %409 = vector.broadcast %cst_189 : f32 to vector<16x4xf32>
    %410 = arith.maximumf %408, %409 : vector<16x4xf32>
    %411 = arith.maximumf %386, %410 : vector<16x4xf32>
    %412 = arith.truncf %411 : vector<16x4xf32> to vector<16x4xbf16>
    %cst_190 = arith.constant dense<0.000000e+00> : vector<8x4xf32>
    %413 = tpu.matmul %18, %412, %cst_190 {dimension_numbers = #tpu.dot_dimension_numbers<[1], [0], [0], [1], [0, 0, 1, 1], [], []>} : vector<8x16xbf16>, vector<16x4xbf16>, vector<8x4xf32> -> vector<8x4xf32>
    %cst_191 = arith.constant dense<0.000000e+00> : vector<8x4xf32>
    %414 = tpu.matmul %26, %412, %cst_191 {dimension_numbers = #tpu.dot_dimension_numbers<[1], [0], [0], [1], [0, 0, 1, 1], [], []>} : vector<8x16xbf16>, vector<16x4xbf16>, vector<8x4xf32> -> vector<8x4xf32>
    %415 = arith.maximumf %413, %414 : vector<8x4xf32>
    %c7_192 = arith.constant 7 : index
    %c1_193 = arith.constant 1 : index
    %c0_194 = arith.constant 0 : index
    %416 = vector.load %arg13[%c7_192, %c1_193, %c0_194] : memref<10x10x4xf32, #tpu.memory_space<vmem>>, vector<1x8x4xf32>
    %417 = vector.shape_cast %416 : vector<1x8x4xf32> to vector<8x4xf32>
    %418 = vector.shape_cast %415 : vector<8x4xf32> to vector<1x8x4xf32>
    tpu.vector_store %arg13[%c7_192, %c1_193, %c0_194], %418 {strides = array<i32>} : memref<10x10x4xf32, #tpu.memory_space<vmem>>, vector<1x8x4xf32>,
    %c14_195 = arith.constant 14 : index
    %c0_196 = arith.constant 0 : index
    %c0_197 = arith.constant 0 : index
    %419 = vector.load %arg12[%c14_195, %c0_196, %c0_197] : memref<18x18x1xf32, #tpu.memory_space<vmem>>, vector<1x18x1xf32>
    %420 = vector.shape_cast %419 : vector<1x18x1xf32> to vector<18x1xf32>
    %421 = vector.extract_strided_slice %420 {offsets = [0, 0], sizes = [16, 1], strides = [1, 1]} : vector<18x1xf32> to vector<16x1xf32>
    %422 = vector.extract_strided_slice %420 {offsets = [1, 0], sizes = [16, 1], strides = [1, 1]} : vector<18x1xf32> to vector<16x1xf32>
    %423 = vector.extract_strided_slice %420 {offsets = [2, 0], sizes = [16, 1], strides = [1, 1]} : vector<18x1xf32> to vector<16x1xf32>
    %c15_198 = arith.constant 15 : index
    %c0_199 = arith.constant 0 : index
    %c0_200 = arith.constant 0 : index
    %424 = vector.load %arg12[%c15_198, %c0_199, %c0_200] : memref<18x18x1xf32, #tpu.memory_space<vmem>>, vector<1x18x1xf32>
    %425 = vector.shape_cast %424 : vector<1x18x1xf32> to vector<18x1xf32>
    %426 = vector.extract_strided_slice %425 {offsets = [0, 0], sizes = [16, 1], strides = [1, 1]} : vector<18x1xf32> to vector<16x1xf32>
    %427 = vector.extract_strided_slice %425 {offsets = [1, 0], sizes = [16, 1], strides = [1, 1]} : vector<18x1xf32> to vector<16x1xf32>
    %428 = vector.extract_strided_slice %425 {offsets = [2, 0], sizes = [16, 1], strides = [1, 1]} : vector<18x1xf32> to vector<16x1xf32>
    %c16 = arith.constant 16 : index
    %c0_201 = arith.constant 0 : index
    %c0_202 = arith.constant 0 : index
    %429 = vector.load %arg12[%c16, %c0_201, %c0_202] : memref<18x18x1xf32, #tpu.memory_space<vmem>>, vector<1x18x1xf32>
    %430 = vector.shape_cast %429 : vector<1x18x1xf32> to vector<18x1xf32>
    %431 = vector.extract_strided_slice %430 {offsets = [0, 0], sizes = [16, 1], strides = [1, 1]} : vector<18x1xf32> to vector<16x1xf32>
    %432 = vector.extract_strided_slice %430 {offsets = [1, 0], sizes = [16, 1], strides = [1, 1]} : vector<18x1xf32> to vector<16x1xf32>
    %433 = vector.extract_strided_slice %430 {offsets = [2, 0], sizes = [16, 1], strides = [1, 1]} : vector<18x1xf32> to vector<16x1xf32>
    %434 = tpu.concatenate %421, %422, %423, %426, %427, %428, %431, %432, %433 in 1 : vector<16x1xf32>, vector<16x1xf32>, vector<16x1xf32>, vector<16x1xf32>, vector<16x1xf32>, vector<16x1xf32>, vector<16x1xf32>, vector<16x1xf32>, vector<16x1xf32> -> vector<16x9xf32>
    %435 = arith.truncf %434 : vector<16x9xf32> to vector<16x9xbf16>
    %cst_203 = arith.constant dense<0.000000e+00> : vector<16x4xf32>
    %436 = tpu.matmul %435, %6, %cst_203 {dimension_numbers = #tpu.dot_dimension_numbers<[1], [0], [0], [1], [0, 0, 1, 1], [], []>} : vector<16x9xbf16>, vector<9x4xbf16>, vector<16x4xf32> -> vector<16x4xf32>
    %437 = vector.broadcast %7 : vector<1x4xf32> to vector<16x4xf32>
    %438 = arith.mulf %436, %437 : vector<16x4xf32>
    %439 = vector.broadcast %8 : vector<1x4xf32> to vector<16x4xf32>
    %440 = arith.addf %438, %439 : vector<16x4xf32>
    %cst_204 = arith.constant 0.000000e+00 : f32
    %441 = vector.broadcast %cst_204 : f32 to vector<16x4xf32>
    %442 = arith.maximumf %440, %441 : vector<16x4xf32>
    %c15_205 = arith.constant 15 : index
    %c0_206 = arith.constant 0 : index
    %c0_207 = arith.constant 0 : index
    %443 = vector.load %arg12[%c15_205, %c0_206, %c0_207] : memref<18x18x1xf32, #tpu.memory_space<vmem>>, vector<1x18x1xf32>
    %444 = vector.shape_cast %443 : vector<1x18x1xf32> to vector<18x1xf32>
    %445 = vector.extract_strided_slice %444 {offsets = [0, 0], sizes = [16, 1], strides = [1, 1]} : vector<18x1xf32> to vector<16x1xf32>
    %446 = vector.extract_strided_slice %444 {offsets = [1, 0], sizes = [16, 1], strides = [1, 1]} : vector<18x1xf32> to vector<16x1xf32>
    %447 = vector.extract_strided_slice %444 {offsets = [2, 0], sizes = [16, 1], strides = [1, 1]} : vector<18x1xf32> to vector<16x1xf32>
    %c16_208 = arith.constant 16 : index
    %c0_209 = arith.constant 0 : index
    %c0_210 = arith.constant 0 : index
    %448 = vector.load %arg12[%c16_208, %c0_209, %c0_210] : memref<18x18x1xf32, #tpu.memory_space<vmem>>, vector<1x18x1xf32>
    %449 = vector.shape_cast %448 : vector<1x18x1xf32> to vector<18x1xf32>
    %450 = vector.extract_strided_slice %449 {offsets = [0, 0], sizes = [16, 1], strides = [1, 1]} : vector<18x1xf32> to vector<16x1xf32>
    %451 = vector.extract_strided_slice %449 {offsets = [1, 0], sizes = [16, 1], strides = [1, 1]} : vector<18x1xf32> to vector<16x1xf32>
    %452 = vector.extract_strided_slice %449 {offsets = [2, 0], sizes = [16, 1], strides = [1, 1]} : vector<18x1xf32> to vector<16x1xf32>
    %c17 = arith.constant 17 : index
    %c0_211 = arith.constant 0 : index
    %c0_212 = arith.constant 0 : index
    %453 = vector.load %arg12[%c17, %c0_211, %c0_212] : memref<18x18x1xf32, #tpu.memory_space<vmem>>, vector<1x18x1xf32>
    %454 = vector.shape_cast %453 : vector<1x18x1xf32> to vector<18x1xf32>
    %455 = vector.extract_strided_slice %454 {offsets = [0, 0], sizes = [16, 1], strides = [1, 1]} : vector<18x1xf32> to vector<16x1xf32>
    %456 = vector.extract_strided_slice %454 {offsets = [1, 0], sizes = [16, 1], strides = [1, 1]} : vector<18x1xf32> to vector<16x1xf32>
    %457 = vector.extract_strided_slice %454 {offsets = [2, 0], sizes = [16, 1], strides = [1, 1]} : vector<18x1xf32> to vector<16x1xf32>
    %458 = tpu.concatenate %445, %446, %447, %450, %451, %452, %455, %456, %457 in 1 : vector<16x1xf32>, vector<16x1xf32>, vector<16x1xf32>, vector<16x1xf32>, vector<16x1xf32>, vector<16x1xf32>, vector<16x1xf32>, vector<16x1xf32>, vector<16x1xf32> -> vector<16x9xf32>
    %459 = arith.truncf %458 : vector<16x9xf32> to vector<16x9xbf16>
    %cst_213 = arith.constant dense<0.000000e+00> : vector<16x4xf32>
    %460 = tpu.matmul %459, %6, %cst_213 {dimension_numbers = #tpu.dot_dimension_numbers<[1], [0], [0], [1], [0, 0, 1, 1], [], []>} : vector<16x9xbf16>, vector<9x4xbf16>, vector<16x4xf32> -> vector<16x4xf32>
    %461 = vector.broadcast %7 : vector<1x4xf32> to vector<16x4xf32>
    %462 = arith.mulf %460, %461 : vector<16x4xf32>
    %463 = vector.broadcast %8 : vector<1x4xf32> to vector<16x4xf32>
    %464 = arith.addf %462, %463 : vector<16x4xf32>
    %cst_214 = arith.constant 0.000000e+00 : f32
    %465 = vector.broadcast %cst_214 : f32 to vector<16x4xf32>
    %466 = arith.maximumf %464, %465 : vector<16x4xf32>
    %467 = arith.maximumf %442, %466 : vector<16x4xf32>
    %468 = arith.truncf %467 : vector<16x4xf32> to vector<16x4xbf16>
    %cst_215 = arith.constant dense<0.000000e+00> : vector<8x4xf32>
    %469 = tpu.matmul %18, %468, %cst_215 {dimension_numbers = #tpu.dot_dimension_numbers<[1], [0], [0], [1], [0, 0, 1, 1], [], []>} : vector<8x16xbf16>, vector<16x4xbf16>, vector<8x4xf32> -> vector<8x4xf32>
    %cst_216 = arith.constant dense<0.000000e+00> : vector<8x4xf32>
    %470 = tpu.matmul %26, %468, %cst_216 {dimension_numbers = #tpu.dot_dimension_numbers<[1], [0], [0], [1], [0, 0, 1, 1], [], []>} : vector<8x16xbf16>, vector<16x4xbf16>, vector<8x4xf32> -> vector<8x4xf32>
    %471 = arith.maximumf %469, %470 : vector<8x4xf32>
    %c8_217 = arith.constant 8 : index
    %c1_218 = arith.constant 1 : index
    %c0_219 = arith.constant 0 : index
    %472 = vector.load %arg13[%c8_217, %c1_218, %c0_219] : memref<10x10x4xf32, #tpu.memory_space<vmem>>, vector<1x8x4xf32>
    %473 = vector.shape_cast %472 : vector<1x8x4xf32> to vector<8x4xf32>
    %474 = vector.shape_cast %471 : vector<8x4xf32> to vector<1x8x4xf32>
    tpu.vector_store %arg13[%c8_217, %c1_218, %c0_219], %474 {strides = array<i32>} : memref<10x10x4xf32, #tpu.memory_space<vmem>>, vector<1x8x4xf32>,
    %c0_220 = arith.constant 0 : index
    %c0_221 = arith.constant 0 : index
    %475 = vector.load %arg5[%c0_220, %c0_221] : memref<36x8xbf16, #tpu.memory_space<vmem>>, vector<36x8xbf16>
    %c0_222 = arith.constant 0 : index
    %c0_223 = arith.constant 0 : index
    %476 = vector.load %arg6[%c0_222, %c0_223] : memref<1x8xf32, #tpu.memory_space<vmem>>, vector<1x8xf32>
    %c0_224 = arith.constant 0 : index
    %c0_225 = arith.constant 0 : index
    %477 = vector.load %arg7[%c0_224, %c0_225] : memref<1x8xf32, #tpu.memory_space<vmem>>, vector<1x8xf32>
    %478 = tpu.iota {dimensions = array<i32: 0>} : vector<4x8xi32>
    %479 = tpu.iota {dimensions = array<i32: 1>} : vector<4x8xi32>
    %c2_i32_226 = arith.constant 2 : i32
    %480 = vector.broadcast %c2_i32_226 : i32 to vector<4x8xi32>
    %481 = arith.muli %480, %478 : vector<4x8xi32>
    %482 = arith.cmpi eq, %479, %481 : vector<4x8xi32>
    %483 = arith.extui %482 : vector<4x8xi1> to vector<4x8xi32>
    %484 = arith.sitofp %483 : vector<4x8xi32> to vector<4x8xf32>
    %485 = arith.truncf %484 : vector<4x8xf32> to vector<4x8xbf16>
    %c2_i32_227 = arith.constant 2 : i32
    %486 = vector.broadcast %c2_i32_227 : i32 to vector<4x8xi32>
    %487 = arith.muli %486, %478 : vector<4x8xi32>
    %c1_i32_228 = arith.constant 1 : i32
    %488 = vector.broadcast %c1_i32_228 : i32 to vector<4x8xi32>
    %489 = arith.addi %487, %488 : vector<4x8xi32>
    %490 = arith.cmpi eq, %479, %489 : vector<4x8xi32>
    %491 = arith.extui %490 : vector<4x8xi1> to vector<4x8xi32>
    %492 = arith.sitofp %491 : vector<4x8xi32> to vector<4x8xf32>
    %493 = arith.truncf %492 : vector<4x8xf32> to vector<4x8xbf16>
    %c0_229 = arith.constant 0 : index
    %c0_230 = arith.constant 0 : index
    %c0_231 = arith.constant 0 : index
    %494 = vector.load %arg13[%c0_229, %c0_230, %c0_231] : memref<10x10x4xf32, #tpu.memory_space<vmem>>, vector<1x10x4xf32>
    %495 = vector.shape_cast %494 : vector<1x10x4xf32> to vector<10x4xf32>
    %496 = vector.extract_strided_slice %495 {offsets = [0, 0], sizes = [8, 4], strides = [1, 1]} : vector<10x4xf32> to vector<8x4xf32>
    %497 = vector.extract_strided_slice %495 {offsets = [1, 0], sizes = [8, 4], strides = [1, 1]} : vector<10x4xf32> to vector<8x4xf32>
    %498 = vector.extract_strided_slice %495 {offsets = [2, 0], sizes = [8, 4], strides = [1, 1]} : vector<10x4xf32> to vector<8x4xf32>
    %c1_232 = arith.constant 1 : index
    %c0_233 = arith.constant 0 : index
    %c0_234 = arith.constant 0 : index
    %499 = vector.load %arg13[%c1_232, %c0_233, %c0_234] : memref<10x10x4xf32, #tpu.memory_space<vmem>>, vector<1x10x4xf32>
    %500 = vector.shape_cast %499 : vector<1x10x4xf32> to vector<10x4xf32>
    %501 = vector.extract_strided_slice %500 {offsets = [0, 0], sizes = [8, 4], strides = [1, 1]} : vector<10x4xf32> to vector<8x4xf32>
    %502 = vector.extract_strided_slice %500 {offsets = [1, 0], sizes = [8, 4], strides = [1, 1]} : vector<10x4xf32> to vector<8x4xf32>
    %503 = vector.extract_strided_slice %500 {offsets = [2, 0], sizes = [8, 4], strides = [1, 1]} : vector<10x4xf32> to vector<8x4xf32>
    %c2_235 = arith.constant 2 : index
    %c0_236 = arith.constant 0 : index
    %c0_237 = arith.constant 0 : index
    %504 = vector.load %arg13[%c2_235, %c0_236, %c0_237] : memref<10x10x4xf32, #tpu.memory_space<vmem>>, vector<1x10x4xf32>
    %505 = vector.shape_cast %504 : vector<1x10x4xf32> to vector<10x4xf32>
    %506 = vector.extract_strided_slice %505 {offsets = [0, 0], sizes = [8, 4], strides = [1, 1]} : vector<10x4xf32> to vector<8x4xf32>
    %507 = vector.extract_strided_slice %505 {offsets = [1, 0], sizes = [8, 4], strides = [1, 1]} : vector<10x4xf32> to vector<8x4xf32>
    %508 = vector.extract_strided_slice %505 {offsets = [2, 0], sizes = [8, 4], strides = [1, 1]} : vector<10x4xf32> to vector<8x4xf32>
    %509 = tpu.concatenate %496, %497, %498, %501, %502, %503, %506, %507, %508 in 1 : vector<8x4xf32>, vector<8x4xf32>, vector<8x4xf32>, vector<8x4xf32>, vector<8x4xf32>, vector<8x4xf32>, vector<8x4xf32>, vector<8x4xf32>, vector<8x4xf32> -> vector<8x36xf32>
    %510 = arith.truncf %509 : vector<8x36xf32> to vector<8x36xbf16>
    %cst_238 = arith.constant dense<0.000000e+00> : vector<8x8xf32>
    %511 = tpu.matmul %510, %475, %cst_238 {dimension_numbers = #tpu.dot_dimension_numbers<[1], [0], [0], [1], [0, 0, 1, 1], [], []>} : vector<8x36xbf16>, vector<36x8xbf16>, vector<8x8xf32> -> vector<8x8xf32>
    %512 = vector.broadcast %476 : vector<1x8xf32> to vector<8x8xf32>
    %513 = arith.mulf %511, %512 : vector<8x8xf32>
    %514 = vector.broadcast %477 : vector<1x8xf32> to vector<8x8xf32>
    %515 = arith.addf %513, %514 : vector<8x8xf32>
    %cst_239 = arith.constant 0.000000e+00 : f32
    %516 = vector.broadcast %cst_239 : f32 to vector<8x8xf32>
    %517 = arith.maximumf %515, %516 : vector<8x8xf32>
    %c1_240 = arith.constant 1 : index
    %c0_241 = arith.constant 0 : index
    %c0_242 = arith.constant 0 : index
    %518 = vector.load %arg13[%c1_240, %c0_241, %c0_242] : memref<10x10x4xf32, #tpu.memory_space<vmem>>, vector<1x10x4xf32>
    %519 = vector.shape_cast %518 : vector<1x10x4xf32> to vector<10x4xf32>
    %520 = vector.extract_strided_slice %519 {offsets = [0, 0], sizes = [8, 4], strides = [1, 1]} : vector<10x4xf32> to vector<8x4xf32>
    %521 = vector.extract_strided_slice %519 {offsets = [1, 0], sizes = [8, 4], strides = [1, 1]} : vector<10x4xf32> to vector<8x4xf32>
    %522 = vector.extract_strided_slice %519 {offsets = [2, 0], sizes = [8, 4], strides = [1, 1]} : vector<10x4xf32> to vector<8x4xf32>
    %c2_243 = arith.constant 2 : index
    %c0_244 = arith.constant 0 : index
    %c0_245 = arith.constant 0 : index
    %523 = vector.load %arg13[%c2_243, %c0_244, %c0_245] : memref<10x10x4xf32, #tpu.memory_space<vmem>>, vector<1x10x4xf32>
    %524 = vector.shape_cast %523 : vector<1x10x4xf32> to vector<10x4xf32>
    %525 = vector.extract_strided_slice %524 {offsets = [0, 0], sizes = [8, 4], strides = [1, 1]} : vector<10x4xf32> to vector<8x4xf32>
    %526 = vector.extract_strided_slice %524 {offsets = [1, 0], sizes = [8, 4], strides = [1, 1]} : vector<10x4xf32> to vector<8x4xf32>
    %527 = vector.extract_strided_slice %524 {offsets = [2, 0], sizes = [8, 4], strides = [1, 1]} : vector<10x4xf32> to vector<8x4xf32>
    %c3_246 = arith.constant 3 : index
    %c0_247 = arith.constant 0 : index
    %c0_248 = arith.constant 0 : index
    %528 = vector.load %arg13[%c3_246, %c0_247, %c0_248] : memref<10x10x4xf32, #tpu.memory_space<vmem>>, vector<1x10x4xf32>
    %529 = vector.shape_cast %528 : vector<1x10x4xf32> to vector<10x4xf32>
    %530 = vector.extract_strided_slice %529 {offsets = [0, 0], sizes = [8, 4], strides = [1, 1]} : vector<10x4xf32> to vector<8x4xf32>
    %531 = vector.extract_strided_slice %529 {offsets = [1, 0], sizes = [8, 4], strides = [1, 1]} : vector<10x4xf32> to vector<8x4xf32>
    %532 = vector.extract_strided_slice %529 {offsets = [2, 0], sizes = [8, 4], strides = [1, 1]} : vector<10x4xf32> to vector<8x4xf32>
    %533 = tpu.concatenate %520, %521, %522, %525, %526, %527, %530, %531, %532 in 1 : vector<8x4xf32>, vector<8x4xf32>, vector<8x4xf32>, vector<8x4xf32>, vector<8x4xf32>, vector<8x4xf32>, vector<8x4xf32>, vector<8x4xf32>, vector<8x4xf32> -> vector<8x36xf32>
    %534 = arith.truncf %533 : vector<8x36xf32> to vector<8x36xbf16>
    %cst_249 = arith.constant dense<0.000000e+00> : vector<8x8xf32>
    %535 = tpu.matmul %534, %475, %cst_249 {dimension_numbers = #tpu.dot_dimension_numbers<[1], [0], [0], [1], [0, 0, 1, 1], [], []>} : vector<8x36xbf16>, vector<36x8xbf16>, vector<8x8xf32> -> vector<8x8xf32>
    %536 = vector.broadcast %476 : vector<1x8xf32> to vector<8x8xf32>
    %537 = arith.mulf %535, %536 : vector<8x8xf32>
    %538 = vector.broadcast %477 : vector<1x8xf32> to vector<8x8xf32>
    %539 = arith.addf %537, %538 : vector<8x8xf32>
    %cst_250 = arith.constant 0.000000e+00 : f32
    %540 = vector.broadcast %cst_250 : f32 to vector<8x8xf32>
    %541 = arith.maximumf %539, %540 : vector<8x8xf32>
    %542 = arith.maximumf %517, %541 : vector<8x8xf32>
    %543 = arith.truncf %542 : vector<8x8xf32> to vector<8x8xbf16>
    %cst_251 = arith.constant dense<0.000000e+00> : vector<4x8xf32>
    %544 = tpu.matmul %485, %543, %cst_251 {dimension_numbers = #tpu.dot_dimension_numbers<[1], [0], [0], [1], [0, 0, 1, 1], [], []>} : vector<4x8xbf16>, vector<8x8xbf16>, vector<4x8xf32> -> vector<4x8xf32>
    %cst_252 = arith.constant dense<0.000000e+00> : vector<4x8xf32>
    %545 = tpu.matmul %493, %543, %cst_252 {dimension_numbers = #tpu.dot_dimension_numbers<[1], [0], [0], [1], [0, 0, 1, 1], [], []>} : vector<4x8xbf16>, vector<8x8xbf16>, vector<4x8xf32> -> vector<4x8xf32>
    %546 = arith.maximumf %544, %545 : vector<4x8xf32>
    %547 = vector.extract_strided_slice %546 {offsets = [0, 0], sizes = [1, 8], strides = [1, 1]} : vector<4x8xf32> to vector<1x8xf32>
    %548 = vector.extract_strided_slice %546 {offsets = [1, 0], sizes = [1, 8], strides = [1, 1]} : vector<4x8xf32> to vector<1x8xf32>
    %549 = vector.extract_strided_slice %546 {offsets = [2, 0], sizes = [1, 8], strides = [1, 1]} : vector<4x8xf32> to vector<1x8xf32>
    %550 = vector.extract_strided_slice %546 {offsets = [3, 0], sizes = [1, 8], strides = [1, 1]} : vector<4x8xf32> to vector<1x8xf32>
    %551 = tpu.concatenate %547, %548, %549, %550 in 1 : vector<1x8xf32>, vector<1x8xf32>, vector<1x8xf32>, vector<1x8xf32> -> vector<1x32xf32>
    %552 = arith.truncf %551 : vector<1x32xf32> to vector<1x32xbf16>
    %c0_253 = arith.constant 0 : index
    %c0_254 = arith.constant 0 : index
    %553 = vector.load %arg8[%c0_253, %c0_254] : memref<128x32xbf16, #tpu.memory_space<vmem>>, vector<32x32xbf16>
    %cst_255 = arith.constant dense<0.000000e+00> : vector<1x32xf32>
    %554 = tpu.matmul %552, %553, %cst_255 {dimension_numbers = #tpu.dot_dimension_numbers<[1], [0], [0], [1], [0, 0, 1, 1], [], []>} : vector<1x32xbf16>, vector<32x32xbf16>, vector<1x32xf32> -> vector<1x32xf32>
    %555 = arith.addf %5, %554 : vector<1x32xf32>
    %c2_256 = arith.constant 2 : index
    %c0_257 = arith.constant 0 : index
    %c0_258 = arith.constant 0 : index
    %556 = vector.load %arg13[%c2_256, %c0_257, %c0_258] : memref<10x10x4xf32, #tpu.memory_space<vmem>>, vector<1x10x4xf32>
    %557 = vector.shape_cast %556 : vector<1x10x4xf32> to vector<10x4xf32>
    %558 = vector.extract_strided_slice %557 {offsets = [0, 0], sizes = [8, 4], strides = [1, 1]} : vector<10x4xf32> to vector<8x4xf32>
    %559 = vector.extract_strided_slice %557 {offsets = [1, 0], sizes = [8, 4], strides = [1, 1]} : vector<10x4xf32> to vector<8x4xf32>
    %560 = vector.extract_strided_slice %557 {offsets = [2, 0], sizes = [8, 4], strides = [1, 1]} : vector<10x4xf32> to vector<8x4xf32>
    %c3_259 = arith.constant 3 : index
    %c0_260 = arith.constant 0 : index
    %c0_261 = arith.constant 0 : index
    %561 = vector.load %arg13[%c3_259, %c0_260, %c0_261] : memref<10x10x4xf32, #tpu.memory_space<vmem>>, vector<1x10x4xf32>
    %562 = vector.shape_cast %561 : vector<1x10x4xf32> to vector<10x4xf32>
    %563 = vector.extract_strided_slice %562 {offsets = [0, 0], sizes = [8, 4], strides = [1, 1]} : vector<10x4xf32> to vector<8x4xf32>
    %564 = vector.extract_strided_slice %562 {offsets = [1, 0], sizes = [8, 4], strides = [1, 1]} : vector<10x4xf32> to vector<8x4xf32>
    %565 = vector.extract_strided_slice %562 {offsets = [2, 0], sizes = [8, 4], strides = [1, 1]} : vector<10x4xf32> to vector<8x4xf32>
    %c4_262 = arith.constant 4 : index
    %c0_263 = arith.constant 0 : index
    %c0_264 = arith.constant 0 : index
    %566 = vector.load %arg13[%c4_262, %c0_263, %c0_264] : memref<10x10x4xf32, #tpu.memory_space<vmem>>, vector<1x10x4xf32>
    %567 = vector.shape_cast %566 : vector<1x10x4xf32> to vector<10x4xf32>
    %568 = vector.extract_strided_slice %567 {offsets = [0, 0], sizes = [8, 4], strides = [1, 1]} : vector<10x4xf32> to vector<8x4xf32>
    %569 = vector.extract_strided_slice %567 {offsets = [1, 0], sizes = [8, 4], strides = [1, 1]} : vector<10x4xf32> to vector<8x4xf32>
    %570 = vector.extract_strided_slice %567 {offsets = [2, 0], sizes = [8, 4], strides = [1, 1]} : vector<10x4xf32> to vector<8x4xf32>
    %571 = tpu.concatenate %558, %559, %560, %563, %564, %565, %568, %569, %570 in 1 : vector<8x4xf32>, vector<8x4xf32>, vector<8x4xf32>, vector<8x4xf32>, vector<8x4xf32>, vector<8x4xf32>, vector<8x4xf32>, vector<8x4xf32>, vector<8x4xf32> -> vector<8x36xf32>
    %572 = arith.truncf %571 : vector<8x36xf32> to vector<8x36xbf16>
    %cst_265 = arith.constant dense<0.000000e+00> : vector<8x8xf32>
    %573 = tpu.matmul %572, %475, %cst_265 {dimension_numbers = #tpu.dot_dimension_numbers<[1], [0], [0], [1], [0, 0, 1, 1], [], []>} : vector<8x36xbf16>, vector<36x8xbf16>, vector<8x8xf32> -> vector<8x8xf32>
    %574 = vector.broadcast %476 : vector<1x8xf32> to vector<8x8xf32>
    %575 = arith.mulf %573, %574 : vector<8x8xf32>
    %576 = vector.broadcast %477 : vector<1x8xf32> to vector<8x8xf32>
    %577 = arith.addf %575, %576 : vector<8x8xf32>
    %cst_266 = arith.constant 0.000000e+00 : f32
    %578 = vector.broadcast %cst_266 : f32 to vector<8x8xf32>
    %579 = arith.maximumf %577, %578 : vector<8x8xf32>
    %c3_267 = arith.constant 3 : index
    %c0_268 = arith.constant 0 : index
    %c0_269 = arith.constant 0 : index
    %580 = vector.load %arg13[%c3_267, %c0_268, %c0_269] : memref<10x10x4xf32, #tpu.memory_space<vmem>>, vector<1x10x4xf32>
    %581 = vector.shape_cast %580 : vector<1x10x4xf32> to vector<10x4xf32>
    %582 = vector.extract_strided_slice %581 {offsets = [0, 0], sizes = [8, 4], strides = [1, 1]} : vector<10x4xf32> to vector<8x4xf32>
    %583 = vector.extract_strided_slice %581 {offsets = [1, 0], sizes = [8, 4], strides = [1, 1]} : vector<10x4xf32> to vector<8x4xf32>
    %584 = vector.extract_strided_slice %581 {offsets = [2, 0], sizes = [8, 4], strides = [1, 1]} : vector<10x4xf32> to vector<8x4xf32>
    %c4_270 = arith.constant 4 : index
    %c0_271 = arith.constant 0 : index
    %c0_272 = arith.constant 0 : index
    %585 = vector.load %arg13[%c4_270, %c0_271, %c0_272] : memref<10x10x4xf32, #tpu.memory_space<vmem>>, vector<1x10x4xf32>
    %586 = vector.shape_cast %585 : vector<1x10x4xf32> to vector<10x4xf32>
    %587 = vector.extract_strided_slice %586 {offsets = [0, 0], sizes = [8, 4], strides = [1, 1]} : vector<10x4xf32> to vector<8x4xf32>
    %588 = vector.extract_strided_slice %586 {offsets = [1, 0], sizes = [8, 4], strides = [1, 1]} : vector<10x4xf32> to vector<8x4xf32>
    %589 = vector.extract_strided_slice %586 {offsets = [2, 0], sizes = [8, 4], strides = [1, 1]} : vector<10x4xf32> to vector<8x4xf32>
    %c5_273 = arith.constant 5 : index
    %c0_274 = arith.constant 0 : index
    %c0_275 = arith.constant 0 : index
    %590 = vector.load %arg13[%c5_273, %c0_274, %c0_275] : memref<10x10x4xf32, #tpu.memory_space<vmem>>, vector<1x10x4xf32>
    %591 = vector.shape_cast %590 : vector<1x10x4xf32> to vector<10x4xf32>
    %592 = vector.extract_strided_slice %591 {offsets = [0, 0], sizes = [8, 4], strides = [1, 1]} : vector<10x4xf32> to vector<8x4xf32>
    %593 = vector.extract_strided_slice %591 {offsets = [1, 0], sizes = [8, 4], strides = [1, 1]} : vector<10x4xf32> to vector<8x4xf32>
    %594 = vector.extract_strided_slice %591 {offsets = [2, 0], sizes = [8, 4], strides = [1, 1]} : vector<10x4xf32> to vector<8x4xf32>
    %595 = tpu.concatenate %582, %583, %584, %587, %588, %589, %592, %593, %594 in 1 : vector<8x4xf32>, vector<8x4xf32>, vector<8x4xf32>, vector<8x4xf32>, vector<8x4xf32>, vector<8x4xf32>, vector<8x4xf32>, vector<8x4xf32>, vector<8x4xf32> -> vector<8x36xf32>
    %596 = arith.truncf %595 : vector<8x36xf32> to vector<8x36xbf16>
    %cst_276 = arith.constant dense<0.000000e+00> : vector<8x8xf32>
    %597 = tpu.matmul %596, %475, %cst_276 {dimension_numbers = #tpu.dot_dimension_numbers<[1], [0], [0], [1], [0, 0, 1, 1], [], []>} : vector<8x36xbf16>, vector<36x8xbf16>, vector<8x8xf32> -> vector<8x8xf32>
    %598 = vector.broadcast %476 : vector<1x8xf32> to vector<8x8xf32>
    %599 = arith.mulf %597, %598 : vector<8x8xf32>
    %600 = vector.broadcast %477 : vector<1x8xf32> to vector<8x8xf32>
    %601 = arith.addf %599, %600 : vector<8x8xf32>
    %cst_277 = arith.constant 0.000000e+00 : f32
    %602 = vector.broadcast %cst_277 : f32 to vector<8x8xf32>
    %603 = arith.maximumf %601, %602 : vector<8x8xf32>
    %604 = arith.maximumf %579, %603 : vector<8x8xf32>
    %605 = arith.truncf %604 : vector<8x8xf32> to vector<8x8xbf16>
    %cst_278 = arith.constant dense<0.000000e+00> : vector<4x8xf32>
    %606 = tpu.matmul %485, %605, %cst_278 {dimension_numbers = #tpu.dot_dimension_numbers<[1], [0], [0], [1], [0, 0, 1, 1], [], []>} : vector<4x8xbf16>, vector<8x8xbf16>, vector<4x8xf32> -> vector<4x8xf32>
    %cst_279 = arith.constant dense<0.000000e+00> : vector<4x8xf32>
    %607 = tpu.matmul %493, %605, %cst_279 {dimension_numbers = #tpu.dot_dimension_numbers<[1], [0], [0], [1], [0, 0, 1, 1], [], []>} : vector<4x8xbf16>, vector<8x8xbf16>, vector<4x8xf32> -> vector<4x8xf32>
    %608 = arith.maximumf %606, %607 : vector<4x8xf32>
    %609 = vector.extract_strided_slice %608 {offsets = [0, 0], sizes = [1, 8], strides = [1, 1]} : vector<4x8xf32> to vector<1x8xf32>
    %610 = vector.extract_strided_slice %608 {offsets = [1, 0], sizes = [1, 8], strides = [1, 1]} : vector<4x8xf32> to vector<1x8xf32>
    %611 = vector.extract_strided_slice %608 {offsets = [2, 0], sizes = [1, 8], strides = [1, 1]} : vector<4x8xf32> to vector<1x8xf32>
    %612 = vector.extract_strided_slice %608 {offsets = [3, 0], sizes = [1, 8], strides = [1, 1]} : vector<4x8xf32> to vector<1x8xf32>
    %613 = tpu.concatenate %609, %610, %611, %612 in 1 : vector<1x8xf32>, vector<1x8xf32>, vector<1x8xf32>, vector<1x8xf32> -> vector<1x32xf32>
    %614 = arith.truncf %613 : vector<1x32xf32> to vector<1x32xbf16>
    %c32 = arith.constant 32 : index
    %c0_280 = arith.constant 0 : index
    %615 = vector.load %arg8[%c32, %c0_280] : memref<128x32xbf16, #tpu.memory_space<vmem>>, vector<32x32xbf16>
    %cst_281 = arith.constant dense<0.000000e+00> : vector<1x32xf32>
    %616 = tpu.matmul %614, %615, %cst_281 {dimension_numbers = #tpu.dot_dimension_numbers<[1], [0], [0], [1], [0, 0, 1, 1], [], []>} : vector<1x32xbf16>, vector<32x32xbf16>, vector<1x32xf32> -> vector<1x32xf32>
    %617 = arith.addf %555, %616 : vector<1x32xf32>
    %c4_282 = arith.constant 4 : index
    %c0_283 = arith.constant 0 : index
    %c0_284 = arith.constant 0 : index
    %618 = vector.load %arg13[%c4_282, %c0_283, %c0_284] : memref<10x10x4xf32, #tpu.memory_space<vmem>>, vector<1x10x4xf32>
    %619 = vector.shape_cast %618 : vector<1x10x4xf32> to vector<10x4xf32>
    %620 = vector.extract_strided_slice %619 {offsets = [0, 0], sizes = [8, 4], strides = [1, 1]} : vector<10x4xf32> to vector<8x4xf32>
    %621 = vector.extract_strided_slice %619 {offsets = [1, 0], sizes = [8, 4], strides = [1, 1]} : vector<10x4xf32> to vector<8x4xf32>
    %622 = vector.extract_strided_slice %619 {offsets = [2, 0], sizes = [8, 4], strides = [1, 1]} : vector<10x4xf32> to vector<8x4xf32>
    %c5_285 = arith.constant 5 : index
    %c0_286 = arith.constant 0 : index
    %c0_287 = arith.constant 0 : index
    %623 = vector.load %arg13[%c5_285, %c0_286, %c0_287] : memref<10x10x4xf32, #tpu.memory_space<vmem>>, vector<1x10x4xf32>
    %624 = vector.shape_cast %623 : vector<1x10x4xf32> to vector<10x4xf32>
    %625 = vector.extract_strided_slice %624 {offsets = [0, 0], sizes = [8, 4], strides = [1, 1]} : vector<10x4xf32> to vector<8x4xf32>
    %626 = vector.extract_strided_slice %624 {offsets = [1, 0], sizes = [8, 4], strides = [1, 1]} : vector<10x4xf32> to vector<8x4xf32>
    %627 = vector.extract_strided_slice %624 {offsets = [2, 0], sizes = [8, 4], strides = [1, 1]} : vector<10x4xf32> to vector<8x4xf32>
    %c6_288 = arith.constant 6 : index
    %c0_289 = arith.constant 0 : index
    %c0_290 = arith.constant 0 : index
    %628 = vector.load %arg13[%c6_288, %c0_289, %c0_290] : memref<10x10x4xf32, #tpu.memory_space<vmem>>, vector<1x10x4xf32>
    %629 = vector.shape_cast %628 : vector<1x10x4xf32> to vector<10x4xf32>
    %630 = vector.extract_strided_slice %629 {offsets = [0, 0], sizes = [8, 4], strides = [1, 1]} : vector<10x4xf32> to vector<8x4xf32>
    %631 = vector.extract_strided_slice %629 {offsets = [1, 0], sizes = [8, 4], strides = [1, 1]} : vector<10x4xf32> to vector<8x4xf32>
    %632 = vector.extract_strided_slice %629 {offsets = [2, 0], sizes = [8, 4], strides = [1, 1]} : vector<10x4xf32> to vector<8x4xf32>
    %633 = tpu.concatenate %620, %621, %622, %625, %626, %627, %630, %631, %632 in 1 : vector<8x4xf32>, vector<8x4xf32>, vector<8x4xf32>, vector<8x4xf32>, vector<8x4xf32>, vector<8x4xf32>, vector<8x4xf32>, vector<8x4xf32>, vector<8x4xf32> -> vector<8x36xf32>
    %634 = arith.truncf %633 : vector<8x36xf32> to vector<8x36xbf16>
    %cst_291 = arith.constant dense<0.000000e+00> : vector<8x8xf32>
    %635 = tpu.matmul %634, %475, %cst_291 {dimension_numbers = #tpu.dot_dimension_numbers<[1], [0], [0], [1], [0, 0, 1, 1], [], []>} : vector<8x36xbf16>, vector<36x8xbf16>, vector<8x8xf32> -> vector<8x8xf32>
    %636 = vector.broadcast %476 : vector<1x8xf32> to vector<8x8xf32>
    %637 = arith.mulf %635, %636 : vector<8x8xf32>
    %638 = vector.broadcast %477 : vector<1x8xf32> to vector<8x8xf32>
    %639 = arith.addf %637, %638 : vector<8x8xf32>
    %cst_292 = arith.constant 0.000000e+00 : f32
    %640 = vector.broadcast %cst_292 : f32 to vector<8x8xf32>
    %641 = arith.maximumf %639, %640 : vector<8x8xf32>
    %c5_293 = arith.constant 5 : index
    %c0_294 = arith.constant 0 : index
    %c0_295 = arith.constant 0 : index
    %642 = vector.load %arg13[%c5_293, %c0_294, %c0_295] : memref<10x10x4xf32, #tpu.memory_space<vmem>>, vector<1x10x4xf32>
    %643 = vector.shape_cast %642 : vector<1x10x4xf32> to vector<10x4xf32>
    %644 = vector.extract_strided_slice %643 {offsets = [0, 0], sizes = [8, 4], strides = [1, 1]} : vector<10x4xf32> to vector<8x4xf32>
    %645 = vector.extract_strided_slice %643 {offsets = [1, 0], sizes = [8, 4], strides = [1, 1]} : vector<10x4xf32> to vector<8x4xf32>
    %646 = vector.extract_strided_slice %643 {offsets = [2, 0], sizes = [8, 4], strides = [1, 1]} : vector<10x4xf32> to vector<8x4xf32>
    %c6_296 = arith.constant 6 : index
    %c0_297 = arith.constant 0 : index
    %c0_298 = arith.constant 0 : index
    %647 = vector.load %arg13[%c6_296, %c0_297, %c0_298] : memref<10x10x4xf32, #tpu.memory_space<vmem>>, vector<1x10x4xf32>
    %648 = vector.shape_cast %647 : vector<1x10x4xf32> to vector<10x4xf32>
    %649 = vector.extract_strided_slice %648 {offsets = [0, 0], sizes = [8, 4], strides = [1, 1]} : vector<10x4xf32> to vector<8x4xf32>
    %650 = vector.extract_strided_slice %648 {offsets = [1, 0], sizes = [8, 4], strides = [1, 1]} : vector<10x4xf32> to vector<8x4xf32>
    %651 = vector.extract_strided_slice %648 {offsets = [2, 0], sizes = [8, 4], strides = [1, 1]} : vector<10x4xf32> to vector<8x4xf32>
    %c7_299 = arith.constant 7 : index
    %c0_300 = arith.constant 0 : index
    %c0_301 = arith.constant 0 : index
    %652 = vector.load %arg13[%c7_299, %c0_300, %c0_301] : memref<10x10x4xf32, #tpu.memory_space<vmem>>, vector<1x10x4xf32>
    %653 = vector.shape_cast %652 : vector<1x10x4xf32> to vector<10x4xf32>
    %654 = vector.extract_strided_slice %653 {offsets = [0, 0], sizes = [8, 4], strides = [1, 1]} : vector<10x4xf32> to vector<8x4xf32>
    %655 = vector.extract_strided_slice %653 {offsets = [1, 0], sizes = [8, 4], strides = [1, 1]} : vector<10x4xf32> to vector<8x4xf32>
    %656 = vector.extract_strided_slice %653 {offsets = [2, 0], sizes = [8, 4], strides = [1, 1]} : vector<10x4xf32> to vector<8x4xf32>
    %657 = tpu.concatenate %644, %645, %646, %649, %650, %651, %654, %655, %656 in 1 : vector<8x4xf32>, vector<8x4xf32>, vector<8x4xf32>, vector<8x4xf32>, vector<8x4xf32>, vector<8x4xf32>, vector<8x4xf32>, vector<8x4xf32>, vector<8x4xf32> -> vector<8x36xf32>
    %658 = arith.truncf %657 : vector<8x36xf32> to vector<8x36xbf16>
    %cst_302 = arith.constant dense<0.000000e+00> : vector<8x8xf32>
    %659 = tpu.matmul %658, %475, %cst_302 {dimension_numbers = #tpu.dot_dimension_numbers<[1], [0], [0], [1], [0, 0, 1, 1], [], []>} : vector<8x36xbf16>, vector<36x8xbf16>, vector<8x8xf32> -> vector<8x8xf32>
    %660 = vector.broadcast %476 : vector<1x8xf32> to vector<8x8xf32>
    %661 = arith.mulf %659, %660 : vector<8x8xf32>
    %662 = vector.broadcast %477 : vector<1x8xf32> to vector<8x8xf32>
    %663 = arith.addf %661, %662 : vector<8x8xf32>
    %cst_303 = arith.constant 0.000000e+00 : f32
    %664 = vector.broadcast %cst_303 : f32 to vector<8x8xf32>
    %665 = arith.maximumf %663, %664 : vector<8x8xf32>
    %666 = arith.maximumf %641, %665 : vector<8x8xf32>
    %667 = arith.truncf %666 : vector<8x8xf32> to vector<8x8xbf16>
    %cst_304 = arith.constant dense<0.000000e+00> : vector<4x8xf32>
    %668 = tpu.matmul %485, %667, %cst_304 {dimension_numbers = #tpu.dot_dimension_numbers<[1], [0], [0], [1], [0, 0, 1, 1], [], []>} : vector<4x8xbf16>, vector<8x8xbf16>, vector<4x8xf32> -> vector<4x8xf32>
    %cst_305 = arith.constant dense<0.000000e+00> : vector<4x8xf32>
    %669 = tpu.matmul %493, %667, %cst_305 {dimension_numbers = #tpu.dot_dimension_numbers<[1], [0], [0], [1], [0, 0, 1, 1], [], []>} : vector<4x8xbf16>, vector<8x8xbf16>, vector<4x8xf32> -> vector<4x8xf32>
    %670 = arith.maximumf %668, %669 : vector<4x8xf32>
    %671 = vector.extract_strided_slice %670 {offsets = [0, 0], sizes = [1, 8], strides = [1, 1]} : vector<4x8xf32> to vector<1x8xf32>
    %672 = vector.extract_strided_slice %670 {offsets = [1, 0], sizes = [1, 8], strides = [1, 1]} : vector<4x8xf32> to vector<1x8xf32>
    %673 = vector.extract_strided_slice %670 {offsets = [2, 0], sizes = [1, 8], strides = [1, 1]} : vector<4x8xf32> to vector<1x8xf32>
    %674 = vector.extract_strided_slice %670 {offsets = [3, 0], sizes = [1, 8], strides = [1, 1]} : vector<4x8xf32> to vector<1x8xf32>
    %675 = tpu.concatenate %671, %672, %673, %674 in 1 : vector<1x8xf32>, vector<1x8xf32>, vector<1x8xf32>, vector<1x8xf32> -> vector<1x32xf32>
    %676 = arith.truncf %675 : vector<1x32xf32> to vector<1x32xbf16>
    %c64 = arith.constant 64 : index
    %c0_306 = arith.constant 0 : index
    %677 = vector.load %arg8[%c64, %c0_306] : memref<128x32xbf16, #tpu.memory_space<vmem>>, vector<32x32xbf16>
    %cst_307 = arith.constant dense<0.000000e+00> : vector<1x32xf32>
    %678 = tpu.matmul %676, %677, %cst_307 {dimension_numbers = #tpu.dot_dimension_numbers<[1], [0], [0], [1], [0, 0, 1, 1], [], []>} : vector<1x32xbf16>, vector<32x32xbf16>, vector<1x32xf32> -> vector<1x32xf32>
    %679 = arith.addf %617, %678 : vector<1x32xf32>
    %c6_308 = arith.constant 6 : index
    %c0_309 = arith.constant 0 : index
    %c0_310 = arith.constant 0 : index
    %680 = vector.load %arg13[%c6_308, %c0_309, %c0_310] : memref<10x10x4xf32, #tpu.memory_space<vmem>>, vector<1x10x4xf32>
    %681 = vector.shape_cast %680 : vector<1x10x4xf32> to vector<10x4xf32>
    %682 = vector.extract_strided_slice %681 {offsets = [0, 0], sizes = [8, 4], strides = [1, 1]} : vector<10x4xf32> to vector<8x4xf32>
    %683 = vector.extract_strided_slice %681 {offsets = [1, 0], sizes = [8, 4], strides = [1, 1]} : vector<10x4xf32> to vector<8x4xf32>
    %684 = vector.extract_strided_slice %681 {offsets = [2, 0], sizes = [8, 4], strides = [1, 1]} : vector<10x4xf32> to vector<8x4xf32>
    %c7_311 = arith.constant 7 : index
    %c0_312 = arith.constant 0 : index
    %c0_313 = arith.constant 0 : index
    %685 = vector.load %arg13[%c7_311, %c0_312, %c0_313] : memref<10x10x4xf32, #tpu.memory_space<vmem>>, vector<1x10x4xf32>
    %686 = vector.shape_cast %685 : vector<1x10x4xf32> to vector<10x4xf32>
    %687 = vector.extract_strided_slice %686 {offsets = [0, 0], sizes = [8, 4], strides = [1, 1]} : vector<10x4xf32> to vector<8x4xf32>
    %688 = vector.extract_strided_slice %686 {offsets = [1, 0], sizes = [8, 4], strides = [1, 1]} : vector<10x4xf32> to vector<8x4xf32>
    %689 = vector.extract_strided_slice %686 {offsets = [2, 0], sizes = [8, 4], strides = [1, 1]} : vector<10x4xf32> to vector<8x4xf32>
    %c8_314 = arith.constant 8 : index
    %c0_315 = arith.constant 0 : index
    %c0_316 = arith.constant 0 : index
    %690 = vector.load %arg13[%c8_314, %c0_315, %c0_316] : memref<10x10x4xf32, #tpu.memory_space<vmem>>, vector<1x10x4xf32>
    %691 = vector.shape_cast %690 : vector<1x10x4xf32> to vector<10x4xf32>
    %692 = vector.extract_strided_slice %691 {offsets = [0, 0], sizes = [8, 4], strides = [1, 1]} : vector<10x4xf32> to vector<8x4xf32>
    %693 = vector.extract_strided_slice %691 {offsets = [1, 0], sizes = [8, 4], strides = [1, 1]} : vector<10x4xf32> to vector<8x4xf32>
    %694 = vector.extract_strided_slice %691 {offsets = [2, 0], sizes = [8, 4], strides = [1, 1]} : vector<10x4xf32> to vector<8x4xf32>
    %695 = tpu.concatenate %682, %683, %684, %687, %688, %689, %692, %693, %694 in 1 : vector<8x4xf32>, vector<8x4xf32>, vector<8x4xf32>, vector<8x4xf32>, vector<8x4xf32>, vector<8x4xf32>, vector<8x4xf32>, vector<8x4xf32>, vector<8x4xf32> -> vector<8x36xf32>
    %696 = arith.truncf %695 : vector<8x36xf32> to vector<8x36xbf16>
    %cst_317 = arith.constant dense<0.000000e+00> : vector<8x8xf32>
    %697 = tpu.matmul %696, %475, %cst_317 {dimension_numbers = #tpu.dot_dimension_numbers<[1], [0], [0], [1], [0, 0, 1, 1], [], []>} : vector<8x36xbf16>, vector<36x8xbf16>, vector<8x8xf32> -> vector<8x8xf32>
    %698 = vector.broadcast %476 : vector<1x8xf32> to vector<8x8xf32>
    %699 = arith.mulf %697, %698 : vector<8x8xf32>
    %700 = vector.broadcast %477 : vector<1x8xf32> to vector<8x8xf32>
    %701 = arith.addf %699, %700 : vector<8x8xf32>
    %cst_318 = arith.constant 0.000000e+00 : f32
    %702 = vector.broadcast %cst_318 : f32 to vector<8x8xf32>
    %703 = arith.maximumf %701, %702 : vector<8x8xf32>
    %c7_319 = arith.constant 7 : index
    %c0_320 = arith.constant 0 : index
    %c0_321 = arith.constant 0 : index
    %704 = vector.load %arg13[%c7_319, %c0_320, %c0_321] : memref<10x10x4xf32, #tpu.memory_space<vmem>>, vector<1x10x4xf32>
    %705 = vector.shape_cast %704 : vector<1x10x4xf32> to vector<10x4xf32>
    %706 = vector.extract_strided_slice %705 {offsets = [0, 0], sizes = [8, 4], strides = [1, 1]} : vector<10x4xf32> to vector<8x4xf32>
    %707 = vector.extract_strided_slice %705 {offsets = [1, 0], sizes = [8, 4], strides = [1, 1]} : vector<10x4xf32> to vector<8x4xf32>
    %708 = vector.extract_strided_slice %705 {offsets = [2, 0], sizes = [8, 4], strides = [1, 1]} : vector<10x4xf32> to vector<8x4xf32>
    %c8_322 = arith.constant 8 : index
    %c0_323 = arith.constant 0 : index
    %c0_324 = arith.constant 0 : index
    %709 = vector.load %arg13[%c8_322, %c0_323, %c0_324] : memref<10x10x4xf32, #tpu.memory_space<vmem>>, vector<1x10x4xf32>
    %710 = vector.shape_cast %709 : vector<1x10x4xf32> to vector<10x4xf32>
    %711 = vector.extract_strided_slice %710 {offsets = [0, 0], sizes = [8, 4], strides = [1, 1]} : vector<10x4xf32> to vector<8x4xf32>
    %712 = vector.extract_strided_slice %710 {offsets = [1, 0], sizes = [8, 4], strides = [1, 1]} : vector<10x4xf32> to vector<8x4xf32>
    %713 = vector.extract_strided_slice %710 {offsets = [2, 0], sizes = [8, 4], strides = [1, 1]} : vector<10x4xf32> to vector<8x4xf32>
    %c9_325 = arith.constant 9 : index
    %c0_326 = arith.constant 0 : index
    %c0_327 = arith.constant 0 : index
    %714 = vector.load %arg13[%c9_325, %c0_326, %c0_327] : memref<10x10x4xf32, #tpu.memory_space<vmem>>, vector<1x10x4xf32>
    %715 = vector.shape_cast %714 : vector<1x10x4xf32> to vector<10x4xf32>
    %716 = vector.extract_strided_slice %715 {offsets = [0, 0], sizes = [8, 4], strides = [1, 1]} : vector<10x4xf32> to vector<8x4xf32>
    %717 = vector.extract_strided_slice %715 {offsets = [1, 0], sizes = [8, 4], strides = [1, 1]} : vector<10x4xf32> to vector<8x4xf32>
    %718 = vector.extract_strided_slice %715 {offsets = [2, 0], sizes = [8, 4], strides = [1, 1]} : vector<10x4xf32> to vector<8x4xf32>
    %719 = tpu.concatenate %706, %707, %708, %711, %712, %713, %716, %717, %718 in 1 : vector<8x4xf32>, vector<8x4xf32>, vector<8x4xf32>, vector<8x4xf32>, vector<8x4xf32>, vector<8x4xf32>, vector<8x4xf32>, vector<8x4xf32>, vector<8x4xf32> -> vector<8x36xf32>
    %720 = arith.truncf %719 : vector<8x36xf32> to vector<8x36xbf16>
    %cst_328 = arith.constant dense<0.000000e+00> : vector<8x8xf32>
    %721 = tpu.matmul %720, %475, %cst_328 {dimension_numbers = #tpu.dot_dimension_numbers<[1], [0], [0], [1], [0, 0, 1, 1], [], []>} : vector<8x36xbf16>, vector<36x8xbf16>, vector<8x8xf32> -> vector<8x8xf32>
    %722 = vector.broadcast %476 : vector<1x8xf32> to vector<8x8xf32>
    %723 = arith.mulf %721, %722 : vector<8x8xf32>
    %724 = vector.broadcast %477 : vector<1x8xf32> to vector<8x8xf32>
    %725 = arith.addf %723, %724 : vector<8x8xf32>
    %cst_329 = arith.constant 0.000000e+00 : f32
    %726 = vector.broadcast %cst_329 : f32 to vector<8x8xf32>
    %727 = arith.maximumf %725, %726 : vector<8x8xf32>
    %728 = arith.maximumf %703, %727 : vector<8x8xf32>
    %729 = arith.truncf %728 : vector<8x8xf32> to vector<8x8xbf16>
    %cst_330 = arith.constant dense<0.000000e+00> : vector<4x8xf32>
    %730 = tpu.matmul %485, %729, %cst_330 {dimension_numbers = #tpu.dot_dimension_numbers<[1], [0], [0], [1], [0, 0, 1, 1], [], []>} : vector<4x8xbf16>, vector<8x8xbf16>, vector<4x8xf32> -> vector<4x8xf32>
    %cst_331 = arith.constant dense<0.000000e+00> : vector<4x8xf32>
    %731 = tpu.matmul %493, %729, %cst_331 {dimension_numbers = #tpu.dot_dimension_numbers<[1], [0], [0], [1], [0, 0, 1, 1], [], []>} : vector<4x8xbf16>, vector<8x8xbf16>, vector<4x8xf32> -> vector<4x8xf32>
    %732 = arith.maximumf %730, %731 : vector<4x8xf32>
    %733 = vector.extract_strided_slice %732 {offsets = [0, 0], sizes = [1, 8], strides = [1, 1]} : vector<4x8xf32> to vector<1x8xf32>
    %734 = vector.extract_strided_slice %732 {offsets = [1, 0], sizes = [1, 8], strides = [1, 1]} : vector<4x8xf32> to vector<1x8xf32>
    %735 = vector.extract_strided_slice %732 {offsets = [2, 0], sizes = [1, 8], strides = [1, 1]} : vector<4x8xf32> to vector<1x8xf32>
    %736 = vector.extract_strided_slice %732 {offsets = [3, 0], sizes = [1, 8], strides = [1, 1]} : vector<4x8xf32> to vector<1x8xf32>
    %737 = tpu.concatenate %733, %734, %735, %736 in 1 : vector<1x8xf32>, vector<1x8xf32>, vector<1x8xf32>, vector<1x8xf32> -> vector<1x32xf32>
    %738 = arith.truncf %737 : vector<1x32xf32> to vector<1x32xbf16>
    %c96 = arith.constant 96 : index
    %c0_332 = arith.constant 0 : index
    %739 = vector.load %arg8[%c96, %c0_332] : memref<128x32xbf16, #tpu.memory_space<vmem>>, vector<32x32xbf16>
    %cst_333 = arith.constant dense<0.000000e+00> : vector<1x32xf32>
    %740 = tpu.matmul %738, %739, %cst_333 {dimension_numbers = #tpu.dot_dimension_numbers<[1], [0], [0], [1], [0, 0, 1, 1], [], []>} : vector<1x32xbf16>, vector<32x32xbf16>, vector<1x32xf32> -> vector<1x32xf32>
    %741 = arith.addf %679, %740 : vector<1x32xf32>
    %c0_334 = arith.constant 0 : index
    %c0_335 = arith.constant 0 : index
    %742 = vector.load %arg9[%c0_334, %c0_335] : memref<1x32xf32, #tpu.memory_space<vmem>>, vector<1x32xf32>
    %743 = arith.mulf %741, %742 : vector<1x32xf32>
    %c0_336 = arith.constant 0 : index
    %c0_337 = arith.constant 0 : index
    %744 = vector.load %arg10[%c0_336, %c0_337] : memref<1x32xf32, #tpu.memory_space<vmem>>, vector<1x32xf32>
    %745 = arith.addf %743, %744 : vector<1x32xf32>
    %cst_338 = arith.constant 0.000000e+00 : f32
    %746 = vector.broadcast %cst_338 : f32 to vector<1x32xf32>
    %747 = arith.maximumf %745, %746 : vector<1x32xf32>
    %c0_339 = arith.constant 0 : index
    %c0_340 = arith.constant 0 : index
    %c0_341 = arith.constant 0 : index
    %748 = vector.load %arg11[%c0_339, %c0_340, %c0_341] : memref<1x1x32xf32, #tpu.memory_space<vmem>>, vector<1x1x32xf32>
    %749 = vector.shape_cast %748 : vector<1x1x32xf32> to vector<1x32xf32>
    %750 = vector.shape_cast %747 : vector<1x32xf32> to vector<1x1x32xf32>
    tpu.vector_store %arg11[%c0_339, %c0_340, %c0_341], %750 {strides = array<i32>} : memref<1x1x32xf32, #tpu.memory_space<vmem>>, vector<1x1x32xf32>,
    return
  }
  func.func @transform_0(%arg0: i32) -> (i32, i32, i32, i32) {
    %c0_i32 = arith.constant 0 : i32
    %c0_i32_0 = arith.constant 0 : i32
    %c0_i32_1 = arith.constant 0 : i32
    %c0_i32_2 = arith.constant 0 : i32
    return %arg0, %c0_i32, %c0_i32_0, %c0_i32_1 : i32, i32, i32, i32
  }
  func.func @transform_1(%arg0: i32) -> (i32, i32) {
    %c0_i32 = arith.constant 0 : i32
    %c0_i32_0 = arith.constant 0 : i32
    %c0_i32_1 = arith.constant 0 : i32
    return %c0_i32, %c0_i32_0 : i32, i32
  }
  func.func @transform_2(%arg0: i32) -> (i32, i32) {
    %c0_i32 = arith.constant 0 : i32
    %c0_i32_0 = arith.constant 0 : i32
    %c0_i32_1 = arith.constant 0 : i32
    return %c0_i32, %c0_i32_0 : i32, i32
  }
  func.func @transform_3(%arg0: i32) -> (i32, i32) {
    %c0_i32 = arith.constant 0 : i32
    %c0_i32_0 = arith.constant 0 : i32
    %c0_i32_1 = arith.constant 0 : i32
    return %c0_i32, %c0_i32_0 : i32, i32
  }
  func.func @transform_4(%arg0: i32) -> (i32, i32) {
    %c0_i32 = arith.constant 0 : i32
    %c0_i32_0 = arith.constant 0 : i32
    %c0_i32_1 = arith.constant 0 : i32
    return %c0_i32, %c0_i32_0 : i32, i32
  }
  func.func @transform_5(%arg0: i32) -> (i32, i32) {
    %c0_i32 = arith.constant 0 : i32
    %c0_i32_0 = arith.constant 0 : i32
    %c0_i32_1 = arith.constant 0 : i32
    return %c0_i32, %c0_i32_0 : i32, i32
  }
  func.func @transform_6(%arg0: i32) -> (i32, i32) {
    %c0_i32 = arith.constant 0 : i32
    %c0_i32_0 = arith.constant 0 : i32
    %c0_i32_1 = arith.constant 0 : i32
    return %c0_i32, %c0_i32_0 : i32, i32
  }
  func.func @transform_7(%arg0: i32) -> (i32, i32) {
    %c0_i32 = arith.constant 0 : i32
    %c0_i32_0 = arith.constant 0 : i32
    %c0_i32_1 = arith.constant 0 : i32
    return %c0_i32, %c0_i32_0 : i32, i32
  }
  func.func @transform_8(%arg0: i32) -> (i32, i32) {
    %c0_i32 = arith.constant 0 : i32
    %c0_i32_0 = arith.constant 0 : i32
    %c0_i32_1 = arith.constant 0 : i32
    return %c0_i32, %c0_i32_0 : i32, i32
  }
  func.func @transform_9(%arg0: i32) -> (i32, i32) {
    %c0_i32 = arith.constant 0 : i32
    %c0_i32_0 = arith.constant 0 : i32
    %c0_i32_1 = arith.constant 0 : i32
    return %c0_i32, %c0_i32_0 : i32, i32
  }
  func.func @transform_10(%arg0: i32) -> (i32, i32, i32) {
    %c0_i32 = arith.constant 0 : i32
    %c0_i32_0 = arith.constant 0 : i32
    %c0_i32_1 = arith.constant 0 : i32
    return %arg0, %c0_i32, %c0_i32_0 : i32, i32, i32
  }
}

</mosaic_0001>

<bundles_post_ra>
// kernel: _lambda_.1
= control target key start
LH: loop header
LB: loop body
LE: loop exit
PB: predicated region body
PF: predicated region fallthrough
CT: control target
= control target key end

     0   :  { %15 = vsyncpa [#allocation5], 0  ;;  %s8504_s0 = inlined_call_operand.vmem [shape: f32[2,16,16,1], index: 0, kind: input, shape index: {}]   ;;  %s8505_s1 = inlined_call_operand.vmem [shape: bf16[9,4], index: 1, kind: input, shape index: {}]   ;;  %s8506_s2 = inlined_call_operand.vmem [shape: f32[1,4], index: 2, kind: input, shape index: {}]   ;;  %s8507_s3 = inlined_call_operand.vmem [shape: f32[1,4], index: 3, kind: input, shape index: {}]   ;;  %s8508_s4 = inlined_call_operand.vmem [shape: bf16[36,8], index: 4, kind: input, shape index: {}]   ;;  %s8509_s5 = inlined_call_operand.vmem [shape: f32[1,8], index: 5, kind: input, shape index: {}]   ;;  %s8510_s6 = inlined_call_operand.vmem [shape: f32[1,8], index: 6, kind: input, shape index: {}]   ;;  %s8511_s7 = inlined_call_operand.vmem [shape: bf16[128,32], index: 7, kind: input, shape index: {}]   ;;  %s8512_s8 = inlined_call_operand.vmem [shape: f32[1,32], index: 8, kind: input, shape index: {}]   ;;  %s8513_s9 = inlined_call_operand.vmem [shape: f32[1,32], index: 9, kind: input, shape index: {}]   ;;  %s8514_s10 = inlined_call_operand.hbm [shape: f32[2,1,32], index: 10, kind: output, shape index: {}]  }
   0x1   :  { %17 = vsyncpa [#allocation5 + $0x1], 0  ;;  %s6647_s13 = smov 0   ;;  %s6649_s14 = smov 0  }
   0x2   :  { %s6651_s15 = smov 0   ;;  %s6653_s16 = smov 0  }
   0x3 LB: > { %s6668_s17 = sadd.s32 4294967295, %s6572_s16   ;;  %s5121_s18 = sadd.s32 4294967294, %s6572_s16   ;;  %s6572_s16 = sphi %s6653_s16, %s8525_s16   ;;  %s6568_s15 = sphi %s6651_s15, %s8524_s15   ;;  %s6564_s14 = sphi %s6649_s14, %s8523_s14   ;;  %s6560_s13 = sphi %s6647_s13, %s8522_s13  }
   0x4   : > { %s6672_s19 = sadd.s32 1, %s6572_s16   ;;  %s245_s20 = sadd.s32 1, %s6568_s15 }
   0x5   : > { %s242_s21 = ssub.s32 %s6572_s16, %s6672_s19  ;;  %p255_p0 = scmp.ne.s32.totalorder %s6568_s15, %s6564_s14 }
   0x6   : > { %p243_p1 = scmp.eq.s32.totalorder %s242_s21, 0  ;;  %p256_p2 = scmp.eq.s32.totalorder %s6668_s17, 1 }
   0x7   : > { %p261_p3 = scmp.ne.s32.totalorder %s6564_s14, %s6560_s13  ;;  %p262_p4 = scmp.eq.s32.totalorder %s5121_s18, 1 }
   0x8   : > { %s6683_s22 = scalar_select %p243_p1, %s6568_s15, %s245_s20  }
   0x9   : > { %p6685_p5 = por %p256_p2, %p255_p0  ;;  %p6689_p6 = por %p262_p4, %p261_p3 }
   0xa   : > { %p5124_p7 = scmp.ge.s32.totalorder %s6572_s16, 1  ;;  %p315_p8 = scmp.lt.s32.totalorder %s6572_s16, 3 }
   0xc   : > { %p316_p9 = pnand %p5124_p7, %p315_p8 }
   0xd   : > { %vm358_vm0 = vcmask (!%p316_p9), 7168   ;;  %vm361_vm1 = vcmask (!%p316_p9), 1024   ;;  %p352_p10 = scmp.lt.s32.totalorder (!%p316_p9), %s6668_s17, 1  ;;  %v6574_v0 = vmov (!%p316_p9), 0.0   ;;  %vm532_vm2 = vcmask (!%p316_p9), 1046528   ;;  %s6575_s30 = smov (!%p316_p9), 1  }
   0xe   : > { %319 = sbr.rel (%p316_p9) target bundleno = 3839 (0xeff), region = 60  ;;  %359 = vst.msk [vmem:[#allocation2] sm:$0xff] (!%p316_p9), %vm358_vm0, %v6574_v0  ;;  %360 = vst.msk [vmem:[#allocation2 + $0x8] sm:$0xff] (!%p316_p9), %vm358_vm0, %v6574_v0  ;;  %5325 = vmatprep.subr.bf16.mxu1 (!%p316_p9), %v6574_v0  ;;  %5337 = vmatprep.subr.bf16.mxu0 (!%p316_p9), %v6574_v0  ;;  %vm544_vm3 = vcmask (!%p316_p9), 1045504   ;;  %vm483_vm4 = vcmask (!%p316_p9), 31744   ;;  %vm650_vm5 = vcmask (!%p316_p9), 1043456  }
   0xf   : > { %362 = vst.msk [vmem:[#allocation2 + $0x10] sm:$0x3] (!%p316_p9), %vm361_vm1, %v6574_v0  ;;  %365 = vst.msk [vmem:[#allocation2 + $0x28] sm:$0x3] (!%p316_p9), %vm361_vm1, %v6574_v0  ;;  %s6576_s11 = smov (!%p316_p9), 3   ;;  %s6577_s12 = smov (!%p316_p9), 2  }
  0x10   : > { %363 = vst.msk [vmem:[#allocation2 + $0x18] sm:$0xff] (!%p316_p9), %vm358_vm0, %v6574_v0  ;;  %364 = vst.msk [vmem:[#allocation2 + $0x20] sm:$0xff] (!%p316_p9), %vm358_vm0, %v6574_v0  ;;  %s6578_s18 = smov (!%p316_p9), 6   ;;  %vm651_vm6 = vcmask (!%p316_p9), 1044480   ;;  %s6579_s20 = smov (!%p316_p9), 5   ;;  %v6580_v54 = vmov (!%p316_p9), 65535  }
  0x11   : > { %366 = vst.msk [vmem:[#allocation2 + $0x30] sm:$0xff] (!%p316_p9), %vm358_vm0, %v6574_v0  ;;  %367 = vst.msk [vmem:[#allocation2 + $0x38] sm:$0xff] (!%p316_p9), %vm358_vm0, %v6574_v0  ;;  %v6465_v53 = vld [vmem:[%s8505_s1] sm:$0x1f] (!%p316_p9)   ;;  %v652_v55 = vsel (!%p316_p9), %vm650_vm5, 4294967295, %v6580_v54  ;;  %s6582_s27 = smov (!%p316_p9), 7  }
  0x12   : > { %368 = vst.msk [vmem:[#allocation2 + $0x40] sm:$0x3] (!%p316_p9), %vm361_vm1, %v6574_v0  ;;  %371 = vst.msk [vmem:[#allocation2 + $0x58] sm:$0x3] (!%p316_p9), %vm361_vm1, %v6574_v0  ;;  %v653_v57 = vsel (!%p316_p9), %vm651_vm6, %v652_v55, 0  ;;  %vm6583_vm7 = vmmov (!%p316_p9), 0  }
  0x13   : > { %369 = vst.msk [vmem:[#allocation2 + $0x48] sm:$0xff] (!%p316_p9), %vm358_vm0, %v6574_v0  ;;  %370 = vst.msk [vmem:[#allocation2 + $0x50] sm:$0xff] (!%p316_p9), %vm358_vm0, %v6574_v0  ;;  %v6911_v58 = vand.u32 (!%p316_p9), %v6465_v53, %v653_v57  ;;  %5327 = vmatprep.mubr.msk.bf16.mxu1 (!%p316_p9), %vm6583_vm7, %v6574_v0  ;;  %5339 = vmatprep.mubr.msk.bf16.mxu0 (!%p316_p9), %vm6583_vm7, %v6574_v0  ;;  %s6584_s28 = smov (!%p316_p9), 8   ;;  %vm620_vm8 = vcmask (!%p316_p9), 15360   ;;  %vm623_vm9 = vcmask (!%p316_p9), 23552   ;;  %vm628_vm10 = vcmask (!%p316_p9), 39936  }
  0x14   : > { %372 = vst.msk [vmem:[#allocation2 + $0x60] sm:$0xff] (!%p316_p9), %vm358_vm0, %v6574_v0  ;;  %373 = vst.msk [vmem:[#allocation2 + $0x68] sm:$0xff] (!%p316_p9), %vm358_vm0, %v6574_v0  ;;  %vm631_vm11 = vcmask (!%p316_p9), 48128   ;;  %vm634_vm12 = vcmask (!%p316_p9), 56320   ;;  %vm637_vm13 = vcmask (!%p316_p9), 64512   ;;  %vm646_vm14 = vcmask (!%p316_p9), 72704  }
  0x15   : > { %374 = vst.msk [vmem:[#allocation2 + $0x70] sm:$0x3] %vm361_vm1, %v6574_v0  ;;  %377 = vst.msk [vmem:[#allocation2 + $0x88] sm:$0x3] %vm361_vm1, %v6574_v0  ;;  %s353_s25 = scalar_select %p352_p10, %s6668_s17, 1  ;;  %v6823_v7 = vld [vmem:[#allocation2] sm:$0xff]  ;;  %5326 = vmatpush3.bf16.msra.mxu1 %v6911_v58 }
  0x16   : > { %375 = vst.msk [vmem:[#allocation2 + $0x78] sm:$0xff] %vm358_vm0, %v6574_v0  ;;  %376 = vst.msk [vmem:[#allocation2 + $0x80] sm:$0xff] %vm358_vm0, %v6574_v0  ;;  %v6825_v8 = vld [vmem:[#allocation2 + $0x8] sm:$0xff]  ;;  %v521_v9 = vld [vmem:[#allocation2 + $0x10] sm:$0x3]  ;;  %v533_v10 = vrot.slane %v6823_v7, 1  ;;  %5331 = vmatprep.subr.bf16.mxu1 %v6574_v0 }
  0x17   : > { %378 = vst.msk [vmem:[#allocation2 + $0x90] sm:$0xff] %vm358_vm0, %v6574_v0  ;;  %379 = vst.msk [vmem:[#allocation2 + $0x98] sm:$0xff] %vm358_vm0, %v6574_v0  ;;  %s5200_s26 = sshll.u32 %s353_s25, 8  ;;  %v534_v11 = vrot.slane %v6825_v8, 1  ;;  %v536_v12 = vrot.slane %v521_v9, 1  ;;  %v548_v13 = vrot.slane %v521_v9, 2 }
  0x18   : > { %380 = vst.msk [vmem:[#allocation2 + $0xa0] sm:$0x3] %vm361_vm1, %v6574_v0  ;;  %383 = vst.msk [vmem:[#allocation2 + $0xb8] sm:$0x3] %vm361_vm1, %v6574_v0  ;;  %s6812_s29 = scalar_lea.vmem %s8504_s0, %s5200_s26  ;;  %v545_v14 = vrot.slane %v6823_v7, 2  ;;  %v546_v15 = vrot.slane %v6825_v8, 2 }
  0x19   : > { %381 = vst.msk [vmem:[#allocation2 + $0xa8] sm:$0xff] %vm358_vm0, %v6574_v0  ;;  %382 = vst.msk [vmem:[#allocation2 + $0xb0] sm:$0xff] %vm358_vm0, %v6574_v0  ;;  %v414_v1 = vld [vmem:[%s6812_s29] sm:$0xff]  ;;  %v415_v2 = vld [vmem:[%s6812_s29 + $0x8] sm:$0xff]  ;;  %v535_v16 = vsel %vm532_vm2, %v533_v10, %v534_v11  ;;  %v537_v17 = vsel %vm532_vm2, %v534_v11, %v536_v12  ;;  %s6581_s26 = smov 4   ;;  %vm851_vm6 = vcmask 130048  }
  0x1a   : > { %384 = vst.msk [vmem:[#allocation2 + $0xc0] sm:$0xff] %vm358_vm0, %v6574_v0  ;;  %385 = vst.msk [vmem:[#allocation2 + $0xc8] sm:$0xff] %vm358_vm0, %v6574_v0  ;;  %v416_v3 = vld [vmem:[%s6812_s29 + $0x10] sm:$0xff]  ;;  %v417_v4 = vld [vmem:[%s6812_s29 + $0x18] sm:$0xff]  ;;  %v5745_v18 = vpack.i.bf16 %v537_v17, %v535_v16  ;;  %v547_v19 = vsel %vm544_vm3, %v545_v14, %v546_v15  ;;  %v549_v20 = vsel %vm544_vm3, %v546_v15, %v548_v13  ;;  %s6588_s25 = smov 24   ;;  %s5197_s21 = sshll.u32 %s6668_s17, 4 }
  0x1b   : > { %386 = vst.msk [vmem:[#allocation2 + $0xd0] sm:$0x3] %vm361_vm1, %v6574_v0  ;;  %389 = vst.msk [vmem:[#allocation2 + $0xe8] sm:$0x3] %vm361_vm1, %v6574_v0  ;;  %v418_v5 = vld [vmem:[%s6812_s29 + $0x20] sm:$0xff]  ;;  %v419_v6 = vld [vmem:[%s6812_s29 + $0x28] sm:$0xff]  ;;  %v5750_v23 = vpack.i.bf16 %v549_v20, %v547_v19 }
  0x1c   : > { %387 = vst.msk [vmem:[#allocation2 + $0xd8] sm:$0xff] %vm358_vm0, %v6574_v0  ;;  %388 = vst.msk [vmem:[#allocation2 + $0xe0] sm:$0xff] %vm358_vm0, %v6574_v0  ;;  %5746 = vrot.lane.b32.xlu0 %v5745_v18, %s6575_s30  ;;  %v420_v13 = vld [vmem:[%s6812_s29 + $0x30] sm:$0xff]  ;;  %v421_v18 = vld [vmem:[%s6812_s29 + $0x38] sm:$0xff]  ;;  %s6591_s17 = smov [#allocation4]  }
  0x1d   : > { %390 = vst.msk [vmem:[#allocation2 + $0xf0] sm:$0xff] %vm358_vm0, %v6574_v0  ;;  %391 = vst.msk [vmem:[#allocation2 + $0xf8] sm:$0xff] %vm358_vm0, %v6574_v0  ;;  %v422_v19 = vld [vmem:[%s6812_s29 + $0x40] sm:$0xff] }
  0x1e   : > { %392 = vst.msk [vmem:[#allocation2 + $0x100] sm:$0x3] %vm361_vm1, %v6574_v0  ;;  %395 = vst.msk [vmem:[#allocation2 + $0x118] sm:$0x3] %vm361_vm1, %v6574_v0 }
  0x1f   : > { %393 = vst.msk [vmem:[#allocation2 + $0x108] sm:$0xff] %vm358_vm0, %v6574_v0  ;;  %394 = vst.msk [vmem:[#allocation2 + $0x110] sm:$0xff] %vm358_vm0, %v6574_v0 }
  0x20   : > { %396 = vst.msk [vmem:[#allocation2 + $0x120] sm:$0xff] %vm358_vm0, %v6574_v0  ;;  %397 = vst.msk [vmem:[#allocation2 + $0x128] sm:$0xff] %vm358_vm0, %v6574_v0  ;;  %5751 = vrot.lane.b32.xlu0 %v5750_v23, %s6577_s12  ;;  %v423_v23 = vld [vmem:[%s6812_s29 + $0x48] sm:$0xff] }
  0x21   : > { %398 = vst.msk [vmem:[#allocation2 + $0x130] sm:$0x3] %vm361_vm1, %v6574_v0  ;;  %401 = vst.msk [vmem:[#allocation2 + $0x148] sm:$0x3] %vm361_vm1, %v6574_v0 }
  0x22   : > { %399 = vst.msk [vmem:[#allocation2 + $0x138] sm:$0xff] %vm358_vm0, %v6574_v0  ;;  %400 = vst.msk [vmem:[#allocation2 + $0x140] sm:$0xff] %vm358_vm0, %v6574_v0 }
  0x23   : > { %402 = vst.msk [vmem:[#allocation2 + $0x150] sm:$0xff] %vm358_vm0, %v6574_v0  ;;  %403 = vst.msk [vmem:[#allocation2 + $0x158] sm:$0xff] %vm358_vm0, %v6574_v0 }
  0x24   : > { %404 = vst.msk [vmem:[#allocation2 + $0x160] sm:$0x3] %vm361_vm1, %v6574_v0  ;;  %407 = vst.msk [vmem:[#allocation2 + $0x178] sm:$0x3] %vm361_vm1, %v6574_v0 }
  0x25   : > { %405 = vst.msk [vmem:[#allocation2 + $0x168] sm:$0xff] %vm358_vm0, %v6574_v0  ;;  %406 = vst.msk [vmem:[#allocation2 + $0x170] sm:$0xff] %vm358_vm0, %v6574_v0 }
  0x26   : > { %408 = vst.msk [vmem:[#allocation2 + $0x180] sm:$0xff] %vm358_vm0, %v6574_v0  ;;  %409 = vst.msk [vmem:[#allocation2 + $0x188] sm:$0xff] %vm358_vm0, %v6574_v0 }
  0x27   : > { %410 = vst.msk [vmem:[#allocation2 + $0x190] sm:$0x3] %vm361_vm1, %v6574_v0  ;;  %413 = vst.msk [vmem:[#allocation2 + $0x1a8] sm:$0x3] %vm361_vm1, %v6574_v0 }
  0x28   : > { %411 = vst.msk [vmem:[#allocation2 + $0x198] sm:$0xff] %vm358_vm0, %v6574_v0  ;;  %412 = vst.msk [vmem:[#allocation2 + $0x1a0] sm:$0xff] %vm358_vm0, %v6574_v0 }
  0x29   : > { %447 = vst.msk [vmem:[#allocation2 + $0x19] sm:$0xff] %vm358_vm0, %v414_v1  ;;  %448 = vst.msk [vmem:[#allocation2 + $0x21] sm:$0xff] %vm358_vm0, %v415_v2 }
  0x2a   : > { %449 = vst.msk [vmem:[#allocation2 + $0x31] sm:$0xff] %vm358_vm0, %v416_v3  ;;  %450 = vst.msk [vmem:[#allocation2 + $0x39] sm:$0xff] %vm358_vm0, %v417_v4 }
  0x2b   : > { %451 = vst.msk [vmem:[#allocation2 + $0x49] sm:$0xff] %vm358_vm0, %v418_v5  ;;  %452 = vst.msk [vmem:[#allocation2 + $0x51] sm:$0xff] %vm358_vm0, %v419_v6 }
  0x2c   : > { %484 = vst.msk [vmem:[#allocation3] sm:$0xff] %vm483_vm4, %v6574_v0  ;;  %487 = vst.msk [vmem:[#allocation3 + $0x10] sm:$0xff] %vm483_vm4, %v6574_v0 }
  0x2d   : > { %489 = vst.msk [vmem:[#allocation3 + $0x20] sm:$0xff] %vm483_vm4, %v6574_v0  ;;  %491 = vst.msk [vmem:[#allocation3 + $0x30] sm:$0xff] %vm483_vm4, %v6574_v0 }
  0x2e   : > { %493 = vst.msk [vmem:[#allocation3 + $0x40] sm:$0xff] %vm483_vm4, %v6574_v0  ;;  %495 = vst.msk [vmem:[#allocation3 + $0x50] sm:$0xff] %vm483_vm4, %v6574_v0 }
  0x2f   : > { %497 = vst.msk [vmem:[#allocation3 + $0x60] sm:$0xff] %vm483_vm4, %v6574_v0  ;;  %499 = vst.msk [vmem:[#allocation3 + $0x70] sm:$0xff] %vm483_vm4, %v6574_v0 }
  0x30   : > { %501 = vst.msk [vmem:[#allocation3 + $0x80] sm:$0xff] %vm483_vm4, %v6574_v0  ;;  %503 = vst.msk [vmem:[#allocation3 + $0x90] sm:$0xff] %vm483_vm4, %v6574_v0  ;;  %v6859_v21 = vld [vmem:[#allocation2 + $0x18] sm:$0xff]  ;;  %v6861_v22 = vld [vmem:[#allocation2 + $0x20] sm:$0xff] }
  0x31   : > { %v6863_v24 = vld [vmem:[#allocation2 + $0x30] sm:$0xff]  ;;  %v5755_v25 = vpack.i.bf16 %v6861_v22, %v6859_v21  ;;  %v6867_v26 = vld [vmem:[#allocation2 + $0x38] sm:$0xff]  ;;  %v524_v27 = vld [vmem:[#allocation2 + $0x28] sm:$0x3]  ;;  %v576_v28 = vrot.slane %v6859_v21, 2  ;;  %v577_v29 = vrot.slane %v6861_v22, 2 }
  0x32   : > { %v565_v30 = vrot.slane %v6859_v21, 1  ;;  %v5760_v31 = vpack.i.bf16 %v6867_v26, %v6863_v24  ;;  %v579_v32 = vrot.slane %v524_v27, 2  ;;  %v566_v33 = vrot.slane %v6861_v22, 1  ;;  %v528_v35 = vld [vmem:[#allocation2 + $0x40] sm:$0x3]  ;;  %v6917_v59 = vld [vmem:[#allocation2 + $0x48] sm:$0xff] }
  0x33   : > { %v568_v34 = vrot.slane %v524_v27, 1  ;;  %5756 = vrot.lane.b32.xlu1 %v5755_v25, %s6576_s11  ;;  %v578_v36 = vsel %vm544_vm3, %v576_v28, %v577_v29  ;;  %v596_v37 = vrot.slane %v6863_v24, 1  ;;  %v6879_v38 = vrot.slane %v6867_v26, 1  ;;  %v6919_v60 = vld [vmem:[#allocation2 + $0x50] sm:$0xff]  ;;  %v719_v61 = vld [vmem:[#allocation2 + $0x58] sm:$0x3] }
  0x34   : > { %v599_v39 = vrot.slane %v528_v35, 1  ;;  %v580_v40 = vsel %vm544_vm3, %v577_v29, %v579_v32  ;;  %v567_v41 = vsel %vm532_vm2, %v565_v30, %v566_v33  ;;  %v607_v43 = vrot.slane %v6863_v24, 2  ;;  %v943_v11 = vld [vmem:[#allocation2 + $0x40] sm:$0x3]  ;;  %v946_v12 = vld [vmem:[#allocation2 + $0x58] sm:$0x3] }
  0x35   : > { %v569_v42 = vsel %vm532_vm2, %v566_v33, %v568_v34  ;;  %v5770_v44 = vpack.i.bf16 %v580_v40, %v578_v36  ;;  %v6888_v45 = vsel %vm532_vm2, %v596_v37, %v6879_v38  ;;  %v6893_v47 = vrot.slane %v6867_v26, 2  ;;  %453 = vst.msk [vmem:[#allocation2 + $0x61] sm:$0xff] %vm358_vm0, %v420_v13  ;;  %454 = vst.msk [vmem:[#allocation2 + $0x69] sm:$0xff] %vm358_vm0, %v421_v18 }
  0x36   : > { %v600_v46 = vsel %vm532_vm2, %v6879_v38, %v599_v39  ;;  %v610_v48 = vrot.slane %v528_v35, 2  ;;  %v5765_v49 = vpack.i.bf16 %v569_v42, %v567_v41  ;;  %v760_v62 = vrot.slane %v6919_v60, 1  ;;  %455 = vst.msk [vmem:[#allocation2 + $0x79] sm:$0xff] %vm358_vm0, %v422_v19  ;;  %456 = vst.msk [vmem:[#allocation2 + $0x81] sm:$0xff] %vm358_vm0, %v423_v23 }
  0x37   : > { %5761 = vrot.lane.b32.xlu1 %v5760_v31, %s6578_s18  ;;  %5771 = vrot.lane.b32.xlu0 %v5770_v44, %s6579_s20  ;;  %v5775_v50 = vpack.i.bf16 %v600_v46, %v6888_v45  ;;  %v6900_v51 = vsel %vm544_vm3, %v607_v43, %v6893_v47  ;;  %v759_v63 = vrot.slane %v6917_v59, 1  ;;  %v762_v1 = vrot.slane %v719_v61, 1 }
  0x38   : > { %v611_v52 = vsel %vm544_vm3, %v6893_v47, %v610_v48  ;;  %v771_v2 = vrot.slane %v6919_v60, 2  ;;  %v770_v3 = vrot.slane %v6917_v59, 2  ;;  %v773_v4 = vrot.slane %v719_v61, 2 }
  0x39   : > { %v5780_v56 = vpack.i.bf16 %v611_v52, %v6900_v51  ;;  %v761_v5 = vsel %vm532_vm2, %v759_v63, %v760_v62  ;;  %v763_v6 = vsel %vm532_vm2, %v760_v62, %v762_v1  ;;  %v5810_v9 = vpack.i.bf16 %v6919_v60, %v6917_v59 }
  0x3a   : > { %v772_v10 = vsel %vm544_vm3, %v770_v3, %v771_v2  ;;  %v5815_v14 = vpack.i.bf16 %v763_v6, %v761_v5  ;;  %v774_v15 = vsel %vm544_vm3, %v771_v2, %v773_v4  ;;  %v957_v16 = vrot.slane %v943_v11, 1 }
  0x3b   : > { %5766 = vrot.lane.b32.xlu1 %v5765_v49, %s6581_s26  ;;  %5776 = vrot.lane.b32.xlu0 %v5775_v50, %s6582_s27  ;;  %v988_v17 = vrot.slane %v946_v12, 1  ;;  %v968_v20 = vrot.slane %v943_v11, 2  ;;  %v5820_v27 = vpack.i.bf16 %v774_v15, %v772_v10  ;;  %v999_v30 = vrot.slane %v946_v12, 2 }
  0x3c   : > { %v958_v25 = vsel %vm532_vm2, %v6879_v38, %v957_v16  ;;  %v948_v35 = vld [vmem:[#allocation2 + $0x60] sm:$0xff]  ;;  %v949_v36 = vld [vmem:[#allocation2 + $0x68] sm:$0xff]  ;;  %v950_v37 = vld [vmem:[#allocation2 + $0x70] sm:$0x3] }
  0x3d   : > { %v5825_v28 = vpack.i.bf16 %v958_v25, %v6888_v45  ;;  %v989_v29 = vsel %vm532_vm2, %v760_v62, %v988_v17  ;;  %v1000_v34 = vsel %vm544_vm3, %v771_v2, %v999_v30  ;;  %v1016_v39 = vrot.slane %v948_v35, 1  ;;  %v1107_v52 = vld [vmem:[#allocation2 + $0x80] sm:$0xff]  ;;  %v1108_v53 = vld [vmem:[#allocation2 + $0x88] sm:$0x3] }
  0x3e   : > { %v5830_v32 = vpack.i.bf16 %v989_v29, %v761_v5  ;;  %v5840_v38 = vpack.i.bf16 %v1000_v34, %v772_v10  ;;  %v6961_v40 = vrot.slane %v949_v36, 1  ;;  %v1019_v41 = vrot.slane %v950_v37, 1 }
  0x3f   : > { %5781 = vrot.lane.b32.xlu1 %v5780_v56, %s6584_s28  ;;  %5786 = vrot.lane.b32.xlu0 %v5765_v49, %s6575_s30  ;;  %v5850_v42 = vpack.i.bf16 %v949_v36, %v948_v35  ;;  %v1027_v43 = vrot.slane %v948_v35, 2  ;;  %v6971_v46 = vrot.slane %v949_v36, 2  ;;  %v6985_v55 = vrot.slane %v1107_v52, 1 }
  0x40   : > { %v1020_v45 = vsel %vm532_vm2, %v6961_v40, %v1019_v41  ;;  %v1151_v57 = vrot.slane %v1108_v53, 1  ;;  %v6988_v61 = vrot.slane %v1107_v52, 2  ;;  %v1162_v3 = vrot.slane %v1108_v53, 2 }
  0x41   : > { %v6978_v49 = vsel %vm544_vm3, %v1027_v43, %v6971_v46 }
  0x42   : > { %v1152_v2 = vsel %vm532_vm2, %v6985_v55, %v1151_v57  ;;  %v1163_v6 = vsel %vm544_vm3, %v6988_v61, %v1162_v3 }
  0x43   : > { %5796 = vrot.lane.b32.xlu1 %v5770_v44, %s6577_s12  ;;  %5791 = vrot.lane.b32.xlu0 %v5760_v31, %s6576_s11  ;;  %v969_v31 = vsel %vm544_vm3, %v6893_v47, %v968_v20  ;;  %v6967_v44 = vsel %vm532_vm2, %v1016_v39, %v6961_v40  ;;  %v1030_v47 = vrot.slane %v950_v37, 2 }
  0x44   : > { %v5835_v33 = vpack.i.bf16 %v969_v31, %v6900_v51  ;;  %v5860_v48 = vpack.i.bf16 %v1020_v45, %v6967_v44  ;;  %v1106_v51 = vld [vmem:[#allocation2 + $0x78] sm:$0xff] }
  0x45   : > { %v6990_v62 = vpack.i.bf16 %v1107_v52, %v1106_v51  ;;  %v1159_v63 = vrot.slane %v1106_v51, 2 }
  0x47   : > { %5801 = vrot.lane.b32.xlu1 %v5775_v50, %s6581_s26  ;;  %5806 = vrot.lane.b32.xlu0 %v5780_v56, %s6579_s20  ;;  %v1031_v50 = vsel %vm544_vm3, %v6971_v46, %v1030_v47  ;;  %v1148_v56 = vrot.slane %v1106_v51, 1  ;;  %v7005_v5 = vsel %vm544_vm3, %v1159_v63, %v6988_v61 }
  0x48   : > { %v5870_v54 = vpack.i.bf16 %v1031_v50, %v6978_v49 }
  0x49   : > { %v6995_v1 = vsel %vm532_vm2, %v1148_v56, %v6985_v55 }
  0x4a   : > { %v5890_v4 = vpack.i.bf16 %v1152_v2, %v6995_v1 }
  0x4b   : > { %5811 = vrot.lane.b32.xlu1 %v5810_v9, %s6578_s18  ;;  %5816 = vrot.lane.b32.xlu0 %v5815_v14, %s6582_s27 }
  0x4f   : > { %5821 = vrot.lane.b32.xlu1 %v5820_v27, %s6584_s28  ;;  %5826 = vrot.lane.b32.xlu0 %v5825_v28, %s6575_s30 }
  0x53   : > { %5831 = vrot.lane.b32.xlu1 %v5830_v32, %s6575_s30  ;;  %5836 = vrot.lane.b32.xlu0 %v5835_v33, %s6577_s12 }
  0x57   : > { %5841 = vrot.lane.b32.xlu1 %v5840_v38, %s6577_s12  ;;  %5846 = vrot.lane.b32.xlu0 %v5810_v9, %s6576_s11  ;;  %v5900_v9 = vpack.i.bf16 %v1163_v6, %v7005_v5 }
  0x5b   : > { %5851 = vrot.lane.b32.xlu1 %v5850_v42, %s6576_s11  ;;  %5856 = vrot.lane.b32.xlu0 %v5830_v32, %s6581_s26 }
  0x5f   : > { %5861 = vrot.lane.b32.xlu1 %v5860_v48, %s6581_s26  ;;  %5866 = vrot.lane.b32.xlu0 %v5840_v38, %s6579_s20 }
  0x63   : > { %5871 = vrot.lane.b32.xlu1 %v5870_v54, %s6579_s20  ;;  %5876 = vrot.lane.b32.xlu0 %v5850_v42, %s6578_s18 }
  0x67   : > { %5881 = vrot.lane.b32.xlu1 %v6990_v62, %s6578_s18  ;;  %5886 = vrot.lane.b32.xlu0 %v5860_v48, %s6582_s27 }
  0x6b   : > { %5891 = vrot.lane.b32.xlu1 %v5890_v4, %s6582_s27  ;;  %5896 = vrot.lane.b32.xlu0 %v5870_v54, %s6584_s28 }
  0x6f   : > { %5901 = vrot.lane.b32.xlu1 %v5900_v9, %s6584_s28 }
  0x8e   : > { %v5747_v10 = vpop.permute.xlu0 %5746 }
  0x8f   : > { %v5749_v11 = vunpack.i.h.bf16 %v5747_v10  ;;  %v5748_v12 = vunpack.i.l.bf16 %v5747_v10 }
  0x91   : > { %v619_v17 = vsel %vm358_vm0, %v6825_v8, %v5749_v11  ;;  %v618_v18 = vsel %vm358_vm0, %v6823_v7, %v5748_v12 }
  0x92   : > { %v5752_v14 = vpop.permute.xlu0 %5751 }
  0x93   : > { %v5754_v15 = vunpack.i.h.bf16 %v5752_v14  ;;  %v5753_v16 = vunpack.i.l.bf16 %v5752_v14 }
  0x95   : > { %v621_v23 = vsel %vm620_vm8, %v618_v18, %v5753_v16  ;;  %v622_v25 = vsel %vm620_vm8, %v619_v17, %v5754_v15 }
  0xa5   : > { %v5757_v13 = vpop.permute.xlu1 %5756 }
  0xa6   : > { %v5759_v27 = vunpack.i.h.bf16 %v5757_v13  ;;  %v5758_v28 = vunpack.i.l.bf16 %v5757_v13 }
  0xa8   : > { %v624_v30 = vsel %vm623_vm9, %v621_v23, %v5758_v28  ;;  %v625_v8 = vsel %vm623_vm9, %v622_v25, %v5759_v27 }
  0xa9   : > { %v5762_v19 = vpop.permute.xlu1 %5761  ;;  %v5772_v20 = vpop.permute.xlu0 %5771 }
  0xaa   : > { %v5774_v33 = vunpack.i.h.bf16 %v5772_v20  ;;  %v5773_v34 = vunpack.i.l.bf16 %v5772_v20  ;;  %v5764_v37 = vunpack.i.h.bf16 %v5762_v19  ;;  %v5763_v38 = vunpack.i.l.bf16 %v5762_v19 }
  0xad   : > { %v5767_v29 = vpop.permute.xlu1 %5766  ;;  %v5777_v32 = vpop.permute.xlu0 %5776 }
  0xae   : > { %v5769_v31 = vunpack.i.h.bf16 %v5767_v29  ;;  %v5768_v7 = vunpack.i.l.bf16 %v5767_v29  ;;  %v5779_v35 = vunpack.i.h.bf16 %v5777_v32  ;;  %v5778_v36 = vunpack.i.l.bf16 %v5777_v32 }
  0xb0   : > { %v627_v39 = vsel %vm483_vm4, %v625_v8, %v5769_v31  ;;  %v626_v41 = vsel %vm483_vm4, %v624_v30, %v5768_v7 }
  0xb1   : > { %v630_v42 = vsel %vm628_vm10, %v627_v39, %v5774_v33  ;;  %v629_v43 = vsel %vm628_vm10, %v626_v41, %v5773_v34  ;;  %v5782_v45 = vpop.permute.xlu1 %5781  ;;  %v5787_v52 = vpop.permute.xlu0 %5786 }
  0xb2   : > { %v632_v47 = vsel %vm631_vm11, %v629_v43, %v5763_v38  ;;  %v633_v48 = vsel %vm631_vm11, %v630_v42, %v5764_v37  ;;  %v5784_v50 = vunpack.i.h.bf16 %v5782_v45  ;;  %v5783_v51 = vunpack.i.l.bf16 %v5782_v45 }
  0xb3   : > { %v635_v53 = vsel %vm634_vm12, %v632_v47, %v5778_v36  ;;  %v636_v54 = vsel %vm634_vm12, %v633_v48, %v5779_v35  ;;  %v5789_v56 = vunpack.i.h.bf16 %v5787_v52  ;;  %v5788_v57 = vunpack.i.l.bf16 %v5787_v52  ;;  %v1325_v48 = vld [vmem:[#allocation2 + $0x70] sm:$0x3] }
  0xb4   : > { %v638_v63 = vsel %vm637_vm13, %v635_v53, %v5783_v51  ;;  %v639_v2 = vsel %vm637_vm13, %v636_v54, %v5784_v50  ;;  %v1328_v50 = vld [vmem:[#allocation2 + $0x88] sm:$0x3]  ;;  %v424_v51 = vld [vmem:[%s6812_s29 + $0x50] sm:$0xff]  ;;  %v1339_v52 = vrot.slane %v1325_v48, 1  ;;  %v1350_v54 = vrot.slane %v1325_v48, 2 }
  0xb5   : > { %v782_v3 = vsel %vm358_vm0, %v6861_v22, %v5789_v56  ;;  %v781_v4 = vsel %vm358_vm0, %v6859_v21, %v5788_v57  ;;  %v5797_v6 = vpop.permute.xlu1 %5796  ;;  %v640_v9 = vpack.c.bf16 %v639_v2, %v638_v63  ;;  %v5792_v12 = vpop.permute.xlu0 %5791  ;;  %v1370_v53 = vrot.slane %v1328_v50, 1  ;;  %v425_v57 = vld [vmem:[%s6812_s29 + $0x58] sm:$0xff]  ;;  %457 = vst.msk [vmem:[#allocation2 + $0x91] sm:$0xff] %vm358_vm0, %v424_v51  ;;  %v426_v63 = vld [vmem:[%s6812_s29 + $0x60] sm:$0xff]  ;;  %v427_v2 = vld [vmem:[%s6812_s29 + $0x68] sm:$0xff] }
  0xb6   : > { %v5799_v10 = vunpack.i.h.bf16 %v5797_v6  ;;  %v5798_v11 = vunpack.i.l.bf16 %v5797_v6  ;;  %v5794_v13 = vunpack.i.h.bf16 %v5792_v12  ;;  %v5793_v14 = vunpack.i.l.bf16 %v5792_v12  ;;  %458 = vst.msk [vmem:[#allocation2 + $0x99] sm:$0xff] %vm358_vm0, %v425_v57  ;;  %459 = vst.msk [vmem:[#allocation2 + $0xa9] sm:$0xff] %vm358_vm0, %v426_v63  ;;  %v431_v12 = vld [vmem:[%s6812_s29 + $0x88] sm:$0xff] }
  0xb7   : > { %5328 = vmatmul.mubr.msk.bf16.vlgmr.msra.gmra.mrb[0].mxu1 %vm646_vm14, %v640_v9  ;;  %v1381_v56 = vrot.slane %v1328_v50, 2  ;;  %v1340_v6 = vsel %vm532_vm2, %v6961_v40, %v1339_v52  ;;  %v1371_v9 = vsel %vm532_vm2, %v6985_v55, %v1370_v53  ;;  %460 = vst.msk [vmem:[#allocation2 + $0xb1] sm:$0xff] %vm358_vm0, %v427_v2  ;;  %v430_v40 = vld [vmem:[%s6812_s29 + $0x80] sm:$0xff]  ;;  %464 = vst.msk [vmem:[#allocation2 + $0xe1] sm:$0xff] %vm358_vm0, %v431_v12 }
  0xb8   : > { %v784_v15 = vsel %vm620_vm8, %v782_v3, %v5799_v10  ;;  %v783_v16 = vsel %vm620_vm8, %v781_v4, %v5798_v11  ;;  %5332 = vmatpush3.bf16.msra.mxu1 %v6911_v58  ;;  %5333 = vmatprep.mubr.msk.bf16.mxu1 %vm6583_vm7, %v6574_v0  ;;  %v428_v3 = vld [vmem:[%s6812_s29 + $0x70] sm:$0xff]  ;;  %v429_v4 = vld [vmem:[%s6812_s29 + $0x78] sm:$0xff]  ;;  %v1351_v10 = vsel %vm544_vm3, %v6971_v46, %v1350_v54  ;;  %v442_v2 = vld [vmem:[%s6812_s29 + $0xe0] sm:$0xff] }
  0xb9   : > { %v5802_v22 = vpop.permute.xlu1 %5801  ;;  %5343 = vmatprep.subr.bf16.mxu1 %v6574_v0  ;;  %v5807_v18 = vpop.permute.xlu0 %5806  ;;  %v785_v19 = vsel %vm623_vm9, %v783_v16, %v5793_v14  ;;  %v786_v20 = vsel %vm623_vm9, %v784_v15, %v5794_v13  ;;  %v1382_v11 = vsel %vm544_vm3, %v6988_v61, %v1381_v56  ;;  %461 = vst.msk [vmem:[#allocation2 + $0xc1] sm:$0xff] %vm358_vm0, %v428_v3  ;;  %462 = vst.msk [vmem:[#allocation2 + $0xc9] sm:$0xff] %vm358_vm0, %v429_v4  ;;  %v432_v13 = vld [vmem:[%s6812_s29 + $0x90] sm:$0xff]  ;;  %v433_v46 = vld [vmem:[%s6812_s29 + $0x98] sm:$0xff] }
  0xba   : > { %v5804_v21 = vunpack.i.h.bf16 %v5802_v22  ;;  %v5803_v17 = vunpack.i.l.bf16 %v5802_v22  ;;  %v5809_v23 = vunpack.i.h.bf16 %v5807_v18  ;;  %v5808_v25 = vunpack.i.l.bf16 %v5807_v18  ;;  %463 = vst.msk [vmem:[#allocation2 + $0xd9] sm:$0xff] %vm358_vm0, %v430_v40  ;;  %465 = vst.msk [vmem:[#allocation2 + $0xf1] sm:$0xff] %vm358_vm0, %v432_v13  ;;  %v434_v61 = vld [vmem:[%s6812_s29 + $0xa0] sm:$0xff]  ;;  %v435_v15 = vld [vmem:[%s6812_s29 + $0xa8] sm:$0xff] }
  0xbb   : > { %v5905_v55 = vpack.i.bf16 %v1340_v6, %v6967_v44  ;;  %v5910_v14 = vpack.i.bf16 %v1371_v9, %v6995_v1  ;;  %466 = vst.msk [vmem:[#allocation2 + $0xf9] sm:$0xff] %vm358_vm0, %v433_v46  ;;  %467 = vst.msk [vmem:[#allocation2 + $0x109] sm:$0xff] %vm358_vm0, %v434_v61  ;;  %v436_v16 = vld [vmem:[%s6812_s29 + $0xb0] sm:$0xff]  ;;  %v437_v44 = vld [vmem:[%s6812_s29 + $0xb8] sm:$0xff]  ;;  %v5915_v1 = vpack.i.bf16 %v1351_v10, %v6978_v49 }
  0xbc   : > { %v787_v27 = vsel %vm483_vm4, %v785_v19, %v5803_v17  ;;  %v788_v28 = vsel %vm483_vm4, %v786_v20, %v5804_v21  ;;  %468 = vst.msk [vmem:[#allocation2 + $0x111] sm:$0xff] %vm358_vm0, %v435_v15  ;;  %v438_v22 = vld [vmem:[%s6812_s29 + $0xc0] sm:$0xff]  ;;  %v5920_v21 = vpack.i.bf16 %v1382_v11, %v7005_v5  ;;  %469 = vst.msk [vmem:[#allocation2 + $0x121] sm:$0xff] %vm358_vm0, %v436_v16  ;;  %v439_v17 = vld [vmem:[%s6812_s29 + $0xc8] sm:$0xff] }
  0xbd   : > { %v5812_v29 = vpop.permute.xlu1 %5811  ;;  %v5817_v31 = vpop.permute.xlu0 %5816  ;;  %v789_v7 = vsel %vm628_vm10, %v787_v27, %v5808_v25  ;;  %v790_v32 = vsel %vm628_vm10, %v788_v28, %v5809_v23  ;;  %5906 = vrot.lane.b32.xlu0 %v5905_v55, %s6575_s30  ;;  %5911 = vrot.lane.b32.xlu1 %v5910_v14, %s6575_s30  ;;  %470 = vst.msk [vmem:[#allocation2 + $0x129] sm:$0xff] %vm358_vm0, %v437_v44  ;;  %471 = vst.msk [vmem:[#allocation2 + $0x139] sm:$0xff] %vm358_vm0, %v438_v22  ;;  %v1330_v18 = vld [vmem:[#allocation2 + $0x90] sm:$0xff]  ;;  %v1331_v19 = vld [vmem:[#allocation2 + $0x98] sm:$0xff] }
  0xbe   : > { %v5814_v30 = vunpack.i.h.bf16 %v5812_v29  ;;  %v5813_v8 = vunpack.i.l.bf16 %v5812_v29  ;;  %v5819_v33 = vunpack.i.h.bf16 %v5817_v31  ;;  %v5818_v34 = vunpack.i.l.bf16 %v5817_v31  ;;  %472 = vst.msk [vmem:[#allocation2 + $0x141] sm:$0xff] %vm358_vm0, %v439_v17  ;;  %v1332_v20 = vld [vmem:[#allocation2 + $0xa0] sm:$0x3]  ;;  %v1710_v52 = vld [vmem:[#allocation2 + $0xb8] sm:$0x3]  ;;  %v443_v3 = vld [vmem:[%s6812_s29 + $0xe8] sm:$0xff] }
  0xbf   : > { %v1398_v23 = vrot.slane %v1330_v18, 1  ;;  %v5930_v49 = vpack.i.bf16 %v1331_v19, %v1330_v18  ;;  %v1399_v25 = vrot.slane %v1331_v19, 1  ;;  %v1401_v5 = vrot.slane %v1332_v20, 1  ;;  %v1707_v51 = vld [vmem:[#allocation2 + $0xa0] sm:$0x3]  ;;  %475 = vst.msk [vmem:[#allocation2 + $0x169] sm:$0xff] %vm358_vm0, %v442_v2 }
  0xc0   : > { %v791_v35 = vsel %vm631_vm11, %v789_v7, %v5813_v8  ;;  %v792_v36 = vsel %vm631_vm11, %v790_v32, %v5814_v30  ;;  %v1409_v27 = vrot.slane %v1330_v18, 2  ;;  %v1410_v28 = vrot.slane %v1331_v19, 2  ;;  %476 = vst.msk [vmem:[#allocation2 + $0x171] sm:$0xff] %vm358_vm0, %v443_v3  ;;  %v1713_v46 = vld [vmem:[#allocation2 + $0xc8] sm:$0xff]  ;;  %v1714_v61 = vld [vmem:[#allocation2 + $0xd0] sm:$0x3] }
  0xc1   : > { %v5822_v37 = vpop.permute.xlu1 %5821  ;;  %v793_v41 = vsel %vm634_vm12, %v791_v35, %v5818_v34  ;;  %v794_v42 = vsel %vm634_vm12, %v792_v36, %v5819_v33  ;;  %5916 = vrot.lane.b32.xlu0 %v5915_v1, %s6577_s12  ;;  %5921 = vrot.lane.b32.xlu1 %v5920_v21, %s6577_s12  ;;  %v1412_v29 = vrot.slane %v1332_v20, 2  ;;  %v1400_v30 = vsel %vm532_vm2, %v1398_v23, %v1399_v25  ;;  %v1488_v33 = vld [vmem:[#allocation2 + $0xa8] sm:$0xff]  ;;  %v1489_v34 = vld [vmem:[#allocation2 + $0xb0] sm:$0xff]  ;;  %v1490_v35 = vld [vmem:[#allocation2 + $0xb8] sm:$0x3] }
  0xc2   : > { %v5824_v38 = vunpack.i.h.bf16 %v5822_v37  ;;  %v5823_v39 = vunpack.i.l.bf16 %v5822_v37  ;;  %v1402_v8 = vsel %vm532_vm2, %v1399_v25, %v1401_v5  ;;  %v1411_v7 = vsel %vm544_vm3, %v1409_v27, %v1410_v28  ;;  %v444_v27 = vld [vmem:[%s6812_s29 + $0xf0] sm:$0xff] }
  0xc3   : > { %v5940_v31 = vpack.i.bf16 %v1402_v8, %v1400_v30  ;;  %v1413_v32 = vsel %vm544_vm3, %v1410_v28, %v1412_v29  ;;  %v1531_v37 = vrot.slane %v1489_v34, 1  ;;  %v1544_v50 = vrot.slane %v1490_v35, 2  ;;  %v1870_v29 = vld [vmem:[#allocation2 + $0xd8] sm:$0xff]  ;;  %v1872_v8 = vld [vmem:[#allocation2 + $0xe8] sm:$0x3]  ;;  %477 = vst.msk [vmem:[#allocation2 + $0x181] sm:$0xff] %vm358_vm0, %v444_v27 }
  0xc4   : > { %v795_v43 = vsel %vm637_vm13, %v793_v41, %v5823_v39  ;;  %v796_v45 = vsel %vm637_vm13, %v794_v42, %v5824_v38  ;;  %v5950_v36 = vpack.i.bf16 %v1413_v32, %v1411_v7  ;;  %v1530_v38 = vrot.slane %v1488_v33, 1  ;;  %v440_v41 = vld [vmem:[%s6812_s29 + $0xd0] sm:$0xff] }
  0xc5   : > { %v797_v47 = vpack.c.bf16 %v796_v45, %v795_v43  ;;  %5926 = vrot.lane.b32.xlu0 %v6990_v62, %s6576_s11  ;;  %5931 = vrot.lane.b32.xlu1 %v5930_v49, %s6576_s11  ;;  %v1533_v39 = vrot.slane %v1490_v35, 1  ;;  %v441_v62 = vld [vmem:[%s6812_s29 + $0xd8] sm:$0xff]  ;;  %473 = vst.msk [vmem:[#allocation2 + $0x151] sm:$0xff] %vm358_vm0, %v440_v41  ;;  %v1542_v42 = vrot.slane %v1489_v34, 2  ;;  %v5960_v43 = vpack.i.bf16 %v1489_v34, %v1488_v33  ;;  %v2089_v41 = vld [vmem:[#allocation2 + $0xd0] sm:$0x3] }
  0xc6   : > { %474 = vst.msk [vmem:[#allocation2 + $0x159] sm:$0xff] %vm358_vm0, %v441_v62  ;;  %v1541_v45 = vrot.slane %v1488_v33, 2  ;;  %v1721_v57 = vrot.slane %v1707_v51, 1  ;;  %v1752_v63 = vrot.slane %v1710_v52, 1  ;;  %v1732_v10 = vrot.slane %v1707_v51, 2  ;;  %v2094_v3 = vld [vmem:[#allocation2 + $0xf0] sm:$0xff] }
  0xc7   : > { %5334 = vmatmul.mubr.msk.bf16.vlgmr.msra.gmra.mrb[4].mxu1 %vm646_vm14, %v797_v47  ;;  %v1532_v47 = vsel %vm532_vm2, %v1530_v38, %v1531_v37  ;;  %v1534_v48 = vsel %vm532_vm2, %v1531_v37, %v1533_v39  ;;  %v1545_v56 = vsel %vm544_vm3, %v1542_v42, %v1544_v50  ;;  %v1763_v11 = vrot.slane %v1710_v52, 2  ;;  %v2092_v62 = vld [vmem:[#allocation2 + $0xe8] sm:$0x3] }
  0xc8   : > { %5345 = vmatprep.mubr.msk.bf16.mxu1 %vm6583_vm7, %v6574_v0  ;;  %v5970_v53 = vpack.i.bf16 %v1534_v48, %v1532_v47  ;;  %v1543_v54 = vsel %vm544_vm3, %v1541_v45, %v1542_v42  ;;  %v1722_v6 = vsel %vm532_vm2, %v1399_v25, %v1721_v57  ;;  %v1753_v9 = vsel %vm532_vm2, %v1531_v37, %v1752_v63 }
  0xc9   : > { %5936 = vrot.lane.b32.xlu0 %v5910_v14, %s6581_s26  ;;  %5941 = vrot.lane.b32.xlu1 %v5940_v31, %s6581_s26  ;;  %v5980_v4 = vpack.i.bf16 %v1545_v56, %v1543_v54  ;;  %v5985_v40 = vpack.i.bf16 %v1722_v6, %v1400_v30  ;;  %v5990_v12 = vpack.i.bf16 %v1753_v9, %v1532_v47  ;;  %v1712_v14 = vld [vmem:[#allocation2 + $0xc0] sm:$0xff]  ;;  %v1781_v22 = vrot.slane %v1713_v46, 1 }
  0xca   : > { %v1733_v13 = vsel %vm544_vm3, %v1410_v28, %v1732_v10  ;;  %v1764_v55 = vsel %vm544_vm3, %v1542_v42, %v1763_v11  ;;  %v1780_v44 = vrot.slane %v1712_v14, 1  ;;  %v1783_v1 = vrot.slane %v1714_v61, 1  ;;  %v445_v28 = vld [vmem:[%s6812_s29 + $0xf8] sm:$0xff]  ;;  %v1871_v30 = vld [vmem:[#allocation2 + $0xe0] sm:$0xff]  ;;  %s8515_s29 = smov 28  }
  0xcb   : > { %v5995_v15 = vpack.i.bf16 %v1733_v13, %v1411_v7  ;;  %v6000_v16 = vpack.i.bf16 %v1764_v55, %v1543_v54  ;;  %v1791_v17 = vrot.slane %v1712_v14, 2  ;;  %v1792_v20 = vrot.slane %v1713_v46, 2  ;;  %478 = vst.msk [vmem:[#allocation2 + $0x189] sm:$0xff] %vm358_vm0, %v445_v28  ;;  %v2096_v6 = vld [vmem:[#allocation2 + $0x100] sm:$0x3]  ;;  %v5827_v13 = vpop.permute.xlu0 %5826  ;;  %v5832_v55 = vpop.permute.xlu1 %5831 }
  0xcc   : > { %v1782_v18 = vsel %vm532_vm2, %v1780_v44, %v1781_v22  ;;  %v1784_v19 = vsel %vm532_vm2, %v1781_v22, %v1783_v1  ;;  %v1794_v23 = vrot.slane %v1714_v61, 2  ;;  %v1913_v7 = vrot.slane %v1871_v30, 1 }
  0xcd   : > { %5946 = vrot.lane.b32.xlu0 %v5920_v21, %s6579_s20  ;;  %5951 = vrot.lane.b32.xlu1 %v5950_v36, %s6579_s20  ;;  %v6010_v21 = vpack.i.bf16 %v1713_v46, %v1712_v14  ;;  %v1793_v25 = vsel %vm544_vm3, %v1791_v17, %v1792_v20  ;;  %v1912_v32 = vrot.slane %v1870_v29, 1  ;;  %v1915_v33 = vrot.slane %v1872_v8, 1 }
  0xce   : > { %v1795_v5 = vsel %vm544_vm3, %v1792_v20, %v1794_v23  ;;  %v1924_v34 = vrot.slane %v1871_v30, 2  ;;  %v6040_v35 = vpack.i.bf16 %v1871_v30, %v1870_v29  ;;  %v1926_v39 = vrot.slane %v1872_v8, 2  ;;  %v2254_v23 = vld [vmem:[#allocation2 + $0x118] sm:$0x3] }
  0xcf   : > { %v1914_v37 = vsel %vm532_vm2, %v1912_v32, %v1913_v7  ;;  %v1916_v38 = vsel %vm532_vm2, %v1913_v7, %v1915_v33  ;;  %v2103_v47 = vrot.slane %v2089_v41, 1  ;;  %v2134_v48 = vrot.slane %v2092_v62, 1 }
  0xd0   : > { %v6050_v42 = vpack.i.bf16 %v1916_v38, %v1914_v37  ;;  %v1927_v45 = vsel %vm544_vm3, %v1924_v34, %v1926_v39  ;;  %v2145_v54 = vrot.slane %v2092_v62, 2  ;;  %v2162_v11 = vrot.slane %v2094_v3, 1  ;;  %v2474_v62 = vld [vmem:[#allocation2 + $0x118] sm:$0x3] }
  0xd1   : > { %5956 = vrot.lane.b32.xlu0 %v5930_v49, %s6578_s18  ;;  %5961 = vrot.lane.b32.xlu1 %v5960_v43, %s6578_s18  ;;  %v6020_v49 = vpack.i.bf16 %v1784_v19, %v1782_v18  ;;  %v2104_v51 = vsel %vm532_vm2, %v1781_v22, %v2103_v47  ;;  %v2135_v52 = vsel %vm532_vm2, %v1913_v7, %v2134_v48  ;;  %v2173_v46 = vrot.slane %v2094_v3, 2  ;;  %v5837_v22 = vpop.permute.xlu0 %5836  ;;  %v2252_v19 = vld [vmem:[#allocation2 + $0x108] sm:$0xff] }
  0xd2   : > { %v6065_v56 = vpack.i.bf16 %v2104_v51, %v1782_v18  ;;  %v6070_v57 = vpack.i.bf16 %v2135_v52, %v1914_v37  ;;  %v2146_v2 = vsel %vm544_vm3, %v1924_v34, %v2145_v54  ;;  %v2176_v44 = vrot.slane %v2096_v6, 2  ;;  %v7193_v18 = vpop.permute.xlu1 %5841 }
  0xd3   : > { %v2297_v27 = vrot.slane %v2254_v23, 1  ;;  %v5829_v30 = vunpack.i.h.bf16 %v5827_v13  ;;  %v5833_v8 = vunpack.i.l.bf16 %v5832_v55  ;;  %v2305_v33 = vrot.slane %v2252_v19, 2 }
  0xd4   : > { %v5834_v37 = vunpack.i.h.bf16 %v5832_v55  ;;  %v5838_v38 = vunpack.i.l.bf16 %v5837_v22 }
  0xd5   : > { %5966 = vrot.lane.b32.xlu0 %v5940_v31, %s6582_s27  ;;  %5971 = vrot.lane.b32.xlu1 %v5970_v53, %s6582_s27  ;;  %v6030_v31 = vpack.i.bf16 %v1795_v5, %v1793_v25  ;;  %v2114_v53 = vrot.slane %v2089_v41, 2  ;;  %v2294_v5 = vrot.slane %v2252_v19, 1  ;;  %v5847_v28 = vpop.permute.xlu0 %5846  ;;  %v2471_v41 = vld [vmem:[#allocation2 + $0x100] sm:$0x3]  ;;  %v1039_v48 = vsel %vm358_vm0, %v6867_v26, %v5829_v30 }
  0xd6   : > { %v2485_v26 = vrot.slane %v2471_v41, 1 }
  0xd7   : > { %v2115_v63 = vsel %vm544_vm3, %v1792_v20, %v2114_v53  ;;  %v2253_v20 = vld [vmem:[#allocation2 + $0x110] sm:$0xff] }
  0xd8   : > { %v6075_v9 = vpack.i.bf16 %v2115_v63, %v1793_v25  ;;  %v2295_v25 = vrot.slane %v2253_v20, 1  ;;  %v7205_v7 = vrot.slane %v2253_v20, 2  ;;  %v7207_v32 = vpack.i.bf16 %v2253_v20, %v2252_v19 }
  0xd9   : > { %5976 = vrot.lane.b32.xlu0 %v5950_v36, %s6584_s28  ;;  %5981 = vrot.lane.b32.xlu1 %v5980_v4, %s6584_s28  ;;  %v1923_v36 = vrot.slane %v1870_v29, 2  ;;  %v2095_v4 = vld [vmem:[#allocation2 + $0xf8] sm:$0xff]  ;;  %v5828_v29 = vunpack.i.l.bf16 %v5827_v13  ;;  %v5857_v51 = vpop.permute.xlu0 %5856 }
  0xda   : > { %v6090_v14 = vpack.i.bf16 %v2095_v4, %v2094_v3  ;;  %v2307_v54 = vsel %vm544_vm3, %v2305_v33, %v7205_v7  ;;  %v5848_v3 = vunpack.i.l.bf16 %v5847_v28  ;;  %v5858_v55 = vunpack.i.l.bf16 %v5857_v51  ;;  %v7267_v33 = vld [vmem:[#allocation2 + $0x120] sm:$0xff] }
  0xdd   : > { %5986 = vrot.lane.b32.xlu0 %v5985_v40, %s6575_s30  ;;  %5991 = vrot.lane.b32.xlu1 %v5990_v12, %s6575_s30  ;;  %v7172_v40 = vrot.slane %v2095_v4, 1  ;;  %v5867_v19 = vpop.permute.xlu0 %5866 }
  0xdf   : > { %v7178_v61 = vsel %vm532_vm2, %v2162_v11, %v7172_v40  ;;  %v505_v11 = vlaneseq }
  0xe1   : > { %5996 = vrot.lane.b32.xlu0 %v5995_v15, %s6577_s12  ;;  %6001 = vrot.lane.b32.xlu1 %v6000_v16, %s6577_s12 }
  0xe5   : > { %6006 = vrot.lane.b32.xlu0 %v5960_v43, %s6576_s11  ;;  %6011 = vrot.lane.b32.xlu1 %v6010_v21, %s6576_s11  ;;  %v1925_v43 = vsel %vm544_vm3, %v1923_v36, %v1924_v34  ;;  %v2296_v34 = vsel %vm532_vm2, %v2294_v5, %v2295_v25  ;;  %v2308_v36 = vrot.slane %v2254_v23, 2 }
  0xe6   : > { %v6060_v50 = vpack.i.bf16 %v1927_v45, %v1925_v43  ;;  %v6080_v10 = vpack.i.bf16 %v2146_v2, %v1925_v43  ;;  %v5839_v43 = vunpack.i.h.bf16 %v5837_v22  ;;  %v5843_v45 = vunpack.i.l.bf16 %v7193_v18 }
  0xe7   : > { %v5844_v2 = vunpack.i.h.bf16 %v7193_v18  ;;  %v5859_v18 = vunpack.i.h.bf16 %v5857_v51 }
  0xe9   : > { %6016 = vrot.lane.b32.xlu0 %v5990_v12, %s6581_s26  ;;  %6021 = vrot.lane.b32.xlu1 %v6020_v49, %s6581_s26  ;;  %v2165_v12 = vrot.slane %v2096_v6, 1  ;;  %v1041_v6 = vsel %vm620_vm8, %v1039_v48, %v5839_v43 }
  0xeb   : > { %v2166_v15 = vsel %vm532_vm2, %v7172_v40, %v2165_v12 }
  0xec   : > { %v6100_v1 = vpack.i.bf16 %v2166_v15, %v7178_v61  ;;  %v2496_v15 = vrot.slane %v2471_v41, 2 }
  0xed   : > { %6026 = vrot.lane.b32.xlu0 %v6000_v16, %s6579_s20  ;;  %6031 = vrot.lane.b32.xlu1 %v6030_v31, %s6579_s20  ;;  %v7182_v16 = vrot.slane %v2095_v4, 2 }
  0xef   : > { %v2177_v17 = vsel %vm544_vm3, %v7182_v16, %v2176_v44  ;;  %v2527_v44 = vrot.slane %v2474_v62, 2 }
  0xf1   : > { %6036 = vrot.lane.b32.xlu0 %v6010_v21, %s6578_s18  ;;  %6041 = vrot.lane.b32.xlu1 %v6040_v35, %s6578_s18  ;;  %v7189_v21 = vsel %vm544_vm3, %v2173_v46, %v7182_v16 }
  0xf5   : > { %6046 = vrot.lane.b32.xlu0 %v6020_v49, %s6582_s27  ;;  %6051 = vrot.lane.b32.xlu1 %v6050_v42, %s6582_s27  ;;  %v7198_v49 = vpack.i.bf16 %v2177_v17, %v7189_v21  ;;  %v1038_v42 = vsel %vm358_vm0, %v6863_v24, %v5828_v29 }
  0xf6   : > { %v1040_v63 = vsel %vm620_vm8, %v1038_v42, %v5838_v38  ;;  %v5877_v42 = vpop.permute.xlu0 %5876 }
  0xf7   : > { %v1042_v17 = vsel %vm623_vm9, %v1040_v63, %v5848_v3 }
  0xf8   : > { %v1044_v30 = vsel %vm483_vm4, %v1042_v17, %v5858_v55 }
  0xf9   : > { %6056 = vrot.lane.b32.xlu0 %v6030_v31, %s6584_s28  ;;  %6061 = vrot.lane.b32.xlu1 %v6060_v50, %s6584_s28  ;;  %v7200_v31 = vpop.permute.xlu1 %5851  ;;  %v1170_v50 = vsel %vm358_vm0, %v6917_v59, %v5833_v8  ;;  %v1171_v59 = vsel %vm358_vm0, %v6919_v60, %v5834_v37  ;;  %v2497_v8 = vsel %vm544_vm3, %v7182_v16, %v2496_v15  ;;  %v5869_v37 = vunpack.i.h.bf16 %v5867_v19 }
  0xfa   : > { %v5854_v12 = vunpack.i.h.bf16 %v7200_v31  ;;  %v5853_v13 = vunpack.i.l.bf16 %v7200_v31  ;;  %v1173_v22 = vsel %vm620_vm8, %v1171_v59, %v5844_v2  ;;  %v2528_v31 = vsel %vm544_vm3, %v7205_v7, %v2527_v44 }
  0xfb   : > { %v6155_v43 = vpack.i.bf16 %v2497_v8, %v7189_v21  ;;  %v508_v2 = vand.u32 127, %v505_v11 }
  0xfc   : > { %v1175_v29 = vsel %vm623_vm9, %v1173_v22, %v5854_v12 }
  0xfd   : > { %6066 = vrot.lane.b32.xlu0 %v6065_v56, %s6575_s30  ;;  %6071 = vrot.lane.b32.xlu1 %v6070_v57, %s6575_s30  ;;  %v2309_v56 = vsel %vm544_vm3, %v7205_v7, %v2308_v36  ;;  %v5862_v4 = vpop.permute.xlu1 %5861  ;;  %v7278_v7 = vld [vmem:[%s8507_s3] ss:$0 sm:$0xff] }
  0xfe   : > { %v6140_v60 = vpack.i.bf16 %v2309_v56, %v2307_v54  ;;  %v5863_v23 = vunpack.i.l.bf16 %v5862_v4  ;;  %v5864_v36 = vunpack.i.h.bf16 %v5862_v4 }
 0x100   : > { %v1177_v51 = vsel %vm483_vm4, %v1175_v29, %v5864_v36 }
 0x101   : > { %6076 = vrot.lane.b32.xlu0 %v6075_v9, %s6577_s12  ;;  %6081 = vrot.lane.b32.xlu1 %v6080_v10, %s6577_s12  ;;  %v1172_v9 = vsel %vm620_vm8, %v1170_v50, %v5843_v45  ;;  %v7284_v45 = vpack.i.bf16 %v2528_v31, %v2307_v54 }
 0x102   : > { %v1174_v5 = vsel %vm623_vm9, %v1172_v9, %v5853_v13 }
 0x103   : > { %v1176_v38 = vsel %vm483_vm4, %v1174_v5, %v5863_v23 }
 0x105   : > { %6086 = vrot.lane.b32.xlu0 %v6040_v35, %s6576_s11  ;;  %6091 = vrot.lane.b32.xlu1 %v6090_v14, %s6576_s11  ;;  %v2298_v35 = vsel %vm532_vm2, %v2295_v25, %v2297_v27 }
 0x106   : > { %v6130_v53 = vpack.i.bf16 %v2298_v35, %v2296_v34  ;;  %v2477_v35 = vld [vmem:[#allocation2 + $0x128] sm:$0xff] }
 0x107   : > { %v7314_v15 = vrot.slane %v2477_v35, 2 }
 0x109   : > { %6096 = vrot.lane.b32.xlu0 %v6070_v57, %s6581_s26  ;;  %6101 = vrot.lane.b32.xlu1 %v6100_v1, %s6581_s26  ;;  %v2516_v57 = vrot.slane %v2474_v62, 1 }
 0x10b   : > { %v2517_v46 = vsel %vm532_vm2, %v2295_v25, %v2516_v57  ;;  %v7253_v25 = vpop.permute.xlu1 %5871 }
 0x10c   : > { %v5873_v62 = vunpack.i.l.bf16 %v7253_v25  ;;  %v5874_v56 = vunpack.i.h.bf16 %v7253_v25 }
 0x10d   : > { %6106 = vrot.lane.b32.xlu0 %v6080_v10, %s6579_s20  ;;  %6111 = vrot.lane.b32.xlu1 %v7198_v49, %s6579_s20  ;;  %v5849_v10 = vunpack.i.h.bf16 %v5847_v28  ;;  %v7259_v28 = vpack.i.bf16 %v2517_v46, %v2296_v34  ;;  %v2478_v34 = vld [vmem:[#allocation2 + $0x130] sm:$0x3]  ;;  %v2555_v46 = vrot.slane %v7267_v33, 2 }
 0x10e   : > { %v2547_v50 = vrot.slane %v2478_v34, 1  ;;  %v1178_v57 = vsel %vm628_vm10, %v1176_v38, %v5873_v62  ;;  %v2558_v44 = vrot.slane %v2478_v34, 2 }
 0x10f   : > { %v1043_v20 = vsel %vm623_vm9, %v1041_v6, %v5849_v10  ;;  %v7302_v6 = vpack.i.bf16 %v2477_v35, %v7267_v33  ;;  %v7331_v8 = vsel %vm544_vm3, %v2555_v46, %v7314_v15 }
 0x110   : > { %v2559_v31 = vsel %vm544_vm3, %v7314_v15, %v2558_v44 }
 0x111   : > { %6116 = vrot.lane.b32.xlu0 %v6090_v14, %s6578_s18  ;;  %6121 = vrot.lane.b32.xlu1 %v7207_v32, %s6578_s18  ;;  %v2486_v14 = vsel %vm532_vm2, %v7172_v40, %v2485_v26  ;;  %v7251_v40 = vld [vmem:[%s8506_s2] ss:$0 sm:$0xff]  ;;  %v5882_v26 = vpop.permute.xlu1 %5881 }
 0x112   : > { %v6145_v27 = vpack.i.bf16 %v2486_v14, %v7178_v61  ;;  %v5868_v61 = vunpack.i.l.bf16 %v5867_v19  ;;  %v5887_v14 = vpop.permute.xlu0 %5886  ;;  %v5884_v25 = vunpack.i.h.bf16 %v5882_v26 }
 0x113   : > { %v5889_v34 = vunpack.i.h.bf16 %v5887_v14 }
 0x115   : > { %6126 = vrot.lane.b32.xlu0 %v6100_v1, %s6582_s27  ;;  %6131 = vrot.lane.b32.xlu1 %v6130_v53, %s6582_s27  ;;  %v7245_v1 = vshrl.u32 %v505_v11, 7  ;;  %v1046_v53 = vsel %vm628_vm10, %v1044_v30, %v5868_v61  ;;  %v5892_v23 = vpop.permute.xlu1 %5891  ;;  %v1179_v30 = vsel %vm628_vm10, %v1177_v51, %v5874_v56 }
 0x116   : > { %v5897_v38 = vpop.permute.xlu0 %5896 }
 0x117   : > { %v509_v16 = vmul.u32 2, %v7245_v1  ;;  %v5899_v56 = vunpack.i.h.bf16 %v5897_v38 }
 0x119   : > { %6136 = vrot.lane.b32.xlu0 %v7198_v49, %s6584_s28  ;;  %6141 = vrot.lane.b32.xlu1 %v6140_v60, %s6584_s28  ;;  %v1045_v49 = vsel %vm483_vm4, %v1043_v20, %v5859_v18  ;;  %v514_v4 = vadd.s32 1, %v509_v16  ;;  %v5878_v60 = vunpack.i.l.bf16 %v5877_v42  ;;  %vm7317_vm15 = vcmp.eq.s32.totalorder %v508_v2, %v509_v16  ;;  %v5902_v51 = vpop.permute.xlu1 %5901 }
 0x11a   : > { %v5883_v20 = vunpack.i.l.bf16 %v5882_v26  ;;  %v7348_v16 = vpack.i.bf16 %v2559_v31, %v7331_v8  ;;  %v5898_v26 = vunpack.i.l.bf16 %v5897_v38 }
 0x11b   : > { %vm515_vm1 = vcmp.eq.s32.totalorder %v508_v2, %v514_v4  ;;  %v1048_v36 = vsel %vm631_vm11, %v1046_v53, %v5878_v60  ;;  %v5903_v2 = vunpack.i.l.bf16 %v5902_v51 }
 0x11c   : > { %v1180_v61 = vsel %vm631_vm11, %v1178_v57, %v5883_v20 }
 0x11d   : > { %6146 = vrot.lane.b32.xlu0 %v6145_v27, %s6575_s30  ;;  %6151 = vrot.lane.b32.xlu1 %v7259_v28, %s6575_s30 }
 0x121   : > { %6156 = vrot.lane.b32.xlu0 %v6155_v43, %s6577_s12  ;;  %6161 = vrot.lane.b32.xlu1 %v7284_v45, %s6577_s12  ;;  %v2635_v43 = vld [vmem:[#allocation2 + $0x140] sm:$0xff] }
 0x125   : > { %6166 = vrot.lane.b32.xlu0 %v7207_v32, %s6576_s11  ;;  %6171 = vrot.lane.b32.xlu1 %v7302_v6, %s6576_s11  ;;  %v5888_v32 = vunpack.i.l.bf16 %v5887_v14 }
 0x129   : > { %6176 = vrot.lane.b32.xlu0 %v7259_v28, %s6581_s26  ;;  %v1050_v28 = vsel %vm634_vm12, %v1048_v36, %v5888_v32  ;;  %v2859_v36 = vld [vmem:[#allocation2 + $0x158] sm:$0xff] }
 0x12d   : > { %6186 = vrot.lane.b32.xlu0 %v7284_v45, %s6579_s20  ;;  %v2688_v45 = vrot.slane %v2635_v43, 2 }
 0x131   : > { %6196 = vrot.lane.b32.xlu0 %v7302_v6, %s6578_s18 }
 0x18a   : > { %v7211_v39 = vpop.f32.mrb[0].mxu1 }
 0x18b   : > { %v5329_v47 = vpop.f32.mrb[1].mxu1  ;;  %v704_v41 = vmul.f32 %v7251_v40, %v7211_v39  ;;  %v2544_v39 = vrot.slane %v7267_v33, 1 }
 0x18c   : > { %v7220_v52 = vpop.f32.mrb[2].mxu1  ;;  %v7287_v47 = vrot.slane %v2477_v35, 1  ;;  %v5127_v35 = vsel %vm7317_vm15, 1.0, %v6574_v0  ;;  %vm485_vm15 = vcmask 25600  }
 0x18d   : > { %v5330_v24 = vpop.f32.mrb[3].mxu1  ;;  %v705_v48 = vmul.f32 %v7251_v40, %v7220_v52  ;;  %v712_v54 = vadd.f32 %v7278_v7, %v704_v41  ;;  %v5879_v52 = vunpack.i.h.bf16 %v5877_v42  ;;  %v1181_v41 = vsel %vm631_vm11, %v1179_v30, %v5884_v25  ;;  %v2634_v42 = vld [vmem:[#allocation2 + $0x138] sm:$0xff]  ;;  %488 = vst.msk [vmem:[#allocation3 + $0x18] sm:$0x3] %vm485_vm15, %v6574_v0  ;;  %486 = vst.msk [vmem:[#allocation3 + $0x8] sm:$0x3] %vm485_vm15, %v6574_v0 }
 0x18e   : > { %v1047_v24 = vsel %vm628_vm10, %v1045_v49, %v5869_v37  ;;  %v7306_v9 = vsel %vm532_vm2, %v2544_v39, %v7287_v47  ;;  %v2548_v55 = vsel %vm532_vm2, %v7287_v47, %v2547_v50  ;;  %v5128_v49 = vsel %vm515_vm1, 1.0, %v6574_v0  ;;  %v2636_v39 = vld [vmem:[#allocation2 + $0x148] sm:$0x3]  ;;  %490 = vst.msk [vmem:[#allocation3 + $0x28] sm:$0x3] %vm485_vm15, %v6574_v0 }
 0x18f   : > { %v713_v10 = vadd.f32 %v7278_v7, %v705_v48  ;;  %v714_v22 = vmax.f32 %v712_v54, 0.0  ;;  %v7326_v1 = vpack.i.bf16 %v2548_v55, %v7306_v9  ;;  %v1049_v37 = vsel %vm631_vm11, %v1047_v24, %v5879_v52  ;;  %492 = vst.msk [vmem:[#allocation3 + $0x38] sm:$0x3] %vm485_vm15, %v6574_v0  ;;  %494 = vst.msk [vmem:[#allocation3 + $0x48] sm:$0x3] %vm485_vm15, %v6574_v0 }
 0x190   : > { %v5894_v48 = vunpack.i.h.bf16 %v5892_v23  ;;  %v5893_v50 = vunpack.i.l.bf16 %v5892_v23  ;;  %v7350_v53 = vpack.c.bf16 %v5127_v35, %v5127_v35  ;;  %v7352_v24 = vpack.c.bf16 %v5128_v49, %v5128_v49  ;;  %v2858_v49 = vld [vmem:[#allocation2 + $0x150] sm:$0xff]  ;;  %496 = vst.msk [vmem:[#allocation3 + $0x58] sm:$0x3] %vm485_vm15, %v6574_v0  ;;  %498 = vst.msk [vmem:[#allocation3 + $0x68] sm:$0x3] %vm485_vm15, %v6574_v0 }
 0x191   : > { %v715_v5 = vmax.f32 %v713_v10, 0.0  ;;  %6181 = vrot.lane.b32.xlu1 %v7326_v1, %s6581_s26  ;;  %v2677_v54 = vrot.slane %v2635_v43, 1  ;;  %v2676_v57 = vrot.slane %v2634_v42, 1  ;;  %v6200_v4 = vpack.i.bf16 %v2635_v43, %v2634_v42  ;;  %6206 = vrot.lane.b32.xlu0 %v7326_v1, %s6582_s27  ;;  %500 = vst.msk [vmem:[#allocation3 + $0x78] sm:$0x3] %vm485_vm15, %v6574_v0 }
 0x192   : > { %v1182_v52 = vsel %vm634_vm12, %v1180_v61, %v5893_v50  ;;  %v1052_v10 = vsel %vm637_vm13, %v1050_v28, %v5898_v26  ;;  %v2690_v14 = vrot.slane %v2636_v39, 2  ;;  %v3016_v50 = vld [vmem:[#allocation2 + $0x168] sm:$0xff]  ;;  %v3018_v28 = vld [vmem:[#allocation2 + $0x178] sm:$0x3]  ;;  %502 = vst.msk [vmem:[#allocation3 + $0x88] sm:$0x3] %vm485_vm15, %v6574_v0 }
 0x193   : > { %v2678_v55 = vsel %vm532_vm2, %v2676_v57, %v2677_v54  ;;  %v1184_v46 = vsel %vm637_vm13, %v1182_v52, %v5903_v2  ;;  %v3069_v2 = vrot.slane %v3016_v50, 2  ;;  %504 = vst.msk [vmem:[#allocation3 + $0x98] sm:$0x3] %vm485_vm15, %v6574_v0 }
 0x195   : > { %6191 = vrot.lane.b32.xlu1 %v7348_v16, %s6579_s20  ;;  %6216 = vrot.lane.b32.xlu0 %v7348_v16, %s6584_s28 }
 0x199   : > { %6201 = vrot.lane.b32.xlu1 %v6200_v4, %s6578_s18 }
 0x19a   : > { %v835_v21 = vpop.f32.mrb[4].mxu1 }
 0x19b   : > { %v842_v59 = vmul.f32 %v7251_v40, %v835_v21  ;;  %v5335_v63 = vpop.f32.mrb[5].mxu1  ;;  %v1051_v21 = vsel %vm634_vm12, %v1049_v37, %v5889_v34  ;;  %v2860_v37 = vld [vmem:[#allocation2 + $0x160] sm:$0x3]  ;;  %v2926_v34 = vrot.slane %v2858_v49, 1 }
 0x19c   : > { %v838_v3 = vpop.f32.mrb[6].mxu1  ;;  %v5904_v63 = vunpack.i.h.bf16 %v5902_v51  ;;  %v2929_v38 = vrot.slane %v2860_v37, 1  ;;  %v3017_v51 = vld [vmem:[#allocation2 + $0x170] sm:$0xff] }
 0x19d   : > { %v844_v12 = vadd.f32 %v7278_v7, %v842_v59  ;;  %v843_v11 = vmul.f32 %v7251_v40, %v838_v3  ;;  %v5336_v13 = vpop.f32.mrb[7].mxu1  ;;  %v2679_v59 = vrot.slane %v2636_v39, 1  ;;  %v1183_v3 = vsel %vm634_vm12, %v1181_v41, %v5894_v48 }
 0x19e   : > { %v2687_v13 = vrot.slane %v2634_v42, 2  ;;  %v1185_v44 = vsel %vm637_vm13, %v1183_v3, %v5904_v63  ;;  %v2937_v41 = vrot.slane %v2858_v49, 2  ;;  %v2940_v42 = vrot.slane %v2860_v37, 2  ;;  %v3235_v63 = vld [vmem:[#allocation2 + $0x160] sm:$0x3] }
 0x19f   : > { %v846_v17 = vmax.f32 %v844_v12, 0.0  ;;  %v845_v18 = vadd.f32 %v7278_v7, %v843_v11  ;;  %v1053_v12 = vsel %vm637_vm13, %v1051_v21, %v5899_v56  ;;  %v2853_v11 = vld [vmem:[#allocation2 + $0x130] sm:$0x3]  ;;  %v2680_v60 = vsel %vm532_vm2, %v2677_v54, %v2679_v59 }
 0x1a0   : > { %v6210_v19 = vpack.i.bf16 %v2680_v60, %v2678_v55  ;;  %v1186_v20 = vpack.c.bf16 %v1185_v44, %v1184_v46  ;;  %v2689_v23 = vsel %vm544_vm3, %v2687_v13, %v2688_v45  ;;  %v3059_v26 = vrot.slane %v3017_v51, 1 }
 0x1a1   : > { %v847_v27 = vmax.f32 %v845_v18, 0.0  ;;  %v848_v29 = vmax.f32 %v714_v22, %v846_v17  ;;  %v2856_v22 = vld [vmem:[#allocation2 + $0x148] sm:$0x3]  ;;  %v2867_v17 = vrot.slane %v2853_v11, 1  ;;  %v1054_v18 = vpack.c.bf16 %v1053_v12, %v1052_v10  ;;  %v3238_v10 = vld [vmem:[#allocation2 + $0x178] sm:$0x3] }
 0x1a2   : > { %v2898_v25 = vrot.slane %v2856_v22, 1  ;;  %6211 = vrot.lane.b32.xlu1 %v6210_v19, %s6582_s27  ;;  %v2909_v31 = vrot.slane %v2856_v22, 2  ;;  %v3058_v21 = vrot.slane %v3016_v50, 1  ;;  %v3070_v57 = vrot.slane %v3017_v51, 2 }
 0x1a3   : > { %v849_v33 = vmax.f32 %v715_v5, %v847_v27  ;;  %v2691_v5 = vsel %vm544_vm3, %v2688_v45, %v2690_v14  ;;  %v2868_v6 = vsel %vm532_vm2, %v7287_v47, %v2867_v17  ;;  %v2878_v27 = vrot.slane %v2853_v11, 2 }
 0x1a4   : > { %v2899_v30 = vsel %vm532_vm2, %v2677_v54, %v2898_v25  ;;  %v6225_v1 = vpack.i.bf16 %v2868_v6, %v7306_v9  ;;  %v2927_v9 = vrot.slane %v2859_v36, 1  ;;  %v3061_v54 = vrot.slane %v3018_v28, 1  ;;  %v3241_v25 = vld [vmem:[#allocation2 + $0x188] sm:$0xff]  ;;  %v3242_v6 = vld [vmem:[#allocation2 + $0x190] sm:$0x3] }
 0x1a5   : > { %v850_v62 = vpack.c.bf16 %v849_v33, %v848_v29  ;;  %v6220_v29 = vpack.i.bf16 %v2691_v5, %v2689_v23  ;;  %v2879_v47 = vsel %vm544_vm3, %v7314_v15, %v2878_v27  ;;  %v6230_v32 = vpack.i.bf16 %v2899_v30, %v2678_v55  ;;  %v3240_v5 = vld [vmem:[#allocation2 + $0x180] sm:$0xff] }
 0x1a6   : > { %v2910_v33 = vsel %vm544_vm3, %v2688_v45, %v2909_v31  ;;  %6226 = vrot.lane.b32.xlu0 %v6225_v1, %s6575_s30  ;;  %v6235_v35 = vpack.i.bf16 %v2879_v47, %v7331_v8  ;;  %v6250_v15 = vpack.i.bf16 %v2859_v36, %v2858_v49  ;;  %v2930_v16 = vsel %vm532_vm2, %v2927_v9, %v2929_v38  ;;  %v3399_v38 = vld [vmem:[#allocation2 + $0x1a0] sm:$0xff] }
 0x1a7   : > { %5338 = vmatpush3.bf16.msra.mxu0 %v850_v62  ;;  %5344 = vmatpush3.bf16.msra.mxu1 %v850_v62  ;;  %v6240_v61 = vpack.i.bf16 %v2910_v33, %v2689_v23  ;;  %v2928_v62 = vsel %vm532_vm2, %v2926_v34, %v2927_v9  ;;  %v2938_v8 = vrot.slane %v2859_v36, 2  ;;  %v6280_v59 = vpack.i.bf16 %v3017_v51, %v3016_v50 }
 0x1a8   : > { %5349 = vmatprep.subr.bf16.mxu0 %v6574_v0  ;;  %5355 = vmatprep.subr.bf16.mxu1 %v6574_v0  ;;  %v6260_v43 = vpack.i.bf16 %v2930_v16, %v2928_v62  ;;  %v3060_v52 = vsel %vm532_vm2, %v3058_v21, %v3059_v26  ;;  %v3062_v3 = vsel %vm532_vm2, %v3059_v26, %v3061_v54  ;;  %v3249_v12 = vrot.slane %v3235_v63, 1  ;;  %v5907_v21 = vpop.permute.xlu0 %5906  ;;  %v5912_v54 = vpop.permute.xlu1 %5911 }
 0x1a9   : > { %6221 = vrot.lane.b32.xlu1 %v6220_v29, %s6584_s28  ;;  %v2939_v39 = vsel %vm544_vm3, %v2937_v41, %v2938_v8  ;;  %v2941_v48 = vsel %vm544_vm3, %v2938_v8, %v2940_v42  ;;  %v6290_v45 = vpack.i.bf16 %v3062_v3, %v3060_v52  ;;  %v3071_v11 = vsel %vm544_vm3, %v3069_v2, %v3070_v57  ;;  %v3400_v41 = vld [vmem:[#allocation2 + $0x1a8] sm:$0x3] }
 0x1aa   : > { %5340 = vmatmul.mubr.msk.bf16.vlgmr.msra.gmra.mrb[0].mxu0 %vm851_vm6, %v7350_v53  ;;  %5346 = vmatmul.mubr.msk.bf16.vlgmr.msra.gmra.mrb[8].mxu1 %vm851_vm6, %v7352_v24  ;;  %v6270_v56 = vpack.i.bf16 %v2941_v48, %v2939_v39  ;;  %v3280_v55 = vrot.slane %v3238_v10, 1  ;;  %v3250_v60 = vsel %vm532_vm2, %v2927_v9, %v3249_v12  ;;  %v3260_v14 = vrot.slane %v3235_v63, 2  ;;  %v3398_v9 = vld [vmem:[#allocation2 + $0x198] sm:$0xff] }
 0x1ab   : > { %5350 = vmatpush3.bf16.msra.mxu0 %v6911_v58  ;;  %5356 = vmatpush3.bf16.msra.mxu1 %v6911_v58  ;;  %v3291_v22 = vrot.slane %v3238_v10, 2  ;;  %v6305_v17 = vpack.i.bf16 %v3250_v60, %v2928_v62  ;;  %v3308_v29 = vrot.slane %v3240_v5, 1  ;;  %v3309_v30 = vrot.slane %v3241_v25, 1 }
 0x1ac   : > { %5351 = vmatprep.mubr.msk.bf16.mxu0 %vm6583_vm7, %v6574_v0  ;;  %5357 = vmatprep.mubr.msk.bf16.mxu1 %vm6583_vm7, %v6574_v0  ;;  %v3281_v44 = vsel %vm532_vm2, %v3059_v26, %v3280_v55  ;;  %v3311_v31 = vrot.slane %v3242_v6, 1  ;;  %v6330_v1 = vpack.i.bf16 %v3241_v25, %v3240_v5  ;;  %v3319_v47 = vrot.slane %v3240_v5, 2 }
 0x1ad   : > { %5361 = vmatprep.subr.bf16.mxu0 %v6574_v0  ;;  %5367 = vmatprep.subr.bf16.mxu1 %v6574_v0  ;;  %v6310_v19 = vpack.i.bf16 %v3281_v44, %v3060_v52  ;;  %v3322_v49 = vrot.slane %v3242_v6, 2  ;;  %v3441_v62 = vrot.slane %v3399_v38, 1  ;;  %v3440_v16 = vrot.slane %v3398_v9, 1 }
 0x1ae   : > { %6231 = vrot.lane.b32.xlu1 %v6230_v32, %s6575_s30  ;;  %6236 = vrot.lane.b32.xlu0 %v6235_v35, %s6577_s12  ;;  %v3312_v33 = vsel %vm532_vm2, %v3309_v30, %v3311_v31  ;;  %v3320_v35 = vrot.slane %v3241_v25, 2  ;;  %v3451_v42 = vrot.slane %v3398_v9, 2  ;;  %v3454_v50 = vrot.slane %v3400_v41, 2 }
 0x1af   : > { %v5908_v52 = vunpack.i.l.bf16 %v5907_v21  ;;  %v5909_v10 = vunpack.i.h.bf16 %v5907_v21  ;;  %v5914_v12 = vunpack.i.h.bf16 %v5912_v54 }
 0x1b0   : > { %v3321_v37 = vsel %vm544_vm3, %v3319_v47, %v3320_v35 }
 0x1b2   : > { %5352 = vmatmul.mubr.msk.bf16.vlgmr.msra.gmra.mrb[4].mxu0 %vm646_vm14, %v1054_v18  ;;  %5358 = vmatmul.mubr.msk.bf16.vlgmr.msra.gmra.mrb[12].mxu1 %vm646_vm14, %v1186_v20  ;;  %v3261_v18 = vsel %vm544_vm3, %v2938_v8, %v3260_v14  ;;  %v3292_v20 = vsel %vm544_vm3, %v3070_v57, %v3291_v22  ;;  %v3452_v8 = vrot.slane %v3399_v38, 2  ;;  %v6478_v14 = vld [vmem:[#allocation2 + $0x68] sm:$0xff] }
 0x1b3   : > { %5363 = vmatprep.mubr.msk.bf16.mxu0 %vm6583_vm7, %v6574_v0  ;;  %5369 = vmatprep.mubr.msk.bf16.mxu1 %vm6583_vm7, %v6574_v0  ;;  %v6315_v23 = vpack.i.bf16 %v3261_v18, %v2939_v39  ;;  %v6320_v27 = vpack.i.bf16 %v3292_v20, %v3071_v11  ;;  %v3442_v39 = vsel %vm532_vm2, %v3440_v16, %v3441_v62 }
 0x1b4   : > { %6241 = vrot.lane.b32.xlu1 %v6240_v61, %s6577_s12  ;;  %6246 = vrot.lane.b32.xlu0 %v6200_v4, %s6576_s11  ;;  %v3072_v4 = vrot.slane %v3018_v28, 2  ;;  %v3453_v28 = vsel %vm544_vm3, %v3451_v42, %v3452_v8 }
 0x1b6   : > { %v3073_v13 = vsel %vm544_vm3, %v3070_v57, %v3072_v4  ;;  %v5917_v57 = vpop.permute.xlu0 %5916 }
 0x1b7   : > { %v6300_v46 = vpack.i.bf16 %v3073_v13, %v3071_v11  ;;  %v5918_v11 = vunpack.i.l.bf16 %v5917_v57  ;;  %v6477_v13 = vld [vmem:[#allocation2 + $0x60] sm:$0xff]  ;;  %v5919_v60 = vunpack.i.h.bf16 %v5917_v57 }
 0x1b8   : > { %6251 = vrot.lane.b32.xlu1 %v6250_v15, %s6576_s11  ;;  %6256 = vrot.lane.b32.xlu0 %v6230_v32, %s6581_s26  ;;  %v3310_v32 = vsel %vm532_vm2, %v3308_v29, %v3309_v30  ;;  %v1420_v55 = vsel %vm358_vm0, %v6477_v13, %v5908_v52 }
 0x1b9   : > { %v6340_v36 = vpack.i.bf16 %v3312_v33, %v3310_v32  ;;  %v1422_v25 = vsel %vm620_vm8, %v1420_v55, %v5918_v11 }
 0x1ba   : > { %v5927_v63 = vpop.permute.xlu0 %5926 }
 0x1bb   : > { %v5929_v6 = vunpack.i.h.bf16 %v5927_v63 }
 0x1bc   : > { %6261 = vrot.lane.b32.xlu1 %v6260_v43, %s6581_s26  ;;  %6266 = vrot.lane.b32.xlu0 %v6240_v61, %s6579_s20  ;;  %v3323_v61 = vsel %vm544_vm3, %v3320_v35, %v3322_v49 }
 0x1bd   : > { %v6350_v34 = vpack.i.bf16 %v3323_v61, %v3321_v37 }
 0x1be   : > { %v5937_v3 = vpop.permute.xlu0 %5936 }
 0x1bf   : > { %v5939_v16 = vunpack.i.h.bf16 %v5937_v3 }
 0x1c0   : > { %6271 = vrot.lane.b32.xlu1 %v6270_v56, %s6579_s20  ;;  %6276 = vrot.lane.b32.xlu0 %v6250_v15, %s6578_s18  ;;  %v6360_v15 = vpack.i.bf16 %v3399_v38, %v3398_v9  ;;  %v3622_v38 = vld [vmem:[#allocation3] sm:$0xff] }
 0x1c4   : > { %6281 = vrot.lane.b32.xlu1 %v6280_v59, %s6578_s18  ;;  %6286 = vrot.lane.b32.xlu0 %v6260_v43, %s6582_s27  ;;  %v3443_v43 = vrot.slane %v3400_v41, 1 }
 0x1c6   : > { %v3444_v48 = vsel %vm532_vm2, %v3441_v62, %v3443_v43 }
 0x1c7   : > { %v6370_v51 = vpack.i.bf16 %v3444_v48, %v3442_v39 }
 0x1c8   : > { %6291 = vrot.lane.b32.xlu1 %v6290_v45, %s6582_s27  ;;  %6296 = vrot.lane.b32.xlu0 %v6270_v56, %s6584_s28  ;;  %v3455_v56 = vsel %vm544_vm3, %v3452_v8, %v3454_v50  ;;  %v5913_v45 = vunpack.i.l.bf16 %v5912_v54  ;;  %v5938_v8 = vunpack.i.l.bf16 %v5937_v3  ;;  %v3636_v50 = vrot.slane %v3622_v38, 2 }
 0x1c9   : > { %v6380_v26 = vpack.i.bf16 %v3455_v56, %v3453_v28  ;;  %v3630_v28 = vrot.slane %v3622_v38, 1 }
 0x1cc   : > { %6301 = vrot.lane.b32.xlu1 %v6300_v46, %s6584_s28  ;;  %6306 = vrot.lane.b32.xlu0 %v6305_v17, %s6575_s30  ;;  %v1421_v46 = vsel %vm358_vm0, %v6478_v14, %v5909_v10  ;;  %v6479_v17 = vld [vmem:[#allocation2 + $0x80] sm:$0xff] }
 0x1cd   : > { %v1553_v18 = vsel %vm358_vm0, %v6479_v17, %v5914_v12  ;;  %v1423_v31 = vsel %vm620_vm8, %v1421_v46, %v5919_v60 }
 0x1ce   : > { %v1425_v62 = vsel %vm623_vm9, %v1423_v31, %v5929_v6 }
 0x1cf   : > { %v1427_v57 = vsel %vm483_vm4, %v1425_v62, %v5939_v16 }
 0x1d0   : > { %6311 = vrot.lane.b32.xlu1 %v6310_v19, %s6575_s30  ;;  %6316 = vrot.lane.b32.xlu0 %v6315_v23, %s6577_s12  ;;  %v7473_v23 = vpop.permute.xlu0 %5946  ;;  %s6590_s30 = smov 32  }
 0x1d1   : > { %v5948_v11 = vunpack.i.l.bf16 %v7473_v23 }
 0x1d4   : > { %6321 = vrot.lane.b32.xlu1 %v6320_v27, %s6577_s12  ;;  %6326 = vrot.lane.b32.xlu0 %v6280_v59, %s6576_s11  ;;  %v5922_v59 = vpop.permute.xlu1 %5921  ;;  %s6585_s12 = smov 12  }
 0x1d5   : > { %v5924_v44 = vunpack.i.h.bf16 %v5922_v59  ;;  %v5923_v22 = vunpack.i.l.bf16 %v5922_v59 }
 0x1d8   : > { %6331 = vrot.lane.b32.xlu1 %v6330_v1, %s6576_s11  ;;  %6336 = vrot.lane.b32.xlu0 %v6310_v19, %s6581_s26  ;;  %v5932_v2 = vpop.permute.xlu1 %5931  ;;  %v6480_v19 = vld [vmem:[#allocation2 + $0x78] sm:$0xff]  ;;  %s350_s11 = sand.u32 1, %s6564_s14  }
 0x1d9   : > { %v1552_v20 = vsel %vm358_vm0, %v6480_v19, %v5913_v45  ;;  %v5933_v47 = vunpack.i.l.bf16 %v5932_v2  ;;  %v5949_v45 = vunpack.i.h.bf16 %v7473_v23 }
 0x1da   : > { %v1554_v49 = vsel %vm620_vm8, %v1552_v20, %v5923_v22 }
 0x1db   : > { %v1556_v42 = vsel %vm623_vm9, %v1554_v49, %v5933_v47 }
 0x1dc   : > { %6341 = vrot.lane.b32.xlu1 %v6340_v36, %s6581_s26  ;;  %6346 = vrot.lane.b32.xlu0 %v6320_v27, %s6579_s20  ;;  %v5942_v4 = vpop.permute.xlu1 %5941  ;;  %v5928_v27 = vunpack.i.l.bf16 %v5927_v63 }
 0x1dd   : > { %v5944_v39 = vunpack.i.h.bf16 %v5942_v4  ;;  %v5943_v48 = vunpack.i.l.bf16 %v5942_v4 }
 0x1de   : > { %v1424_v41 = vsel %vm623_vm9, %v1422_v25, %v5928_v27 }
 0x1df   : > { %v1426_v54 = vsel %vm483_vm4, %v1424_v41, %v5938_v8 }
 0x1e0   : > { %6351 = vrot.lane.b32.xlu1 %v6350_v34, %s6579_s20  ;;  %6356 = vrot.lane.b32.xlu0 %v6330_v1, %s6578_s18  ;;  %v7475_v5 = vpop.permute.xlu1 %5951  ;;  %v5934_v1 = vunpack.i.h.bf16 %v5932_v2  ;;  %v1558_v2 = vsel %vm483_vm4, %v1556_v42, %v5943_v48  ;;  %v1428_v38 = vsel %vm628_vm10, %v1426_v54, %v5948_v11  ;;  %s6587_s20 = smov 20  }
 0x1e4   : > { %6361 = vrot.lane.b32.xlu1 %v6360_v15, %s6578_s18  ;;  %6366 = vrot.lane.b32.xlu0 %v6340_v36, %s6582_s27  ;;  %v1555_v36 = vsel %vm620_vm8, %v1553_v18, %v5924_v44  ;;  %v3623_v15 = vld [vmem:[#allocation3 + $0x8] sm:$0x3]  ;;  %v7488_v21 = vpop.permute.xlu1 %5961  ;;  %s6586_s18 = smov 16  }
 0x1e5   : > { %v1557_v43 = vsel %vm623_vm9, %v1555_v36, %v5934_v1  ;;  %v3631_v56 = vrot.slane %v3623_v15, 1  ;;  %v5964_v16 = vunpack.i.h.bf16 %v7488_v21  ;;  %v5963_v8 = vunpack.i.l.bf16 %v7488_v21 }
 0x1e6   : > { %v1559_v52 = vsel %vm483_vm4, %v1557_v43, %v5944_v39  ;;  %v1429_v43 = vsel %vm628_vm10, %v1427_v57, %v5949_v45 }
 0x1e7   : > { %v3632_v44 = vsel %vm532_vm2, %v3630_v28, %v3631_v56 }
 0x1e8   : > { %6371 = vrot.lane.b32.xlu1 %v6370_v51, %s6582_s27  ;;  %6376 = vrot.lane.b32.xlu0 %v6350_v34, %s6584_s28  ;;  %v3637_v51 = vrot.slane %v3623_v15, 2  ;;  %v5972_v41 = vpop.permute.xlu1 %5971 }
 0x1e9   : > { %v5973_v54 = vunpack.i.l.bf16 %v5972_v41 }
 0x1ea   : > { %v3638_v46 = vsel %vm544_vm3, %v3636_v50, %v3637_v51 }
 0x1ec   : > { %6381 = vrot.lane.b32.xlu1 %v6380_v26, %s6584_s28  ;;  %v7486_v26 = vpop.permute.xlu0 %5956 }
 0x1ed   : > { %v5958_v15 = vunpack.i.l.bf16 %v7486_v26 }
 0x1ef   : > { %v1430_v28 = vsel %vm631_vm11, %v1428_v38, %v5958_v15 }
 0x1f0   : > { %v5967_v36 = vpop.permute.xlu0 %5966 }
 0x1f1   : > { %v5968_v50 = vunpack.i.l.bf16 %v5967_v36  ;;  %v5969_v56 = vunpack.i.h.bf16 %v5967_v36 }
 0x1f4   : > { %v5977_v57 = vpop.permute.xlu0 %5976 }
 0x27d   : > { %v889_v29 = vpop.f32.mrb[0].mxu0  ;;  %v932_v30 = vpop.f32.mrb[8].mxu1 }
 0x27e   : > { %v938_v32 = vmax.f32 %v889_v29, %v932_v30  ;;  %v5341_v33 = vpop.f32.mrb[1].mxu0  ;;  %v5347_v35 = vpop.f32.mrb[9].mxu1 }
 0x27f   : > { %v892_v37 = vpop.f32.mrb[2].mxu0  ;;  %v935_v61 = vpop.f32.mrb[10].mxu1  ;;  %v5953_v33 = vunpack.i.l.bf16 %v7475_v5 }
 0x280   : > { %940 = vst.msk [vmem:[#allocation3 + $0x11] sm:$0xff] %vm483_vm4, %v938_v32  ;;  %v5342_v34 = vpop.f32.mrb[3].mxu0  ;;  %v5348_v9 = vpop.f32.mrb[11].mxu1  ;;  %v5954_v32 = vunpack.i.h.bf16 %v7475_v5  ;;  %v5959_v5 = vunpack.i.h.bf16 %v7486_v26  ;;  %v5974_v26 = vunpack.i.h.bf16 %v5972_v41 }
 0x281   : > { %v1560_v39 = vsel %vm628_vm10, %v1558_v2, %v5953_v33  ;;  %v5978_v2 = vunpack.i.l.bf16 %v5977_v57 }
 0x282   : > { %v1561_v48 = vsel %vm628_vm10, %v1559_v52, %v5954_v32  ;;  %v1431_v21 = vsel %vm631_vm11, %v1429_v43, %v5959_v5  ;;  %v5982_v52 = vpop.permute.xlu1 %5981 }
 0x283   : > { %v1433_v45 = vsel %vm634_vm12, %v1431_v21, %v5969_v56 }
 0x285   : > { %v1092_v59 = vpop.f32.mrb[4].mxu0  ;;  %v1224_v63 = vpop.f32.mrb[12].mxu1 }
 0x286   : > { %v1099_v3 = vmul.f32 %v7251_v40, %v1092_v59  ;;  %v1231_v4 = vmul.f32 %v7251_v40, %v1224_v63  ;;  %v5353_v10 = vpop.f32.mrb[5].mxu0  ;;  %v5359_v12 = vpop.f32.mrb[13].mxu1  ;;  %v1562_v59 = vsel %vm631_vm11, %v1560_v39, %v5963_v8  ;;  %v1563_v63 = vsel %vm631_vm11, %v1561_v48, %v5964_v16  ;;  %v6483_v16 = vld [vmem:[#allocation2 + $0xb0] sm:$0xff] }
 0x287   : > { %v1095_v13 = vpop.f32.mrb[6].mxu0  ;;  %v1227_v55 = vpop.f32.mrb[14].mxu1  ;;  %v7498_v60 = vld [vmem:[#allocation3 + $0x10] sm:$0xff]  ;;  %v3625_v14 = vld [vmem:[#allocation3 + $0x18] sm:$0x3]  ;;  %v5984_v10 = vunpack.i.h.bf16 %v5982_v52  ;;  %v5983_v12 = vunpack.i.l.bf16 %v5982_v52  ;;  %v1564_v11 = vsel %vm634_vm12, %v1562_v59, %v5973_v54 }
 0x288   : > { %v1101_v22 = vadd.f32 %v7278_v7, %v1099_v3  ;;  %v1233_v17 = vadd.f32 %v7278_v7, %v1231_v4  ;;  %v1100_v18 = vmul.f32 %v7251_v40, %v1095_v13  ;;  %v1232_v19 = vmul.f32 %v7251_v40, %v1227_v55  ;;  %v5354_v20 = vpop.f32.mrb[7].mxu0  ;;  %v5360_v25 = vpop.f32.mrb[15].mxu1 }
 0x289   : > { %v3653_v23 = vrot.slane %v7498_v60, 2  ;;  %v3654_v6 = vrot.slane %v3625_v14, 2  ;;  %v3647_v27 = vrot.slane %v7498_v60, 1  ;;  %v3648_v29 = vrot.slane %v3625_v14, 1 }
 0x28a   : > { %v1103_v30 = vmax.f32 %v1101_v22, 0.0  ;;  %v1235_v31 = vmax.f32 %v1233_v17, 0.0  ;;  %v1102_v1 = vadd.f32 %v7278_v7, %v1100_v18  ;;  %v1234_v47 = vadd.f32 %v7278_v7, %v1232_v19  ;;  %v5987_v18 = vpop.permute.xlu0 %5986  ;;  %v5992_v19 = vpop.permute.xlu1 %5991 }
 0x28b   : > { %v7513_v35 = vsel %vm544_vm3, %v3653_v23, %v3654_v6  ;;  %v7516_v49 = vsel %vm532_vm2, %v3647_v27, %v3648_v29  ;;  %v1432_v3 = vsel %vm634_vm12, %v1430_v28, %v5968_v50  ;;  %v5979_v4 = vunpack.i.h.bf16 %v5977_v57 }
 0x28c   : > { %v1237_v37 = vmax.f32 %v1103_v30, %v1235_v31  ;;  %v1104_v61 = vmax.f32 %v1102_v1, 0.0  ;;  %v1236_v34 = vmax.f32 %v1234_v47, 0.0  ;;  %v6390_v9 = vpack.i.bf16 %v7513_v35, %v3638_v46 }
 0x28d   : > { %v6385_v62 = vpack.i.bf16 %v7516_v49, %v3632_v44  ;;  %v1565_v13 = vsel %vm634_vm12, %v1563_v63, %v5974_v26  ;;  %v1434_v55 = vsel %vm637_vm13, %v1432_v3, %v5978_v2  ;;  %v1435_v14 = vsel %vm637_vm13, %v1433_v45, %v5979_v4 }
 0x28e   : > { %v1238_v42 = vmax.f32 %v1104_v61, %v1236_v34  ;;  %6391 = vrot.lane.b32.xlu1 %v6390_v9, %s6584_s28  ;;  %v1566_v46 = vsel %vm637_vm13, %v1564_v11, %v5983_v12  ;;  %v1567_v44 = vsel %vm637_vm13, %v1565_v13, %v5984_v10  ;;  %v1436_v22 = vpack.c.bf16 %v1435_v14, %v1434_v55  ;;  %v5997_v20 = vpop.permute.xlu0 %5996  ;;  %v6002_v25 = vpop.permute.xlu1 %6001  ;;  %v6481_v61 = vld [vmem:[#allocation2 + $0x98] sm:$0xff]  ;;  %v6482_v9 = vld [vmem:[#allocation2 + $0x90] sm:$0xff] }
 0x28f   : > { %6386 = vrot.lane.b32.xlu0 %v6385_v62, %s6581_s26  ;;  %v1568_v17 = vpack.c.bf16 %v1567_v44, %v1566_v46  ;;  %v5989_v30 = vunpack.i.h.bf16 %v5987_v18  ;;  %v5988_v31 = vunpack.i.l.bf16 %v5987_v18  ;;  %v5994_v1 = vunpack.i.h.bf16 %v5992_v19 }
 0x290   : > { %v1239_v51 = vpack.c.bf16 %v1238_v42, %v1237_v37  ;;  %v5993_v47 = vunpack.i.l.bf16 %v5992_v19  ;;  %v5999_v32 = vunpack.i.h.bf16 %v5997_v20  ;;  %v5998_v33 = vunpack.i.l.bf16 %v5997_v20  ;;  %v6484_v42 = vld [vmem:[#allocation2 + $0xa8] sm:$0xff] }
 0x291   : > { %v1803_v34 = vsel %vm358_vm0, %v6481_v61, %v5989_v30  ;;  %v1802_v38 = vsel %vm358_vm0, %v6482_v9, %v5988_v31  ;;  %v6004_v15 = vunpack.i.h.bf16 %v6002_v25  ;;  %v6003_v41 = vunpack.i.l.bf16 %v6002_v25 }
 0x292   : > { %5362 = vmatpush3.bf16.msra.mxu0 %v1239_v51  ;;  %5368 = vmatpush3.bf16.msra.mxu1 %v1239_v51  ;;  %v6007_v23 = vpop.permute.xlu0 %6006  ;;  %v6012_v6 = vpop.permute.xlu1 %6011  ;;  %v1935_v8 = vsel %vm358_vm0, %v6483_v16, %v5994_v1  ;;  %v1934_v43 = vsel %vm358_vm0, %v6484_v42, %v5993_v47  ;;  %v1804_v54 = vsel %vm620_vm8, %v1802_v38, %v5998_v33 }
 0x293   : > { %5373 = vmatprep.subr.bf16.mxu0 %v6574_v0  ;;  %5379 = vmatprep.subr.bf16.mxu1 %v6574_v0  ;;  %v6009_v51 = vunpack.i.h.bf16 %v6007_v23  ;;  %v6008_v28 = vunpack.i.l.bf16 %v6007_v23  ;;  %v1805_v21 = vsel %vm620_vm8, %v1803_v34, %v5999_v32  ;;  %v6014_v59 = vunpack.i.h.bf16 %v6012_v6 }
 0x294   : > { %v6013_v63 = vunpack.i.l.bf16 %v6012_v6  ;;  %v1936_v52 = vsel %vm620_vm8, %v1934_v43, %v6003_v41  ;;  %v1937_v3 = vsel %vm620_vm8, %v1935_v8, %v6004_v15 }
 0x295   : > { %5364 = vmatmul.mubr.msk.bf16.vlgmr.msra.gmra.mrb[8].mxu0 %vm851_vm6, %v7350_v53  ;;  %5370 = vmatmul.mubr.msk.bf16.vlgmr.msra.gmra.mrb[16].mxu1 %vm851_vm6, %v7352_v24  ;;  %v1806_v12 = vsel %vm623_vm9, %v1804_v54, %v6008_v28  ;;  %v1807_v45 = vsel %vm623_vm9, %v1805_v21, %v6009_v51  ;;  %v1939_v14 = vsel %vm623_vm9, %v1937_v3, %v6014_v59 }
 0x296   : > { %5374 = vmatpush3.bf16.msra.mxu0 %v6911_v58  ;;  %5380 = vmatpush3.bf16.msra.mxu1 %v6911_v58  ;;  %v6017_v27 = vpop.permute.xlu0 %6016  ;;  %v6022_v29 = vpop.permute.xlu1 %6021  ;;  %v1938_v55 = vsel %vm623_vm9, %v1936_v52, %v6013_v63 }
 0x297   : > { %5375 = vmatprep.mubr.msk.bf16.mxu0 %vm6583_vm7, %v6574_v0  ;;  %5381 = vmatprep.mubr.msk.bf16.mxu1 %vm6583_vm7, %v6574_v0  ;;  %v6019_v4 = vunpack.i.h.bf16 %v6017_v27  ;;  %v6018_v10 = vunpack.i.l.bf16 %v6017_v27  ;;  %v6024_v11 = vunpack.i.h.bf16 %v6022_v29  ;;  %v6023_v13 = vunpack.i.l.bf16 %v6022_v29 }
 0x298   : > { %5385 = vmatprep.subr.bf16.mxu0 %v6574_v0  ;;  %5391 = vmatprep.subr.bf16.mxu1 %v6574_v0 }
 0x299   : > { %v1808_v18 = vsel %vm483_vm4, %v1806_v12, %v6018_v10  ;;  %v1809_v19 = vsel %vm483_vm4, %v1807_v45, %v6019_v4  ;;  %v1940_v27 = vsel %vm483_vm4, %v1938_v55, %v6023_v13  ;;  %v1941_v29 = vsel %vm483_vm4, %v1939_v14, %v6024_v11 }
 0x29a   : > { %v7562_v36 = vpop.permute.xlu0 %6026  ;;  %v7564_v37 = vpop.permute.xlu1 %6031 }
 0x29b   : > { %v6029_v30 = vunpack.i.h.bf16 %v7562_v36  ;;  %v6028_v31 = vunpack.i.l.bf16 %v7562_v36 }
 0x29d   : > { %5376 = vmatmul.mubr.msk.bf16.vlgmr.msra.gmra.mrb[12].mxu0 %vm646_vm14, %v1436_v22  ;;  %5382 = vmatmul.mubr.msk.bf16.vlgmr.msra.gmra.mrb[20].mxu1 %vm646_vm14, %v1568_v17  ;;  %v1811_v4 = vsel %vm628_vm10, %v1809_v19, %v6029_v30 }
 0x29e   : > { %5387 = vmatprep.mubr.msk.bf16.mxu0 %vm6583_vm7, %v6574_v0  ;;  %5393 = vmatprep.mubr.msk.bf16.mxu1 %vm6583_vm7, %v6574_v0  ;;  %v7579_v46 = vpop.permute.xlu0 %6036  ;;  %v7581_v44 = vpop.permute.xlu1 %6041 }
 0x29f   : > { %v6039_v59 = vunpack.i.h.bf16 %v7579_v46  ;;  %v6043_v52 = vunpack.i.l.bf16 %v7581_v44 }
 0x2a2   : > { %v6047_v28 = vpop.permute.xlu0 %6046  ;;  %v6052_v63 = vpop.permute.xlu1 %6051 }
 0x2a3   : > { %v6048_v45 = vunpack.i.l.bf16 %v6047_v28  ;;  %v6049_v55 = vunpack.i.h.bf16 %v6047_v28  ;;  %v6054_v14 = vunpack.i.h.bf16 %v6052_v63 }
 0x2a6   : > { %v6062_v19 = vpop.permute.xlu1 %6061 }
 0x368   : > { %v1274_v62 = vpop.f32.mrb[8].mxu0  ;;  %v1314_v5 = vpop.f32.mrb[16].mxu1 }
 0x369   : > { %v1320_v39 = vmax.f32 %v1274_v62, %v1314_v5  ;;  %v5365_v48 = vpop.f32.mrb[9].mxu0  ;;  %v5371_v50 = vpop.f32.mrb[17].mxu1 }
 0x36a   : > { %v1277_v56 = vpop.f32.mrb[10].mxu0  ;;  %v1317_v26 = vpop.f32.mrb[18].mxu1  ;;  %v6034_v48 = vunpack.i.h.bf16 %v7564_v37  ;;  %v6033_v50 = vunpack.i.l.bf16 %v7564_v37  ;;  %v6038_v37 = vunpack.i.l.bf16 %v7579_v46  ;;  %v6053_v46 = vunpack.i.l.bf16 %v6052_v63 }
 0x36b   : > { %1322 = vst.msk [vmem:[#allocation3 + $0x21] sm:$0xff] %vm483_vm4, %v1320_v39  ;;  %v5366_v57 = vpop.f32.mrb[11].mxu0  ;;  %v5372_v2 = vpop.f32.mrb[19].mxu1 }
 0x36c   : > { %v6044_v2 = vunpack.i.h.bf16 %v7581_v44  ;;  %v1942_v10 = vsel %vm628_vm10, %v1940_v27, %v6033_v50  ;;  %v1943_v12 = vsel %vm628_vm10, %v1941_v29, %v6034_v48  ;;  %v1813_v44 = vsel %vm631_vm11, %v1811_v4, %v6039_v59 }
 0x36d   : > { %v1815_v27 = vsel %vm634_vm12, %v1813_v44, %v6049_v55 }
 0x370   : > { %v1474_v22 = vpop.f32.mrb[12].mxu0  ;;  %v1606_v17 = vpop.f32.mrb[20].mxu1 }
 0x371   : > { %v1481_v20 = vmul.f32 %v7251_v40, %v1474_v22  ;;  %v1613_v25 = vmul.f32 %v7251_v40, %v1606_v17  ;;  %v5377_v23 = vpop.f32.mrb[13].mxu0  ;;  %v5383_v6 = vpop.f32.mrb[21].mxu1  ;;  %v7598_v40 = vld [vmem:[%s8506_s2] ss:$0 sm:$0xff]  ;;  %v1945_v22 = vsel %vm631_vm11, %v1943_v12, %v6044_v2 }
 0x372   : > { %v1477_v1 = vpop.f32.mrb[14].mxu0  ;;  %v1609_v47 = vpop.f32.mrb[22].mxu1  ;;  %v7591_v32 = vld [vmem:[#allocation3 + $0x20] sm:$0xff]  ;;  %v3627_v33 = vld [vmem:[#allocation3 + $0x28] sm:$0x3]  ;;  %v6064_v23 = vunpack.i.h.bf16 %v6062_v19  ;;  %v6063_v6 = vunpack.i.l.bf16 %v6062_v19  ;;  %v1947_v30 = vsel %vm634_vm12, %v1945_v22, %v6054_v14 }
 0x373   : > { %v1483_v61 = vadd.f32 %v7278_v7, %v1481_v20  ;;  %v1615_v34 = vadd.f32 %v7278_v7, %v1613_v25  ;;  %v1482_v9 = vmul.f32 %v7598_v40, %v1477_v1  ;;  %v1614_v38 = vmul.f32 %v7598_v40, %v1609_v47  ;;  %v5378_v15 = vpop.f32.mrb[15].mxu0  ;;  %v5384_v36 = vpop.f32.mrb[23].mxu1 }
 0x374   : > { %v6395_v41 = vpack.i.bf16 %v7591_v32, %v7498_v60  ;;  %v3664_v62 = vrot.slane %v7591_v32, 1  ;;  %v3665_v5 = vrot.slane %v3627_v33, 1  ;;  %v3670_v16 = vrot.slane %v7591_v32, 2  ;;  %v6057_v17 = vpop.permute.xlu0 %6056 }
 0x375   : > { %v1485_v8 = vmax.f32 %v1483_v61, 0.0  ;;  %v1617_v42 = vmax.f32 %v1615_v34, 0.0  ;;  %v1484_v43 = vadd.f32 %v7278_v7, %v1482_v9  ;;  %v1616_v39 = vadd.f32 %v7278_v7, %v1614_v38  ;;  %v6072_v38 = vpop.permute.xlu1 %6071 }
 0x376   : > { %6396 = vrot.lane.b32.xlu0 %v6395_v41, %s6585_s12  ;;  %v7612_v60 = vsel %vm532_vm2, %v3664_v62, %v3665_v5  ;;  %v3671_v51 = vrot.slane %v3627_v33, 2  ;;  %v1810_v7 = vsel %vm628_vm10, %v1808_v18, %v6028_v31  ;;  %v6058_v18 = vunpack.i.l.bf16 %v6057_v17 }
 0x377   : > { %v1619_v56 = vmax.f32 %v1485_v8, %v1617_v42  ;;  %v1486_v26 = vmax.f32 %v1484_v43, 0.0  ;;  %v1618_v54 = vmax.f32 %v1616_v39, 0.0  ;;  %v6400_v21 = vpack.i.bf16 %v7612_v60, %v7516_v49 }
 0x378   : > { %v7620_v57 = vsel %vm544_vm3, %v3670_v16, %v3671_v51  ;;  %v1812_v13 = vsel %vm631_vm11, %v1810_v7, %v6038_v37  ;;  %v6059_v25 = vunpack.i.h.bf16 %v6057_v17  ;;  %v1949_v33 = vsel %vm637_vm13, %v1947_v30, %v6064_v23  ;;  %v6067_v9 = vpop.permute.xlu0 %6066  ;;  %v6486_v51 = vld [vmem:[#allocation2 + $0xc8] sm:$0xff]  ;;  %v6487_v7 = vld [vmem:[#allocation2 + $0xc0] sm:$0xff] }
 0x379   : > { %v1620_v3 = vmax.f32 %v1486_v26, %v1618_v54  ;;  %6401 = vrot.lane.b32.xlu1 %v6400_v21, %s6586_s18  ;;  %v6405_v49 = vpack.i.bf16 %v7620_v57, %v7513_v35  ;;  %v1944_v35 = vsel %vm631_vm11, %v1942_v10, %v6043_v52  ;;  %v1814_v20 = vsel %vm634_vm12, %v1812_v13, %v6048_v45  ;;  %v6082_v36 = vpop.permute.xlu1 %6081  ;;  %v6489_v10 = vld [vmem:[#allocation2 + $0xd8] sm:$0xff] }
 0x37a   : > { %v1946_v29 = vsel %vm634_vm12, %v1944_v35, %v6053_v46  ;;  %v1816_v31 = vsel %vm637_vm13, %v1814_v20, %v6058_v18  ;;  %v1817_v1 = vsel %vm637_vm13, %v1815_v27, %v6059_v25  ;;  %v6069_v8 = vunpack.i.h.bf16 %v6067_v9 }
 0x37b   : > { %v1621_v11 = vpack.c.bf16 %v1620_v3, %v1619_v56  ;;  %6406 = vrot.lane.b32.xlu0 %v6405_v49, %s6587_s20  ;;  %v1948_v47 = vsel %vm637_vm13, %v1946_v29, %v6063_v6  ;;  %v1818_v61 = vpack.c.bf16 %v1817_v1, %v1816_v31  ;;  %v6068_v42 = vunpack.i.l.bf16 %v6067_v9  ;;  %v6488_v49 = vld [vmem:[#allocation2 + $0xe0] sm:$0xff] }
 0x37c   : > { %v1950_v34 = vpack.c.bf16 %v1949_v33, %v1948_v47  ;;  %v6077_v15 = vpop.permute.xlu0 %6076  ;;  %v6074_v43 = vunpack.i.h.bf16 %v6072_v38  ;;  %v6073_v39 = vunpack.i.l.bf16 %v6072_v38  ;;  %v2185_v28 = vsel %vm358_vm0, %v6486_v51, %v6069_v8 }
 0x37d   : > { %5386 = vmatpush3.bf16.msra.mxu0 %v1621_v11  ;;  %5392 = vmatpush3.bf16.msra.mxu1 %v1621_v11  ;;  %v6092_v62 = vpop.permute.xlu1 %6091  ;;  %v6079_v56 = vunpack.i.h.bf16 %v6077_v15  ;;  %v6078_v26 = vunpack.i.l.bf16 %v6077_v15  ;;  %v2184_v59 = vsel %vm358_vm0, %v6487_v7, %v6068_v42  ;;  %v6084_v37 = vunpack.i.h.bf16 %v6082_v36 }
 0x37e   : > { %5397 = vmatprep.subr.bf16.mxu0 %v6574_v0  ;;  %5403 = vmatprep.subr.bf16.mxu1 %v6574_v0  ;;  %v6083_v63 = vunpack.i.l.bf16 %v6082_v36  ;;  %v2317_v4 = vsel %vm358_vm0, %v6488_v49, %v6074_v43  ;;  %v2316_v12 = vsel %vm358_vm0, %v6489_v10, %v6073_v39  ;;  %v6094_v22 = vunpack.i.h.bf16 %v6092_v62 }
 0x37f   : > { %v2186_v44 = vsel %vm620_vm8, %v2184_v59, %v6078_v26  ;;  %v2187_v35 = vsel %vm620_vm8, %v2185_v28, %v6079_v56  ;;  %v6093_v17 = vunpack.i.l.bf16 %v6092_v62  ;;  %v2319_v19 = vsel %vm620_vm8, %v2317_v4, %v6084_v37 }
 0x380   : > { %5388 = vmatmul.mubr.msk.bf16.vlgmr.msra.gmra.mrb[16].mxu0 %vm851_vm6, %v7350_v53  ;;  %5394 = vmatmul.mubr.msk.bf16.vlgmr.msra.gmra.mrb[24].mxu1 %vm851_vm6, %v7352_v24  ;;  %v6087_v41 = vpop.permute.xlu0 %6086  ;;  %v2318_v18 = vsel %vm620_vm8, %v2316_v12, %v6083_v63  ;;  %v2321_v29 = vsel %vm623_vm9, %v2319_v19, %v6094_v22 }
 0x381   : > { %5398 = vmatpush3.bf16.msra.mxu0 %v6911_v58  ;;  %5404 = vmatpush3.bf16.msra.mxu1 %v6911_v58  ;;  %v7665_v16 = vpop.permute.xlu1 %6101  ;;  %v6089_v13 = vunpack.i.h.bf16 %v6087_v41  ;;  %v6088_v55 = vunpack.i.l.bf16 %v6087_v41  ;;  %v2320_v27 = vsel %vm623_vm9, %v2318_v18, %v6093_v17 }
 0x382   : > { %5399 = vmatprep.mubr.msk.bf16.mxu0 %vm6583_vm7, %v6574_v0  ;;  %5405 = vmatprep.mubr.msk.bf16.mxu1 %vm6583_vm7, %v6574_v0  ;;  %v6104_v33 = vunpack.i.h.bf16 %v7665_v16 }
 0x383   : > { %5409 = vmatprep.subr.bf16.mxu0 %v6574_v0  ;;  %5415 = vmatprep.subr.bf16.mxu1 %v6574_v0  ;;  %v2188_v20 = vsel %vm623_vm9, %v2186_v44, %v6088_v55  ;;  %v2189_v25 = vsel %vm623_vm9, %v2187_v35, %v6089_v13 }
 0x384   : > { %v7663_v5 = vpop.permute.xlu0 %6096  ;;  %v2323_v55 = vsel %vm483_vm4, %v2321_v29, %v6104_v33 }
 0x385   : > { %v7669_v50 = vpop.permute.xlu1 %6111  ;;  %v6099_v30 = vunpack.i.h.bf16 %v7663_v5  ;;  %v6098_v31 = vunpack.i.l.bf16 %v7663_v5 }
 0x386   : > { %v6114_v62 = vunpack.i.h.bf16 %v7669_v50  ;;  %v6113_v5 = vunpack.i.l.bf16 %v7669_v50 }
 0x387   : > { %v2191_v49 = vsel %vm483_vm4, %v2189_v25, %v6099_v30 }
 0x388   : > { %5400 = vmatmul.mubr.msk.bf16.vlgmr.msra.gmra.mrb[20].mxu0 %vm646_vm14, %v1818_v61  ;;  %5406 = vmatmul.mubr.msk.bf16.vlgmr.msra.gmra.mrb[28].mxu1 %vm646_vm14, %v1950_v34  ;;  %v7667_v48 = vpop.permute.xlu0 %6106  ;;  %v6103_v61 = vunpack.i.l.bf16 %v7665_v16  ;;  %v7703_v16 = vld [vmem:[%s8507_s3] ss:$0 sm:$0xff]  ;;  %v2325_v29 = vsel %vm628_vm10, %v2323_v55, %v6114_v62 }
 0x389   : > { %5411 = vmatprep.mubr.msk.bf16.mxu0 %vm6583_vm7, %v6574_v0  ;;  %5417 = vmatprep.mubr.msk.bf16.mxu1 %vm6583_vm7, %v6574_v0  ;;  %v7684_v6 = vpop.permute.xlu1 %6121  ;;  %v6109_v36 = vunpack.i.h.bf16 %v7667_v48  ;;  %v6108_v41 = vunpack.i.l.bf16 %v7667_v48 }
 0x38a   : > { %v2322_v13 = vsel %vm483_vm4, %v2320_v27, %v6103_v61  ;;  %v6123_v25 = vunpack.i.l.bf16 %v7684_v6 }
 0x38b   : > { %v2193_v19 = vsel %vm628_vm10, %v2191_v49, %v6109_v36  ;;  %v2324_v27 = vsel %vm628_vm10, %v2322_v13, %v6113_v5 }
 0x38c   : > { %v7682_v23 = vpop.permute.xlu0 %6116 }
 0x38d   : > { %v6119_v22 = vunpack.i.h.bf16 %v7682_v23  ;;  %v6132_v17 = vpop.permute.xlu1 %6131 }
 0x38e   : > { %v6133_v33 = vunpack.i.l.bf16 %v6132_v17 }
 0x453   : > { %v1656_v54 = vpop.f32.mrb[16].mxu0  ;;  %v1696_v21 = vpop.f32.mrb[24].mxu1 }
 0x454   : > { %v1702_v2 = vmax.f32 %v1656_v54, %v1696_v21  ;;  %v5389_v52 = vpop.f32.mrb[17].mxu0  ;;  %v5395_v3 = vpop.f32.mrb[25].mxu1 }
 0x455   : > { %v1659_v45 = vpop.f32.mrb[18].mxu0  ;;  %v1699_v11 = vpop.f32.mrb[26].mxu1  ;;  %v2190_v3 = vsel %vm483_vm4, %v2188_v20, %v6098_v31  ;;  %v6124_v20 = vunpack.i.h.bf16 %v7684_v6  ;;  %v2326_v6 = vsel %vm631_vm11, %v2324_v27, %v6123_v25  ;;  %v6494_v25 = vld [vmem:[#allocation2 + $0x110] sm:$0xff] }
 0x456   : > { %1704 = vst.msk [vmem:[#allocation3 + $0x31] sm:$0xff] %vm483_vm4, %v1702_v2  ;;  %v5390_v14 = vpop.f32.mrb[19].mxu0  ;;  %v5396_v46 = vpop.f32.mrb[27].mxu1  ;;  %v2192_v35 = vsel %vm628_vm10, %v2190_v3, %v6108_v41 }
 0x457   : > { %v6118_v14 = vunpack.i.l.bf16 %v7682_v23  ;;  %v6127_v46 = vpop.permute.xlu0 %6126  ;;  %v2327_v61 = vsel %vm631_vm11, %v2325_v29, %v6124_v20 }
 0x458   : > { %v6129_v31 = vunpack.i.h.bf16 %v6127_v46 }
 0x459   : > { %v2194_v23 = vsel %vm631_vm11, %v2192_v35, %v6118_v14  ;;  %v6491_v14 = vld [vmem:[#allocation2 + $0xf8] sm:$0xff]  ;;  %v6492_v35 = vld [vmem:[#allocation2 + $0xf0] sm:$0xff] }
 0x45b   : > { %v1856_v1 = vpop.f32.mrb[20].mxu0  ;;  %v1988_v47 = vpop.f32.mrb[28].mxu1 }
 0x45c   : > { %v1863_v34 = vmul.f32 %v7598_v40, %v1856_v1  ;;  %v1995_v9 = vmul.f32 %v7598_v40, %v1988_v47  ;;  %v5401_v38 = vpop.f32.mrb[21].mxu0  ;;  %v5407_v15 = vpop.f32.mrb[29].mxu1  ;;  %v6128_v1 = vunpack.i.l.bf16 %v6127_v46  ;;  %v6134_v47 = vunpack.i.h.bf16 %v6132_v17  ;;  %v6493_v17 = vld [vmem:[#allocation2 + $0x108] sm:$0xff] }
 0x45d   : > { %v1859_v8 = vpop.f32.mrb[22].mxu0  ;;  %v1991_v42 = vpop.f32.mrb[30].mxu1  ;;  %v7698_v43 = vld [vmem:[#allocation3 + $0x30] sm:$0xff]  ;;  %v3769_v39 = vld [vmem:[#allocation3 + $0x38] sm:$0x3] }
 0x45e   : > { %v1865_v51 = vadd.f32 %v7703_v16, %v1863_v34  ;;  %v1997_v28 = vadd.f32 %v7703_v16, %v1995_v9  ;;  %v1864_v48 = vmul.f32 %v7598_v40, %v1859_v8  ;;  %v1996_v56 = vmul.f32 %v7598_v40, %v1991_v42  ;;  %v5402_v26 = vpop.f32.mrb[23].mxu0  ;;  %v5408_v50 = vpop.f32.mrb[31].mxu1 }
 0x45f   : > { %v6410_v54 = vpack.i.bf16 %v7698_v43, %v7591_v32  ;;  %v3790_v21 = vrot.slane %v7698_v43, 1  ;;  %v3791_v7 = vrot.slane %v3769_v39, 1  ;;  %v3796_v59 = vrot.slane %v7698_v43, 2  ;;  %v6137_v34 = vpop.permute.xlu0 %6136  ;;  %v6142_v15 = vpop.permute.xlu1 %6141 }
 0x460   : > { %v1867_v37 = vmax.f32 %v1865_v51, 0.0  ;;  %v1999_v63 = vmax.f32 %v1997_v28, 0.0  ;;  %v1866_v2 = vadd.f32 %v7703_v16, %v1864_v48  ;;  %v1998_v52 = vadd.f32 %v7703_v16, %v1996_v56 }
 0x461   : > { %6411 = vrot.lane.b32.xlu1 %v6410_v54, %s6588_s25  ;;  %v7719_v32 = vsel %vm532_vm2, %v3790_v21, %v3791_v7  ;;  %v3797_v4 = vrot.slane %v3769_v39, 2  ;;  %v6139_v9 = vunpack.i.h.bf16 %v6137_v34  ;;  %v6138_v38 = vunpack.i.l.bf16 %v6137_v34 }
 0x462   : > { %v2001_v10 = vmax.f32 %v1867_v37, %v1999_v63  ;;  %v1868_v12 = vmax.f32 %v1866_v2, 0.0  ;;  %v2000_v45 = vmax.f32 %v1998_v52, 0.0  ;;  %v6415_v11 = vpack.i.bf16 %v7719_v32, %v7612_v60 }
 0x463   : > { %v7727_v44 = vsel %vm544_vm3, %v3796_v59, %v3797_v4  ;;  %v2196_v36 = vsel %vm634_vm12, %v2194_v23, %v6128_v1  ;;  %v6144_v62 = vunpack.i.h.bf16 %v6142_v15  ;;  %v6143_v5 = vunpack.i.l.bf16 %v6142_v15  ;;  %v6147_v50 = vpop.permute.xlu0 %6146  ;;  %v6152_v54 = vpop.permute.xlu1 %6151 }
 0x464   : > { %v2002_v18 = vmax.f32 %v1868_v12, %v2000_v45  ;;  %6416 = vrot.lane.b32.xlu0 %v6415_v11, %s8515_s29  ;;  %v6420_v60 = vpack.i.bf16 %v7727_v44, %v7620_v57  ;;  %v2195_v57 = vsel %vm631_vm11, %v2193_v19, %v6119_v22  ;;  %v2328_v8 = vsel %vm634_vm12, %v2326_v6, %v6133_v33 }
 0x465   : > { %v2197_v41 = vsel %vm634_vm12, %v2195_v57, %v6129_v31  ;;  %v2329_v42 = vsel %vm634_vm12, %v2327_v61, %v6134_v47  ;;  %v2198_v39 = vsel %vm637_vm13, %v2196_v36, %v6138_v38  ;;  %v2330_v28 = vsel %vm637_vm13, %v2328_v8, %v6143_v5 }
 0x466   : > { %v2003_v30 = vpack.c.bf16 %v2002_v18, %v2001_v10  ;;  %6421 = vrot.lane.b32.xlu1 %v6420_v60, %s6590_s30  ;;  %v2199_v51 = vsel %vm637_vm13, %v2197_v41, %v6139_v9  ;;  %v2331_v48 = vsel %vm637_vm13, %v2329_v42, %v6144_v62  ;;  %v6149_v52 = vunpack.i.h.bf16 %v6147_v50 }
 0x467   : > { %v2200_v56 = vpack.c.bf16 %v2199_v51, %v2198_v39  ;;  %v2332_v26 = vpack.c.bf16 %v2331_v48, %v2330_v28  ;;  %v6157_v21 = vpop.permute.xlu0 %6156  ;;  %v6162_v7 = vpop.permute.xlu1 %6161  ;;  %v6148_v3 = vunpack.i.l.bf16 %v6147_v50  ;;  %v6153_v49 = vunpack.i.l.bf16 %v6152_v54 }
 0x468   : > { %6426 = vrot.lane.b32.xlu0 %v6415_v11, %s6581_s26  ;;  %5410 = vmatpush3.bf16.msra.mxu0 %v2003_v30  ;;  %v6154_v4 = vunpack.i.h.bf16 %v6152_v54  ;;  %v6159_v12 = vunpack.i.h.bf16 %v6157_v21  ;;  %v6158_v45 = vunpack.i.l.bf16 %v6157_v21  ;;  %v6163_v11 = vunpack.i.l.bf16 %v6162_v7 }
 0x469   : > { %5416 = vmatpush3.bf16.msra.mxu1 %v2003_v30  ;;  %5421 = vmatprep.subr.bf16.mxu0 %v6574_v0  ;;  %v2567_v46 = vsel %vm358_vm0, %v6491_v14, %v6149_v52  ;;  %v2566_v22 = vsel %vm358_vm0, %v6492_v35, %v6148_v3  ;;  %v2698_v18 = vsel %vm358_vm0, %v6493_v17, %v6153_v49 }
 0x46a   : > { %6431 = vrot.lane.b32.xlu1 %v6420_v60, %s6584_s28  ;;  %5427 = vmatprep.subr.bf16.mxu1 %v6574_v0  ;;  %v6164_v60 = vunpack.i.h.bf16 %v6162_v7  ;;  %v2699_v27 = vsel %vm358_vm0, %v6494_v25, %v6154_v4  ;;  %v2568_v6 = vsel %vm620_vm8, %v2566_v22, %v6158_v45  ;;  %v2569_v61 = vsel %vm620_vm8, %v2567_v46, %v6159_v12 }
 0x46b   : > { %5412 = vmatmul.mubr.msk.bf16.vlgmr.msra.gmra.mrb[24].mxu0 %vm851_vm6, %v7350_v53  ;;  %v6167_v59 = vpop.permute.xlu0 %6166  ;;  %v6172_v37 = vpop.permute.xlu1 %6171  ;;  %v2700_v34 = vsel %vm620_vm8, %v2698_v18, %v6163_v11 }
 0x46c   : > { %5418 = vmatmul.mubr.msk.bf16.vlgmr.msra.gmra.mrb[32].mxu1 %vm851_vm6, %v7352_v24  ;;  %5422 = vmatpush3.bf16.msra.mxu0 %v6911_v58  ;;  %v6169_v31 = vunpack.i.h.bf16 %v6167_v59  ;;  %v6168_v1 = vunpack.i.l.bf16 %v6167_v59  ;;  %v6173_v57 = vunpack.i.l.bf16 %v6172_v37  ;;  %v6174_v9 = vunpack.i.h.bf16 %v6172_v37 }
 0x46d   : > { %5428 = vmatpush3.bf16.msra.mxu1 %v6911_v58  ;;  %5423 = vmatprep.mubr.msk.bf16.mxu0 %vm6583_vm7, %v6574_v0  ;;  %v2701_v15 = vsel %vm620_vm8, %v2699_v27, %v6164_v60 }
 0x46e   : > { %5429 = vmatprep.mubr.msk.bf16.mxu1 %vm6583_vm7, %v6574_v0  ;;  %5433 = vmatprep.subr.bf16.mxu0 %v6574_v0  ;;  %v2570_v5 = vsel %vm623_vm9, %v2568_v6, %v6168_v1  ;;  %v2571_v8 = vsel %vm623_vm9, %v2569_v61, %v6169_v31  ;;  %v2702_v42 = vsel %vm623_vm9, %v2700_v34, %v6173_v57 }
 0x46f   : > { %5439 = vmatprep.subr.bf16.mxu1 %v6574_v0  ;;  %v6177_v63 = vpop.permute.xlu0 %6176  ;;  %v6182_v2 = vpop.permute.xlu1 %6181  ;;  %v2703_v28 = vsel %vm623_vm9, %v2701_v15, %v6174_v9 }
 0x470   : > { %v6179_v36 = vunpack.i.h.bf16 %v6177_v63  ;;  %v6178_v41 = vunpack.i.l.bf16 %v6177_v63  ;;  %v6183_v62 = vunpack.i.l.bf16 %v6182_v2  ;;  %v6184_v39 = vunpack.i.h.bf16 %v6182_v2 }
 0x472   : > { %v2572_v21 = vsel %vm483_vm4, %v2570_v5, %v6178_v41  ;;  %v2573_v7 = vsel %vm483_vm4, %v2571_v8, %v6179_v36  ;;  %v2704_v59 = vsel %vm483_vm4, %v2702_v42, %v6183_v62  ;;  %v2705_v52 = vsel %vm483_vm4, %v2703_v28, %v6184_v39 }
 0x473   : > { %5424 = vmatmul.mubr.msk.bf16.vlgmr.msra.gmra.mrb[28].mxu0 %vm646_vm14, %v2200_v56  ;;  %v7774_v10 = vpop.permute.xlu0 %6186  ;;  %v7776_v13 = vpop.permute.xlu1 %6191 }
 0x474   : > { %5430 = vmatmul.mubr.msk.bf16.vlgmr.msra.gmra.mrb[36].mxu1 %vm646_vm14, %v2332_v26  ;;  %5435 = vmatprep.mubr.msk.bf16.mxu0 %vm6583_vm7, %v6574_v0  ;;  %v6188_v3 = vunpack.i.l.bf16 %v7774_v10  ;;  %v6189_v25 = vunpack.i.h.bf16 %v7774_v10 }
 0x475   : > { %5441 = vmatprep.mubr.msk.bf16.mxu1 %vm6583_vm7, %v6574_v0 }
 0x476   : > { %v2574_v61 = vsel %vm628_vm10, %v2572_v21, %v6188_v3 }
 0x477   : > { %v7790_v51 = vpop.permute.xlu0 %6196  ;;  %v7793_v48 = vpop.permute.xlu1 %6201 }
 0x478   : > { %v6198_v34 = vunpack.i.l.bf16 %v7790_v51  ;;  %v6204_v15 = vunpack.i.h.bf16 %v7793_v48  ;;  %v6203_v36 = vunpack.i.l.bf16 %v7793_v48 }
 0x47b   : > { %v6207_v57 = vpop.permute.xlu0 %6206  ;;  %v6212_v9 = vpop.permute.xlu1 %6211 }
 0x47c   : > { %v6208_v8 = vunpack.i.l.bf16 %v6207_v57  ;;  %v6209_v39 = vunpack.i.h.bf16 %v6207_v57  ;;  %v6213_v28 = vunpack.i.l.bf16 %v6212_v9 }
 0x47f   : > { %v6222_v21 = vpop.permute.xlu1 %6221 }
 0x53e   : > { %v2038_v55 = vpop.f32.mrb[24].mxu0 }
 0x53f   : > { %v2078_v19 = vpop.f32.mrb[32].mxu1  ;;  %v5413_v20 = vpop.f32.mrb[25].mxu0 }
 0x540   : > { %v2084_v29 = vmax.f32 %v2038_v55, %v2078_v19  ;;  %v5419_v30 = vpop.f32.mrb[33].mxu1  ;;  %v2041_v23 = vpop.f32.mrb[26].mxu0 }
 0x541   : > { %v2081_v47 = vpop.f32.mrb[34].mxu1  ;;  %v5414_v33 = vpop.f32.mrb[27].mxu0  ;;  %v6194_v23 = vunpack.i.h.bf16 %v7776_v13 }
 0x542   : > { %2086 = vst.msk [vmem:[#allocation3 + $0x41] sm:$0xff] %vm483_vm4, %v2084_v29  ;;  %v5420_v38 = vpop.f32.mrb[35].mxu1 }
 0x543   : > { %v6199_v38 = vunpack.i.h.bf16 %v7790_v51  ;;  %v2707_v5 = vsel %vm628_vm10, %v2705_v52, %v6194_v23  ;;  %v6214_v51 = vunpack.i.h.bf16 %v6212_v9 }
 0x546   : > { %v2238_v56 = vpop.f32.mrb[28].mxu0 }
 0x547   : > { %v2245_v26 = vmul.f32 %v7598_v40, %v2238_v56  ;;  %v2370_v50 = vpop.f32.mrb[36].mxu1  ;;  %v5425_v54 = vpop.f32.mrb[29].mxu0 }
 0x548   : > { %v2377_v37 = vmul.f32 %v7598_v40, %v2370_v50  ;;  %v5431_v63 = vpop.f32.mrb[37].mxu1  ;;  %v2241_v2 = vpop.f32.mrb[30].mxu0 }
 0x549   : > { %v2247_v49 = vadd.f32 %v7703_v16, %v2245_v26  ;;  %v2246_v4 = vmul.f32 %v7598_v40, %v2241_v2  ;;  %v2373_v12 = vpop.f32.mrb[38].mxu1  ;;  %v5426_v45 = vpop.f32.mrb[31].mxu0  ;;  %v7804_v11 = vld [vmem:[#allocation3 + $0x40] sm:$0xff]  ;;  %v3969_v55 = vld [vmem:[#allocation3 + $0x48] sm:$0x3]  ;;  %v2709_v26 = vsel %vm631_vm11, %v2707_v5, %v6204_v15  ;;  %v6223_v63 = vunpack.i.l.bf16 %v6222_v21 }
 0x54a   : > { %v2379_v14 = vadd.f32 %v7703_v16, %v2377_v37  ;;  %v2378_v46 = vmul.f32 %v7598_v40, %v2373_v12  ;;  %v5432_v35 = vpop.f32.mrb[39].mxu1  ;;  %v6435_v22 = vpack.i.bf16 %v7804_v11, %v7698_v43  ;;  %v3990_v17 = vrot.slane %v7804_v11, 1  ;;  %v6217_v50 = vpop.permute.xlu0 %6216  ;;  %v6498_v5 = vld [vmem:[#allocation2 + $0x138] sm:$0xff] }
 0x54b   : > { %v2249_v18 = vmax.f32 %v2247_v49, 0.0  ;;  %v2248_v60 = vadd.f32 %v7703_v16, %v2246_v4  ;;  %v3991_v19 = vrot.slane %v3969_v55, 1  ;;  %v3996_v20 = vrot.slane %v7804_v11, 2  ;;  %v6232_v35 = vpop.permute.xlu1 %6231 }
 0x54c   : > { %v2381_v27 = vmax.f32 %v2379_v14, 0.0  ;;  %v2380_v29 = vadd.f32 %v7703_v16, %v2378_v46  ;;  %6436 = vrot.lane.b32.xlu0 %v6435_v22, %s6585_s12  ;;  %v3997_v30 = vrot.slane %v3969_v55, 2  ;;  %v6193_v43 = vunpack.i.l.bf16 %v7776_v13 }
 0x54d   : > { %v2250_v31 = vmax.f32 %v2248_v60, 0.0  ;;  %v7819_v1 = vsel %vm532_vm2, %v3990_v17, %v3991_v19  ;;  %v6218_v54 = vunpack.i.l.bf16 %v6217_v50  ;;  %v6224_v37 = vunpack.i.h.bf16 %v6222_v21 }
 0x54e   : > { %v2383_v47 = vmax.f32 %v2249_v18, %v2381_v27  ;;  %v2382_v33 = vmax.f32 %v2380_v29, 0.0  ;;  %v6440_v10 = vpack.i.bf16 %v7819_v1, %v7719_v32  ;;  %v7824_v6 = vsel %vm544_vm3, %v3996_v20, %v3997_v30  ;;  %v6227_v46 = vpop.permute.xlu0 %6226 }
 0x54f   : > { %v6445_v13 = vpack.i.bf16 %v7824_v6, %v7727_v44  ;;  %v2575_v32 = vsel %vm628_vm10, %v2573_v7, %v6189_v25  ;;  %v2706_v62 = vsel %vm628_vm10, %v2704_v59, %v6193_v43  ;;  %v2576_v44 = vsel %vm631_vm11, %v2574_v61, %v6198_v34  ;;  %v6242_v17 = vpop.permute.xlu1 %6241  ;;  %v6496_v34 = vld [vmem:[#allocation2 + $0x120] sm:$0xff] }
 0x550   : > { %v2384_v41 = vmax.f32 %v2250_v31, %v2382_v33  ;;  %6441 = vrot.lane.b32.xlu1 %v6440_v10, %s6586_s18  ;;  %v2577_v48 = vsel %vm631_vm11, %v2575_v32, %v6199_v38  ;;  %v2708_v56 = vsel %vm631_vm11, %v2706_v62, %v6203_v36  ;;  %v2578_v7 = vsel %vm634_vm12, %v2576_v44, %v6208_v8  ;;  %v6495_v31 = vld [vmem:[#allocation2 + $0x128] sm:$0xff]  ;;  %v6497_v32 = vld [vmem:[#allocation2 + $0x140] sm:$0xff] }
 0x551   : > { %6446 = vrot.lane.b32.xlu0 %v6445_v13, %s6587_s20  ;;  %v6219_v59 = vunpack.i.h.bf16 %v6217_v50  ;;  %v2579_v2 = vsel %vm634_vm12, %v2577_v48, %v6209_v39  ;;  %v2710_v52 = vsel %vm634_vm12, %v2708_v56, %v6213_v28  ;;  %v2711_v3 = vsel %vm634_vm12, %v2709_v26, %v6214_v51 }
 0x552   : > { %v2385_v42 = vpack.c.bf16 %v2384_v41, %v2383_v47  ;;  %v2580_v49 = vsel %vm637_vm13, %v2578_v7, %v6218_v54  ;;  %v2712_v12 = vsel %vm637_vm13, %v2710_v52, %v6223_v63  ;;  %v2713_v45 = vsel %vm637_vm13, %v2711_v3, %v6224_v37  ;;  %v6237_v22 = vpop.permute.xlu0 %6236 }
 0x553   : > { %v2581_v4 = vsel %vm637_vm13, %v2579_v2, %v6219_v59  ;;  %v2714_v14 = vpack.c.bf16 %v2713_v45, %v2712_v12  ;;  %v6252_v60 = vpop.permute.xlu1 %6251  ;;  %v6229_v25 = vunpack.i.h.bf16 %v6227_v46  ;;  %v6228_v27 = vunpack.i.l.bf16 %v6227_v46 }
 0x554   : > { %5434 = vmatpush3.bf16.msra.mxu0 %v2385_v42  ;;  %5440 = vmatpush3.bf16.msra.mxu1 %v2385_v42  ;;  %v2582_v55 = vpack.c.bf16 %v2581_v4, %v2580_v49  ;;  %v6234_v29 = vunpack.i.h.bf16 %v6232_v35  ;;  %v6233_v30 = vunpack.i.l.bf16 %v6232_v35  ;;  %v6239_v47 = vunpack.i.h.bf16 %v6237_v22 }
 0x555   : > { %5445 = vmatprep.subr.bf16.mxu0 %v6574_v0  ;;  %5451 = vmatprep.subr.bf16.mxu1 %v6574_v0  ;;  %v2949_v57 = vsel %vm358_vm0, %v6495_v31, %v6229_v25  ;;  %v6238_v33 = vunpack.i.l.bf16 %v6237_v22  ;;  %v2948_v9 = vsel %vm358_vm0, %v6496_v34, %v6228_v27  ;;  %v6244_v13 = vunpack.i.h.bf16 %v6242_v17 }
 0x556   : > { %v6247_v18 = vpop.permute.xlu0 %6246  ;;  %v6243_v38 = vunpack.i.l.bf16 %v6242_v17  ;;  %v3081_v62 = vsel %vm358_vm0, %v6497_v32, %v6234_v29  ;;  %v3080_v8 = vsel %vm358_vm0, %v6498_v5, %v6233_v30  ;;  %v2951_v26 = vsel %vm620_vm8, %v2949_v57, %v6239_v47 }
 0x557   : > { %5436 = vmatmul.mubr.msk.bf16.vlgmr.msra.gmra.mrb[32].mxu0 %vm851_vm6, %v7350_v53  ;;  %5442 = vmatmul.mubr.msk.bf16.vlgmr.msra.gmra.mrb[40].mxu1 %vm851_vm6, %v7352_v24  ;;  %v7870_v20 = vpop.permute.xlu1 %6261  ;;  %v6249_v39 = vunpack.i.h.bf16 %v6247_v18  ;;  %v6248_v51 = vunpack.i.l.bf16 %v6247_v18  ;;  %v2950_v56 = vsel %vm620_vm8, %v2948_v9, %v6238_v33  ;;  %v6254_v50 = vunpack.i.h.bf16 %v6252_v60 }
 0x558   : > { %5446 = vmatpush3.bf16.msra.mxu0 %v6911_v58  ;;  %5452 = vmatpush3.bf16.msra.mxu1 %v6911_v58  ;;  %v6253_v54 = vunpack.i.l.bf16 %v6252_v60  ;;  %v3082_v21 = vsel %vm620_vm8, %v3080_v8, %v6243_v38  ;;  %v3083_v7 = vsel %vm620_vm8, %v3081_v62, %v6244_v13 }
 0x559   : > { %5447 = vmatprep.mubr.msk.bf16.mxu0 %vm6583_vm7, %v6574_v0  ;;  %5453 = vmatprep.mubr.msk.bf16.mxu1 %vm6583_vm7, %v6574_v0  ;;  %v2952_v63 = vsel %vm623_vm9, %v2950_v56, %v6248_v51  ;;  %v2953_v2 = vsel %vm623_vm9, %v2951_v26, %v6249_v39  ;;  %v3085_v4 = vsel %vm623_vm9, %v3083_v7, %v6254_v50 }
 0x55a   : > { %5457 = vmatprep.subr.bf16.mxu0 %v6574_v0  ;;  %5463 = vmatprep.subr.bf16.mxu1 %v6574_v0  ;;  %v6257_v19 = vpop.permute.xlu0 %6256  ;;  %v3084_v49 = vsel %vm623_vm9, %v3082_v21, %v6253_v54 }
 0x55b   : > { %v7874_v43 = vpop.permute.xlu1 %6271  ;;  %v6259_v59 = vunpack.i.h.bf16 %v6257_v19  ;;  %v6258_v37 = vunpack.i.l.bf16 %v6257_v19 }
 0x55c   : > { %v6274_v32 = vunpack.i.h.bf16 %v7874_v43 }
 0x55d   : > { %v2954_v18 = vsel %vm483_vm4, %v2952_v63, %v6258_v37  ;;  %v2955_v60 = vsel %vm483_vm4, %v2953_v2, %v6259_v59 }
 0x55e   : > { %v7872_v23 = vpop.permute.xlu0 %6266 }
 0x55f   : > { %5448 = vmatmul.mubr.msk.bf16.vlgmr.msra.gmra.mrb[36].mxu0 %vm646_vm14, %v2582_v55  ;;  %5454 = vmatmul.mubr.msk.bf16.vlgmr.msra.gmra.mrb[44].mxu1 %vm646_vm14, %v2714_v14  ;;  %v7889_v3 = vpop.permute.xlu1 %6281  ;;  %v6264_v55 = vunpack.i.h.bf16 %v7870_v20  ;;  %v6263_v14 = vunpack.i.l.bf16 %v7870_v20  ;;  %v6269_v19 = vunpack.i.h.bf16 %v7872_v23  ;;  %v6268_v25 = vunpack.i.l.bf16 %v7872_v23 }
 0x560   : > { %5459 = vmatprep.mubr.msk.bf16.mxu0 %vm6583_vm7, %v6574_v0  ;;  %5465 = vmatprep.mubr.msk.bf16.mxu1 %vm6583_vm7, %v6574_v0  ;;  %v6284_v59 = vunpack.i.h.bf16 %v7889_v3  ;;  %v6283_v37 = vunpack.i.l.bf16 %v7889_v3 }
 0x561   : > { %v3086_v39 = vsel %vm483_vm4, %v3084_v49, %v6263_v14  ;;  %v3087_v51 = vsel %vm483_vm4, %v3085_v4, %v6264_v55  ;;  %v2956_v21 = vsel %vm628_vm10, %v2954_v18, %v6268_v25  ;;  %v2957_v7 = vsel %vm628_vm10, %v2955_v60, %v6269_v19 }
 0x562   : > { %v7887_v52 = vpop.permute.xlu0 %6276  ;;  %v3089_v2 = vsel %vm628_vm10, %v3087_v51, %v6274_v32 }
 0x563   : > { %v6278_v56 = vunpack.i.l.bf16 %v7887_v52  ;;  %v6292_v26 = vpop.permute.xlu1 %6291 }
 0x564   : > { %v6294_v55 = vunpack.i.h.bf16 %v6292_v26  ;;  %v6293_v14 = vunpack.i.l.bf16 %v6292_v26 }
 0x567   : > { %v6302_v18 = vpop.permute.xlu1 %6301 }
 0x568   : > { %v6304_v19 = vunpack.i.h.bf16 %v6302_v18  ;;  %v6303_v25 = vunpack.i.l.bf16 %v6302_v18 }
 0x62a   : > { %v2420_v10 = vpop.f32.mrb[32].mxu0  ;;  %v2460_v61 = vpop.f32.mrb[40].mxu1 }
 0x62b   : > { %v2466_v15 = vmax.f32 %v2420_v10, %v2460_v61  ;;  %v5437_v36 = vpop.f32.mrb[33].mxu0  ;;  %v5443_v41 = vpop.f32.mrb[41].mxu1 }
 0x62c   : > { %v2423_v42 = vpop.f32.mrb[34].mxu0  ;;  %v2463_v44 = vpop.f32.mrb[42].mxu1 }
 0x62d   : > { %2468 = vst.msk [vmem:[#allocation3 + $0x51] sm:$0xff] %vm483_vm4, %v2466_v15  ;;  %v5438_v28 = vpop.f32.mrb[35].mxu0  ;;  %v5444_v48 = vpop.f32.mrb[43].mxu1 }
 0x62e   : > { %v6287_v28 = vpop.permute.xlu0 %6286 }
 0x62f   : > { %v6288_v4 = vunpack.i.l.bf16 %v6287_v28 }
 0x632   : > { %v2620_v12 = vpop.f32.mrb[36].mxu0  ;;  %v2752_v45 = vpop.f32.mrb[44].mxu1 }
 0x633   : > { %v2627_v46 = vmul.f32 %v7598_v40, %v2620_v12  ;;  %v2759_v35 = vmul.f32 %v7598_v40, %v2752_v45  ;;  %v5449_v22 = vpop.f32.mrb[37].mxu0  ;;  %v5455_v17 = vpop.f32.mrb[45].mxu1  ;;  %v2958_v12 = vsel %vm631_vm11, %v2956_v21, %v6278_v56 }
 0x634   : > { %v2623_v27 = vpop.f32.mrb[38].mxu0  ;;  %v2755_v29 = vpop.f32.mrb[46].mxu1  ;;  %v7901_v30 = vld [vmem:[#allocation3 + $0x50] sm:$0xff]  ;;  %v4058_v31 = vld [vmem:[#allocation3 + $0x58] sm:$0x3]  ;;  %v2960_v60 = vsel %vm634_vm12, %v2958_v12, %v6288_v4 }
 0x635   : > { %v2629_v20 = vadd.f32 %v7703_v16, %v2627_v46  ;;  %v2761_v57 = vadd.f32 %v7703_v16, %v2759_v35  ;;  %v2628_v47 = vmul.f32 %v7598_v40, %v2623_v27  ;;  %v2760_v33 = vmul.f32 %v7598_v40, %v2755_v29  ;;  %v5450_v10 = vpop.f32.mrb[39].mxu0  ;;  %v5456_v61 = vpop.f32.mrb[47].mxu1 }
 0x636   : > { %v6450_v34 = vpack.i.bf16 %v7901_v30, %v7804_v11  ;;  %v4079_v23 = vrot.slane %v7901_v30, 1  ;;  %v4080_v9 = vrot.slane %v4058_v31, 1  ;;  %v4085_v13 = vrot.slane %v7901_v30, 2  ;;  %v6297_v35 = vpop.permute.xlu0 %6296  ;;  %v6312_v61 = vpop.permute.xlu1 %6311 }
 0x637   : > { %v2631_v38 = vmax.f32 %v2629_v20, 0.0  ;;  %v2763_v15 = vmax.f32 %v2761_v57, 0.0  ;;  %v2630_v36 = vadd.f32 %v7703_v16, %v2628_v47  ;;  %v2762_v41 = vadd.f32 %v7703_v16, %v2760_v33 }
 0x638   : > { %v6273_v40 = vunpack.i.l.bf16 %v7874_v43  ;;  %6451 = vrot.lane.b32.xlu1 %v6450_v34, %s6588_s25  ;;  %v7917_v62 = vsel %vm532_vm2, %v4079_v23, %v4080_v9  ;;  %v4086_v11 = vrot.slane %v4058_v31, 2  ;;  %v6279_v43 = vunpack.i.h.bf16 %v7887_v52 }
 0x639   : > { %v2765_v5 = vmax.f32 %v2631_v38, %v2763_v15  ;;  %v2632_v8 = vmax.f32 %v2630_v36, 0.0  ;;  %v2764_v42 = vmax.f32 %v2762_v41, 0.0  ;;  %v6455_v44 = vpack.i.bf16 %v7917_v62, %v7819_v1 }
 0x63a   : > { %v4087_v48 = vsel %vm544_vm3, %v4085_v13, %v4086_v11  ;;  %v3088_v63 = vsel %vm628_vm10, %v3086_v39, %v6273_v40  ;;  %v6289_v52 = vunpack.i.h.bf16 %v6287_v28  ;;  %v2959_v45 = vsel %vm631_vm11, %v2957_v7, %v6279_v43  ;;  %v6307_v10 = vpop.permute.xlu0 %6306  ;;  %v6322_v23 = vpop.permute.xlu1 %6321  ;;  %v6501_v7 = vld [vmem:[#allocation2 + $0x170] sm:$0xff] }
 0x63b   : > { %v2766_v50 = vmax.f32 %v2632_v8, %v2764_v42  ;;  %6456 = vrot.lane.b32.xlu0 %v6455_v44, %s8515_s29  ;;  %v6460_v54 = vpack.i.bf16 %v4087_v48, %v7824_v6  ;;  %v3090_v3 = vsel %vm631_vm11, %v3088_v63, %v6283_v37  ;;  %v3091_v46 = vsel %vm631_vm11, %v3089_v2, %v6284_v59  ;;  %v6499_v42 = vld [vmem:[#allocation2 + $0x150] sm:$0xff]  ;;  %v6502_v37 = vld [vmem:[#allocation2 + $0x168] sm:$0xff] }
 0x63c   : > { %v6299_v22 = vunpack.i.h.bf16 %v6297_v35  ;;  %v6298_v17 = vunpack.i.l.bf16 %v6297_v35  ;;  %v3092_v27 = vsel %vm634_vm12, %v3090_v3, %v6293_v14  ;;  %v3093_v29 = vsel %vm634_vm12, %v3091_v46, %v6294_v55 }
 0x63d   : > { %v2767_v49 = vpack.c.bf16 %v2766_v50, %v2765_v5  ;;  %6461 = vrot.lane.b32.xlu1 %v6460_v54, %s6590_s30  ;;  %v3094_v20 = vsel %vm637_vm13, %v3092_v27, %v6303_v25  ;;  %v3095_v57 = vsel %vm637_vm13, %v3093_v29, %v6304_v19  ;;  %v6308_v36 = vunpack.i.l.bf16 %v6307_v10 }
 0x63e   : > { %v3096_v33 = vpack.c.bf16 %v3095_v57, %v3094_v20  ;;  %v6317_v34 = vpop.permute.xlu0 %6316  ;;  %v6332_v13 = vpop.permute.xlu1 %6331  ;;  %v6309_v41 = vunpack.i.h.bf16 %v6307_v10  ;;  %v6314_v32 = vunpack.i.h.bf16 %v6312_v61  ;;  %v6313_v40 = vunpack.i.l.bf16 %v6312_v61 }
 0x63f   : > { %4365 = vrot.lane.b32.xlu0 %v7819_v1, %s6581_s26  ;;  %5458 = vmatpush3.bf16.msra.mxu0 %v2767_v49  ;;  %v2961_v1 = vsel %vm634_vm12, %v2959_v45, %v6289_v52  ;;  %v6318_v11 = vunpack.i.l.bf16 %v6317_v34  ;;  %v3330_v44 = vsel %vm358_vm0, %v6499_v42, %v6308_v36  ;;  %v6319_v39 = vunpack.i.h.bf16 %v6317_v34 }
 0x640   : > { %5464 = vmatpush3.bf16.msra.mxu1 %v2767_v49  ;;  %5469 = vmatprep.subr.bf16.mxu0 %v6574_v0  ;;  %v2963_v31 = vsel %vm637_vm13, %v2961_v1, %v6299_v22  ;;  %v6324_v56 = vunpack.i.h.bf16 %v6322_v23  ;;  %v6323_v26 = vunpack.i.l.bf16 %v6322_v23  ;;  %v3463_v59 = vsel %vm358_vm0, %v6501_v7, %v6314_v32 }
 0x641   : > { %4368 = vrot.lane.b32.xlu1 %v7824_v6, %s6584_s28  ;;  %5475 = vmatprep.subr.bf16.mxu1 %v6574_v0  ;;  %v2962_v6 = vsel %vm637_vm13, %v2960_v60, %v6298_v17  ;;  %v3462_v63 = vsel %vm358_vm0, %v6502_v37, %v6313_v40  ;;  %v3332_v4 = vsel %vm620_vm8, %v3330_v44, %v6318_v11  ;;  %v6334_v14 = vunpack.i.h.bf16 %v6332_v13 }
 0x642   : > { %5460 = vmatmul.mubr.msk.bf16.vlgmr.msra.gmra.mrb[40].mxu0 %vm851_vm6, %v7350_v53  ;;  %v2964_v47 = vpack.c.bf16 %v2963_v31, %v2962_v6  ;;  %v6327_v9 = vpop.permute.xlu0 %6326  ;;  %v7979_v15 = vpop.permute.xlu1 %6341  ;;  %v6333_v3 = vunpack.i.l.bf16 %v6332_v13  ;;  %v3464_v46 = vsel %vm620_vm8, %v3462_v63, %v6323_v26  ;;  %v3465_v35 = vsel %vm620_vm8, %v3463_v59, %v6324_v56  ;;  %v8005_v6 = vld [vmem:[%s8506_s2] ss:$0 sm:$0xff] }
 0x643   : > { %4371 = vrot.lane.b32.xlu0 %v7901_v30, %s6585_s12  ;;  %5466 = vmatmul.mubr.msk.bf16.vlgmr.msra.gmra.mrb[48].mxu1 %vm851_vm6, %v7352_v24  ;;  %v6328_v2 = vunpack.i.l.bf16 %v6327_v9  ;;  %v6329_v12 = vunpack.i.h.bf16 %v6327_v9  ;;  %v3467_v29 = vsel %vm623_vm9, %v3465_v35, %v6334_v14  ;;  %v6343_v10 = vunpack.i.l.bf16 %v7979_v15 }
 0x644   : > { %5470 = vmatpush3.bf16.msra.mxu0 %v6911_v58  ;;  %5476 = vmatpush3.bf16.msra.mxu1 %v6911_v58  ;;  %v3466_v27 = vsel %vm623_vm9, %v3464_v46, %v6333_v3 }
 0x645   : > { %4374 = vrot.lane.b32.xlu1 %v7917_v62, %s6586_s18  ;;  %5471 = vmatprep.mubr.msk.bf16.mxu0 %vm6583_vm7, %v6574_v0  ;;  %v3334_v17 = vsel %vm623_vm9, %v3332_v4, %v6328_v2  ;;  %v3468_v63 = vsel %vm483_vm4, %v3466_v27, %v6343_v10 }
 0x646   : > { %5477 = vmatprep.mubr.msk.bf16.mxu1 %vm6583_vm7, %v6574_v0  ;;  %5481 = vmatprep.subr.bf16.mxu0 %v6574_v0  ;;  %v6337_v38 = vpop.permute.xlu0 %6336  ;;  %v7983_v5 = vpop.permute.xlu1 %6351 }
 0x647   : > { %4377 = vrot.lane.b32.xlu0 %v4087_v48, %s6587_s20  ;;  %5487 = vmatprep.subr.bf16.mxu1 %v6574_v0  ;;  %v6338_v22 = vunpack.i.l.bf16 %v6337_v38  ;;  %v6339_v18 = vunpack.i.h.bf16 %v6337_v38  ;;  %v6353_v7 = vunpack.i.l.bf16 %v7983_v5 }
 0x649   : > { %4457 = vrot.lane.b32.xlu1 %v4087_v48, %s6584_s28  ;;  %v6500_v48 = vld [vmem:[#allocation2 + $0x158] sm:$0xff]  ;;  %v3470_v46 = vsel %vm628_vm10, %v3468_v63, %v6353_v7 }
 0x64a   : > { %5472 = vmatmul.mubr.msk.bf16.vlgmr.msra.gmra.mrb[44].mxu0 %vm646_vm14, %v2964_v47  ;;  %v3331_v43 = vsel %vm358_vm0, %v6500_v48, %v6309_v41  ;;  %v7998_v19 = vpop.permute.xlu1 %6361  ;;  %v3336_v47 = vsel %vm483_vm4, %v3334_v17, %v6338_v22  ;;  %vm3678_vm0 = vcmask 97280  }
 0x64b   : > { %4454 = vrot.lane.b32.xlu0 %v7917_v62, %s6581_s26  ;;  %5478 = vmatmul.mubr.msk.bf16.vlgmr.msra.gmra.mrb[52].mxu1 %vm646_vm14, %v3096_v33  ;;  %v7981_v62 = vpop.permute.xlu0 %6346  ;;  %v3333_v55 = vsel %vm620_vm8, %v3331_v43, %v6319_v39  ;;  %v6344_v33 = vunpack.i.h.bf16 %v7979_v15  ;;  %vm3681_vm8 = vcmask 162816  }
 0x64c   : > { %5483 = vmatprep.mubr.msk.bf16.mxu0 %vm6583_vm7, %v6574_v0  ;;  %5489 = vmatprep.mubr.msk.bf16.mxu1 %vm6583_vm7, %v6574_v0  ;;  %v3335_v1 = vsel %vm623_vm9, %v3333_v55, %v6329_v12  ;;  %v6348_v13 = vunpack.i.l.bf16 %v7981_v62  ;;  %v6349_v56 = vunpack.i.h.bf16 %v7981_v62  ;;  %v6363_v55 = vunpack.i.l.bf16 %v7998_v19 }
 0x64d   : > { %v3337_v9 = vsel %vm483_vm4, %v3335_v1, %v6339_v18  ;;  %v3469_v62 = vsel %vm483_vm4, %v3467_v29, %v6344_v33  ;;  %vm3683_vm9 = vcmask 195584  }
 0x64e   : > { %v6372_v4 = vpop.permute.xlu1 %6371  ;;  %v3339_v3 = vsel %vm628_vm10, %v3337_v9, %v6349_v56  ;;  %v3472_v27 = vsel %vm631_vm11, %v3470_v46, %v6363_v55 }
 0x64f   : > { %v7995_v60 = vpop.permute.xlu0 %6356  ;;  %v6374_v1 = vunpack.i.h.bf16 %v6372_v4 }
 0x650   : > { %v6359_v12 = vunpack.i.h.bf16 %v7995_v60 }
 0x653   : > { %v6367_v2 = vpop.permute.xlu0 %6366 }
 0x654   : > { %v6368_v22 = vunpack.i.l.bf16 %v6367_v2 }
 0x715   : > { %v2802_v8 = vpop.f32.mrb[40].mxu0 }
 0x716   : > { %v2842_v51 = vpop.f32.mrb[48].mxu1  ;;  %v5461_v28 = vpop.f32.mrb[41].mxu0 }
 0x717   : > { %v2848_v50 = vmax.f32 %v2802_v8, %v2842_v51  ;;  %v5467_v54 = vpop.f32.mrb[49].mxu1  ;;  %v2805_v21 = vpop.f32.mrb[42].mxu0 }
 0x718   : > { %v2845_v49 = vpop.f32.mrb[50].mxu1  ;;  %v5462_v52 = vpop.f32.mrb[43].mxu0  ;;  %v6354_v21 = vunpack.i.h.bf16 %v7983_v5  ;;  %v6358_v5 = vunpack.i.l.bf16 %v7995_v60  ;;  %v6369_v60 = vunpack.i.h.bf16 %v6367_v2 }
 0x719   : > { %2850 = vst.msk [vmem:[#allocation3 + $0x61] sm:$0xff] %vm483_vm4, %v2848_v50  ;;  %v5468_v45 = vpop.f32.mrb[51].mxu1  ;;  %v3338_v52 = vsel %vm628_vm10, %v3336_v47, %v6348_v13 }
 0x71a   : > { %v6364_v45 = vunpack.i.h.bf16 %v7998_v19  ;;  %v3471_v35 = vsel %vm628_vm10, %v3469_v62, %v6354_v21  ;;  %v3340_v18 = vsel %vm631_vm11, %v3338_v52, %v6358_v5  ;;  %v6373_v19 = vunpack.i.l.bf16 %v6372_v4  ;;  %v6504_v4 = vld [vmem:[%s8507_s3] ss:$0 sm:$0xff] }
 0x71b   : > { %v3342_v47 = vsel %vm634_vm12, %v3340_v18, %v6368_v22  ;;  %vm3685_vm10 = vcmask 228352  }
 0x71c   : > { %v3473_v29 = vsel %vm631_vm11, %v3471_v35, %v6364_v45 }
 0x71d   : > { %v3002_v25 = vpop.f32.mrb[44].mxu0  ;;  %v3475_v9 = vsel %vm634_vm12, %v3473_v29, %v6374_v1 }
 0x71e   : > { %v3009_v31 = vmul.f32 %v8005_v6, %v3002_v25  ;;  %v3134_v20 = vpop.f32.mrb[52].mxu1  ;;  %v5473_v57 = vpop.f32.mrb[45].mxu0  ;;  %v3341_v25 = vsel %vm631_vm11, %v3339_v3, %v6359_v12  ;;  %vm3709_vm11 = vcmask 1041408  }
 0x71f   : > { %v3141_v61 = vmul.f32 %v8005_v6, %v3134_v20  ;;  %v5479_v34 = vpop.f32.mrb[53].mxu1  ;;  %v3005_v23 = vpop.f32.mrb[46].mxu0 }
 0x720   : > { %v3011_v38 = vadd.f32 %v7703_v16, %v3009_v31  ;;  %v3010_v36 = vmul.f32 %v8005_v6, %v3005_v23  ;;  %v3137_v41 = vpop.f32.mrb[54].mxu1  ;;  %v5474_v32 = vpop.f32.mrb[47].mxu0  ;;  %v8016_v40 = vld [vmem:[#allocation3 + $0x60] sm:$0xff]  ;;  %v4364_v11 = vld [vmem:[#allocation3 + $0x68] sm:$0x3]  ;;  %v3343_v34 = vsel %vm634_vm12, %v3341_v25, %v6369_v60  ;;  %v3474_v23 = vsel %vm634_vm12, %v3472_v27, %v6373_v19 }
 0x721   : > { %v3143_v8 = vadd.f32 %v7703_v16, %v3141_v61  ;;  %v3142_v15 = vmul.f32 %v8005_v6, %v3137_v41  ;;  %4381 = vrot.lane.b32.xlu1 %v8016_v40, %s6588_s25  ;;  %v5480_v42 = vpop.f32.mrb[55].mxu1  ;;  %v4385_v44 = vrot.slane %v8016_v40, 1  ;;  %v4386_v39 = vrot.slane %v4364_v11, 1  ;;  %v6377_v31 = vpop.permute.xlu0 %6376 }
 0x722   : > { %v3013_v51 = vmax.f32 %v3011_v38, 0.0  ;;  %v3012_v28 = vadd.f32 %v7703_v16, %v3010_v36  ;;  %v4391_v48 = vrot.slane %v8016_v40, 2  ;;  %v4392_v43 = vrot.slane %v4364_v11, 2  ;;  %v6382_v57 = vpop.permute.xlu1 %6381 }
 0x723   : > { %v3145_v26 = vmax.f32 %v3143_v8, 0.0  ;;  %v3144_v50 = vadd.f32 %v7703_v16, %v3142_v15  ;;  %v8028_v54 = vsel %vm532_vm2, %v4385_v44, %v4386_v39  ;;  %v6378_v20 = vunpack.i.l.bf16 %v6377_v31 }
 0x724   : > { %v3014_v59 = vmax.f32 %v3012_v28, 0.0  ;;  %4388 = vrot.lane.b32.xlu0 %v8028_v54, %s8515_s29  ;;  %v8035_v37 = vsel %vm544_vm3, %v4391_v48, %v4392_v43  ;;  %v6379_v33 = vunpack.i.h.bf16 %v6377_v31  ;;  %v6384_v10 = vunpack.i.h.bf16 %v6382_v57 }
 0x725   : > { %v3147_v16 = vmax.f32 %v3013_v51, %v3145_v26  ;;  %v3146_v49 = vmax.f32 %v3144_v50, 0.0  ;;  %4394 = vrot.lane.b32.xlu1 %v8035_v37, %s6590_s30  ;;  %v6383_v61 = vunpack.i.l.bf16 %v6382_v57  ;;  %v3344_v13 = vsel %vm637_vm13, %v3342_v47, %v6378_v20  ;;  %v6387_v11 = vpop.permute.xlu0 %6386 }
 0x726   : > { %v3345_v38 = vsel %vm637_vm13, %v3343_v34, %v6379_v33  ;;  %v3477_v41 = vsel %vm637_vm13, %v3475_v9, %v6384_v10  ;;  %v6392_v56 = vpop.permute.xlu1 %6391  ;;  %v6389_v2 = vunpack.i.h.bf16 %v6387_v11  ;;  %v6388_v27 = vunpack.i.l.bf16 %v6387_v11 }
 0x727   : > { %v3148_v14 = vmax.f32 %v3014_v59, %v3146_v49  ;;  %v3476_v36 = vsel %vm637_vm13, %v3474_v23, %v6383_v61  ;;  %v3346_v32 = vpack.c.bf16 %v3345_v38, %v3344_v13  ;;  %v6394_v33 = vunpack.i.h.bf16 %v6392_v56  ;;  %v6505_v61 = vld [vmem:[#allocation3 + $0x10] sm:$0xff]  ;;  %v6506_v38 = vld [vmem:[#allocation3] sm:$0xff] }
 0x728   : > { %4460 = vrot.lane.b32.xlu0 %v8016_v40, %s6585_s12  ;;  %v6393_v10 = vunpack.i.l.bf16 %v6392_v56  ;;  %v3802_v34 = vsel %vm483_vm4, %v6505_v61, %v6389_v2  ;;  %v8140_v2 = vld [vmem:[%s8508_s4 + $0x8] sm:$0xff]   ;;  %vm3687_vm12 = vcmask 261120  }
 0x729   : > { %v3149_v17 = vpack.c.bf16 %v3148_v14, %v3147_v16  ;;  %4463 = vrot.lane.b32.xlu1 %v8028_v54, %s6586_s18  ;;  %v8088_v26 = vpop.permute.xlu0 %6396 }
 0x72a   : > { %v6402_v29 = vpop.permute.xlu1 %6401  ;;  %v6399_v23 = vunpack.i.h.bf16 %v8088_v26 }
 0x72b   : > { %5482 = vmatpush3.bf16.msra.mxu0 %v3149_v17  ;;  %5488 = vmatpush3.bf16.msra.mxu1 %v3149_v17  ;;  %v6403_v11 = vunpack.i.l.bf16 %v6402_v29 }
 0x72c   : > { %4466 = vrot.lane.b32.xlu0 %v8035_v37, %s6587_s20  ;;  %5493 = vmatprep.subr.bf16.mxu0 %v6574_v0 }
 0x72d   : > { %5499 = vmatprep.subr.bf16.mxu1 %v6574_v0  ;;  %v6407_v9 = vpop.permute.xlu0 %6406 }
 0x72e   : > { %5484 = vmatmul.mubr.msk.bf16.vlgmr.msra.gmra.mrb[48].mxu0 %vm851_vm6, %v7350_v53  ;;  %5490 = vmatmul.mubr.msk.bf16.vlgmr.msra.gmra.mrb[56].mxu1 %vm851_vm6, %v7352_v24  ;;  %v6408_v56 = vunpack.i.l.bf16 %v6407_v9 }
 0x72f   : > { %5494 = vmatpush3.bf16.msra.mxu0 %v6911_v58  ;;  %5500 = vmatpush3.bf16.msra.mxu1 %v6911_v58  ;;  %v3478_v58 = vpack.c.bf16 %v3477_v41, %v3476_v36  ;;  %v3676_v36 = vsel %vm483_vm4, %v6506_v38, %v6388_v27  ;;  %v6398_v41 = vunpack.i.l.bf16 %v8088_v26 }
 0x730   : > { %5495 = vmatprep.mubr.msk.bf16.mxu0 %vm6583_vm7, %v6574_v0  ;;  %5501 = vmatprep.mubr.msk.bf16.mxu1 %vm6583_vm7, %v6574_v0 }
 0x731   : > { %5505 = vmatprep.subr.bf16.mxu0 %v6574_v0  ;;  %5511 = vmatprep.subr.bf16.mxu1 %v6574_v0 }
 0x736   : > { %5496 = vmatmul.mubr.msk.bf16.vlgmr.msra.gmra.mrb[52].mxu0 %vm646_vm14, %v3346_v32  ;;  %5502 = vmatmul.mubr.msk.bf16.vlgmr.msra.gmra.mrb[60].mxu1 %vm646_vm14, %v3478_v58  ;;  %v6404_v32 = vunpack.i.h.bf16 %v6402_v29  ;;  %v6412_v58 = vpop.permute.xlu1 %6411  ;;  %vm3705_vm14 = vcmask 293888  }
 0x737   : > { %5507 = vmatprep.mubr.msk.bf16.mxu0 %vm6583_vm7, %v6574_v0  ;;  %5513 = vmatprep.mubr.msk.bf16.mxu1 %vm6583_vm7, %v6574_v0  ;;  %v6414_v26 = vunpack.i.h.bf16 %v6412_v58 }
 0x801   : > { %v3184_v8 = vpop.f32.mrb[48].mxu0  ;;  %v3224_v15 = vpop.f32.mrb[56].mxu1 }
 0x802   : > { %v3230_v42 = vmax.f32 %v3184_v8, %v3224_v15  ;;  %v5485_v44 = vpop.f32.mrb[49].mxu0  ;;  %v5491_v39 = vpop.f32.mrb[57].mxu1  ;;  %v3803_v15 = vsel %vm637_vm13, %v3802_v34, %v6394_v33  ;;  %v8178_v33 = vld [vmem:[%s8509_s5] ss:$0 sm:$0xff] }
 0x803   : > { %v3187_v51 = vpop.f32.mrb[50].mxu0  ;;  %v3227_v28 = vpop.f32.mrb[58].mxu1  ;;  %v3804_v44 = vsel %vm3678_vm0, %v3803_v15, %v6399_v23  ;;  %v6409_v39 = vunpack.i.h.bf16 %v6407_v9  ;;  %v8183_v34 = vld [vmem:[%s8510_s6] ss:$0 sm:$0xff] }
 0x804   : > { %3232 = vst.msk [vmem:[#allocation3 + $0x71] sm:$0xff] %vm483_vm4, %v3230_v42  ;;  %v5486_v48 = vpop.f32.mrb[51].mxu0  ;;  %v5492_v43 = vpop.f32.mrb[59].mxu1  ;;  %v3677_v42 = vsel %vm637_vm13, %v3676_v36, %v6393_v10  ;;  %v8123_v28 = vld [vmem:[%s8508_s4] sm:$0xff]  }
 0x805   : > { %v6417_v51 = vpop.permute.xlu0 %6416  ;;  %v3679_v48 = vsel %vm3678_vm0, %v3677_v42, %v6398_v41  ;;  %v3805_v43 = vsel %vm851_vm6, %v3804_v44, %v6404_v32 }
 0x809   : > { %v3384_v50 = vpop.f32.mrb[52].mxu0  ;;  %v3516_v21 = vpop.f32.mrb[60].mxu1 }
 0x80a   : > { %v3391_v7 = vmul.f32 %v8005_v6, %v3384_v50  ;;  %v3523_v59 = vmul.f32 %v8005_v6, %v3516_v21  ;;  %v5497_v63 = vpop.f32.mrb[53].mxu0  ;;  %v5503_v62 = vpop.f32.mrb[61].mxu1  ;;  %v3680_v50 = vsel %vm851_vm6, %v3679_v48, %v6403_v11  ;;  %v6413_v21 = vunpack.i.l.bf16 %v6412_v58 }
 0x80b   : > { %v3387_v16 = vpop.f32.mrb[54].mxu0  ;;  %v3519_v49 = vpop.f32.mrb[62].mxu1  ;;  %v8092_v52 = vld [vmem:[#allocation3 + $0x70] sm:$0xff]  ;;  %v4453_v5 = vld [vmem:[#allocation3 + $0x78] sm:$0x3]  ;;  %v3806_v62 = vsel %vm3681_vm8, %v3805_v43, %v6409_v39 }
 0x80c   : > { %v3393_v12 = vadd.f32 %v6504_v4, %v3391_v7  ;;  %v3525_v45 = vadd.f32 %v6504_v4, %v3523_v59  ;;  %v3392_v55 = vmul.f32 %v8005_v6, %v3387_v16  ;;  %v3524_v14 = vmul.f32 %v8005_v6, %v3519_v49  ;;  %v5498_v3 = vpop.f32.mrb[55].mxu0  ;;  %4470 = vrot.lane.b32.xlu1 %v8092_v52, %s6588_s25  ;;  %v5504_v46 = vpop.f32.mrb[63].mxu1 }
 0x80d   : > { %v4474_v35 = vrot.slane %v8092_v52, 1  ;;  %v4475_v22 = vrot.slane %v4453_v5, 1  ;;  %v4480_v17 = vrot.slane %v8092_v52, 2  ;;  %v4481_v18 = vrot.slane %v4453_v5, 2  ;;  %v6422_v63 = vpop.permute.xlu1 %6421 }
 0x80e   : > { %v3395_v60 = vmax.f32 %v3393_v12, 0.0  ;;  %v3527_v1 = vmax.f32 %v3525_v45, 0.0  ;;  %v3394_v19 = vadd.f32 %v6504_v4, %v3392_v55  ;;  %v3526_v25 = vadd.f32 %v6504_v4, %v3524_v14  ;;  %v6468_v5 = vld [vmem:[%s8508_s4 + $0x10] ss:$0 sps:$4 sm:$0x33]  }
 0x80f   : > { %v8104_v31 = vsel %vm532_vm2, %v4474_v35, %v4475_v22  ;;  %v8107_v6 = vsel %vm544_vm3, %v4480_v17, %v4481_v18  ;;  %v6419_v7 = vunpack.i.h.bf16 %v6417_v51  ;;  %v6418_v59 = vunpack.i.l.bf16 %v6417_v51 }
 0x810   : > { %v3529_v20 = vmax.f32 %v3395_v60, %v3527_v1  ;;  %v3396_v57 = vmax.f32 %v3394_v19, 0.0  ;;  %v3528_v47 = vmax.f32 %v3526_v25, 0.0  ;;  %4477 = vrot.lane.b32.xlu0 %v8104_v31, %s8515_s29  ;;  %4483 = vrot.lane.b32.xlu1 %v8107_v6, %s6590_s30  ;;  %v3682_v16 = vsel %vm3681_vm8, %v3680_v50, %v6408_v56  ;;  %s8521_s29 = smov 28  }
 0x811   : > { %v3807_v49 = vsel %vm3683_vm9, %v3806_v62, %v6414_v26  ;;  %v3684_v4 = vsel %vm3683_vm9, %v3682_v16, %v6413_v21  ;;  %v6424_v12 = vunpack.i.h.bf16 %v6422_v63  ;;  %v6423_v45 = vunpack.i.l.bf16 %v6422_v63  ;;  %v6432_v10 = vpop.permute.xlu1 %6431  ;;  %v6507_v26 = vld [vmem:[#allocation3 + $0x30] sm:$0xff]  ;;  %v6508_v63 = vld [vmem:[#allocation3 + $0x20] sm:$0xff] }
 0x812   : > { %v3530_v13 = vmax.f32 %v3396_v57, %v3528_v47  ;;  %v3808_v55 = vsel %vm3685_vm10, %v3807_v49, %v6419_v7  ;;  %v3686_v14 = vsel %vm3685_vm10, %v3684_v4, %v6418_v59  ;;  %v8160_v3 = vsel %vm3709_vm11, %v6468_v5, 0  ;;  %v6427_v47 = vpop.permute.xlu0 %6426 }
 0x813   : > { %v3688_v46 = vsel %vm3687_vm12, %v3686_v14, %v6423_v45  ;;  %v3809_v35 = vsel %vm3687_vm12, %v3808_v55, %v6424_v12  ;;  %v6429_v44 = vunpack.i.h.bf16 %v6427_v47  ;;  %v6428_v39 = vunpack.i.l.bf16 %v6427_v47 }
 0x814   : > { %v3531_v8 = vpack.c.bf16 %v3530_v13, %v3529_v20  ;;  %v3689_v22 = vpack.c.bf16 %v3688_v46, %v3688_v46  ;;  %v3810_v17 = vpack.c.bf16 %v3809_v35, %v3809_v35  ;;  %v6434_v21 = vunpack.i.h.bf16 %v6432_v10 }
 0x815   : > { %v6442_v51 = vpop.permute.xlu1 %6441  ;;  %v4091_v50 = vsel %vm483_vm4, %v6507_v26, %v6429_v44  ;;  %v6433_v7 = vunpack.i.l.bf16 %v6432_v10  ;;  %v4002_v62 = vsel %vm483_vm4, %v6508_v63, %v6428_v39 }
 0x816   : > { %5506 = vmatpush3.bf16.msra.mxu0 %v3531_v8  ;;  %5512 = vmatpush3.bf16.msra.mxu1 %v3531_v8  ;;  %v6437_v61 = vpop.permute.xlu0 %6436  ;;  %v6444_v12 = vunpack.i.h.bf16 %v6442_v51  ;;  %v6443_v45 = vunpack.i.l.bf16 %v6442_v51  ;;  %v4092_v46 = vsel %vm637_vm13, %v4091_v50, %v6434_v21 }
 0x817   : > { %5517 = vmatprep.subr.bf16.mxu0 %v6574_v0  ;;  %5527 = vmatprep.subr.bf16.mxu1 %v6574_v0  ;;  %v6439_v16 = vunpack.i.h.bf16 %v6437_v61  ;;  %v6438_v49 = vunpack.i.l.bf16 %v6437_v61  ;;  %v4003_v14 = vsel %vm637_vm13, %v4002_v62, %v6433_v7 }
 0x819   : > { %5508 = vmatmul.mubr.msk.bf16.vlgmr.msra.gmra.mrb[56].mxu0 %vm851_vm6, %v7350_v53  ;;  %5514 = vmatmul.mubr.msk.bf16.vlgmr.msra.gmra.mrb[64].mxu1 %vm851_vm6, %v7352_v24  ;;  %v6452_v5 = vpop.permute.xlu1 %6451 }
 0x81a   : > { %5518 = vmatpush3.bf16.msra.mxu0 %v8123_v28  ;;  %5528 = vmatpush3.bf16.msra.mxu1 %v8123_v28  ;;  %v6447_v59 = vpop.permute.xlu0 %6446 }
 0x81b   : > { %5519 = vmatprep.subr.bf16.mxu0 %v6574_v0  ;;  %5529 = vmatprep.subr.bf16.mxu1 %v6574_v0 }
 0x81c   : > { %5523 = vmatprep.mubr.msk.bf16.mxu0 %vm6583_vm7, %v6574_v0  ;;  %5533 = vmatprep.mubr.msk.bf16.mxu1 %vm6583_vm7, %v6574_v0 }
 0x81e   : > { %5520 = vmatpush3.bf16.msra.mxu0 %v8140_v2  ;;  %5530 = vmatpush3.bf16.msra.mxu1 %v8140_v2  ;;  %v6457_v35 = vpop.permute.xlu0 %6456 }
 0x81f   : > { %5521 = vmatprep.subr.bf16.mxu0 %v6574_v0  ;;  %5531 = vmatprep.subr.bf16.mxu1 %v6574_v0 }
 0x822   : > { %5522 = vmatpush3.bf16.msra.mxu0 %v8160_v3  ;;  %5532 = vmatpush3.bf16.msra.mxu1 %v8160_v3 }
 0x823   : > { %5537 = vmatprep.subr.bf16.mxu0 %v6574_v0  ;;  %5543 = vmatprep.subr.bf16.mxu1 %v6574_v0 }
 0x825   : > { %5524 = vmatmul.mubr.msk.bf16.vlgmr.msra.gmra.mrb[60].mxu0 %vm3705_vm14, %v3689_v22  ;;  %5534 = vmatmul.mubr.msk.bf16.vlgmr.msra.gmra.mrb[68].mxu1 %vm3705_vm14, %v3810_v17  ;;  %v4093_v22 = vsel %vm3678_vm0, %v4092_v46, %v6439_v16  ;;  %v4004_v17 = vsel %vm3678_vm0, %v4003_v14, %v6438_v49 }
 0x826   : > { %5539 = vmatprep.mubr.msk.bf16.mxu0 %vm6583_vm7, %v6574_v0  ;;  %5545 = vmatprep.mubr.msk.bf16.mxu1 %vm6583_vm7, %v6574_v0 }
 0x8ec   : > { %v3566_v18 = vpop.f32.mrb[56].mxu0  ;;  %v3606_v60 = vpop.f32.mrb[64].mxu1 }
 0x8ed   : > { %v3612_v1 = vmax.f32 %v3566_v18, %v3606_v60  ;;  %v5509_v19 = vpop.f32.mrb[57].mxu0  ;;  %v5515_v25 = vpop.f32.mrb[65].mxu1  ;;  %v6449_v18 = vunpack.i.h.bf16 %v6447_v59  ;;  %v6448_v60 = vunpack.i.l.bf16 %v6447_v59 }
 0x8ee   : > { %v3569_v27 = vpop.f32.mrb[58].mxu0  ;;  %v3609_v29 = vpop.f32.mrb[66].mxu1  ;;  %v4005_v19 = vsel %vm851_vm6, %v4004_v17, %v6443_v45  ;;  %v6454_v25 = vunpack.i.h.bf16 %v6452_v5 }
 0x8ef   : > { %3614 = vst.msk [vmem:[#allocation3 + $0x81] sm:$0xff] %vm483_vm4, %v3612_v1  ;;  %v5510_v20 = vpop.f32.mrb[59].mxu0  ;;  %v5516_v57 = vpop.f32.mrb[67].mxu1  ;;  %v4094_v1 = vsel %vm851_vm6, %v4093_v22, %v6444_v12  ;;  %v6453_v27 = vunpack.i.l.bf16 %v6452_v5  ;;  %v6459_v29 = vunpack.i.h.bf16 %v6457_v35  ;;  %v4006_v47 = vsel %vm3681_vm8, %v4005_v19, %v6448_v60  ;;  %v6509_v19 = vld [vmem:[#allocation3 + $0x40] sm:$0xff] }
 0x8f0   : > { %v6458_v20 = vunpack.i.l.bf16 %v6457_v35  ;;  %v6462_v57 = vpop.permute.xlu1 %6461  ;;  %v4095_v10 = vsel %vm3681_vm8, %v4094_v1, %v6449_v18 }
 0x8f1   : > { %v4096_v61 = vsel %vm3683_vm9, %v4095_v10, %v6454_v25 }
 0x8f4   : > { %v4369_v50 = vpop.permute.xlu1 %4368 }
 0x8f8   : > { %v3747_v23 = vpop.f32.mrb[60].mxu0  ;;  %v3848_v9 = vpop.f32.mrb[68].mxu1 }
 0x8f9   : > { %v3759_v13 = vmul.f32 %v8178_v33, %v3747_v23  ;;  %v3854_v38 = vmul.f32 %v8178_v33, %v3848_v9  ;;  %v5525_v36 = vpop.f32.mrb[61].mxu0  ;;  %v5535_v41 = vpop.f32.mrb[69].mxu1  ;;  %v4007_v23 = vsel %vm3683_vm9, %v4006_v47, %v6453_v27  ;;  %v6464_v9 = vunpack.i.h.bf16 %v6462_v57 }
 0x8fa   : > { %v3750_v32 = vpop.f32.mrb[62].mxu0  ;;  %v3851_v58 = vpop.f32.mrb[70].mxu1  ;;  %v4008_v36 = vsel %vm3685_vm10, %v4007_v23, %v6458_v20 }
 0x8fb   : > { %v3766_v11 = vadd.f32 %v8183_v34, %v3759_v13  ;;  %v3855_v8 = vadd.f32 %v8183_v34, %v3854_v38  ;;  %v5526_v15 = vpop.f32.mrb[63].mxu0  ;;  %v5536_v42 = vpop.f32.mrb[71].mxu1  ;;  %v6463_v13 = vunpack.i.l.bf16 %v6462_v57  ;;  %v4097_v38 = vsel %vm3685_vm10, %v4096_v61, %v6459_v29 }
 0x8fc   : > { %v4098_v32 = vsel %vm3687_vm12, %v4097_v38, %v6464_v9  ;;  %v4375_v7 = vpop.permute.xlu1 %4374 }
 0x8fd   : > { %v3767_v48 = vmax.f32 %v3766_v11, 0.0  ;;  %v3856_v43 = vmax.f32 %v3855_v8, 0.0  ;;  %v4009_v41 = vsel %vm3687_vm12, %v4008_v36, %v6463_v13  ;;  %v4099_v11 = vpack.c.bf16 %v4098_v32, %v4098_v32  ;;  %v4366_v8 = vpop.permute.xlu0 %4365 }
 0x8fe   : > { %v4010_v58 = vpack.c.bf16 %v4009_v41, %v4009_v41  ;;  %v4397_v25 = vsel %vm483_vm4, %v6509_v19, %v4366_v8 }
 0x8ff   : > { %v3857_v56 = vmax.f32 %v3767_v48, %v3856_v43  ;;  %v4398_v57 = vsel %vm637_vm13, %v4397_v25, %v4369_v50 }
 0x900   : > { %v4458_v22 = vpop.permute.xlu1 %4457 }
 0x901   : > { %v3858_v4 = vpack.c.bf16 %v3857_v56, %v3857_v56  ;;  %v4372_v21 = vpop.permute.xlu0 %4371 }
 0x902   : > { %v4399_v10 = vsel %vm3678_vm0, %v4398_v57, %v4372_v21 }
 0x903   : > { %v3862_v55 = vsel %vm650_vm5, %v3858_v4, 0  ;;  %v4400_v23 = vsel %vm851_vm6, %v4399_v10, %v4375_v7  ;;  %v6469_v7 = vld [vmem:[%s8511_s7 + $0x10] sm:$0xff]  }
 0x904   : > { %5538 = vmatpush3.bf16.msra.mxu0 %v3862_v55  ;;  %5544 = vmatpush3.bf16.msra.mxu1 %v3862_v55  ;;  %v4382_v27 = vpop.permute.xlu1 %4381 }
 0x905   : > { %5549 = vmatprep.subr.bf16.mxu0 %v6574_v0  ;;  %5559 = vmatprep.subr.bf16.mxu1 %v6574_v0  ;;  %v4378_v59 = vpop.permute.xlu0 %4377 }
 0x906   : > { %v4401_v9 = vsel %vm3681_vm8, %v4400_v23, %v4378_v59  ;;  %v6470_v59 = vld [vmem:[%s8511_s7 + $0x18] sm:$0xff]  }
 0x907   : > { %5540 = vmatmul.mubr.msk.bf16.vlgmr.msra.gmra.mrb[64].mxu0 %vm637_vm13, %v7350_v53  ;;  %5546 = vmatmul.mubr.msk.bf16.vlgmr.msra.gmra.mrb[72].mxu1 %vm637_vm13, %v7352_v24  ;;  %v4402_v13 = vsel %vm3683_vm9, %v4401_v9, %v4382_v27 }
 0x908   : > { %5550 = vmatpush3.bf16.msra.mxu0 %v8123_v28  ;;  %5560 = vmatpush3.bf16.msra.mxu1 %v8123_v28  ;;  %v4395_v61 = vpop.permute.xlu1 %4394 }
 0x909   : > { %5551 = vmatprep.subr.bf16.mxu0 %v6574_v0  ;;  %5561 = vmatprep.subr.bf16.mxu1 %v6574_v0  ;;  %v4455_v1 = vpop.permute.xlu0 %4454 }
 0x90a   : > { %5555 = vmatprep.mubr.msk.bf16.mxu0 %vm6583_vm7, %v6574_v0  ;;  %5565 = vmatprep.mubr.msk.bf16.mxu1 %vm6583_vm7, %v6574_v0  ;;  %v4486_v41 = vsel %vm483_vm4, %v7901_v30, %v4455_v1 }
 0x90c   : > { %5552 = vmatpush3.bf16.msra.mxu0 %v8140_v2  ;;  %5562 = vmatpush3.bf16.msra.mxu1 %v8140_v2  ;;  %v4464_v32 = vpop.permute.xlu1 %4463 }
 0x90d   : > { %5553 = vmatprep.subr.bf16.mxu0 %v6574_v0  ;;  %5563 = vmatprep.subr.bf16.mxu1 %v6574_v0  ;;  %v4389_v47 = vpop.permute.xlu0 %4388 }
 0x90e   : > { %v4403_v36 = vsel %vm3685_vm10, %v4402_v13, %v4389_v47 }
 0x910   : > { %5554 = vmatpush3.bf16.msra.mxu0 %v8160_v3  ;;  %5564 = vmatpush3.bf16.msra.mxu1 %v8160_v3 }
 0x911   : > { %5569 = vmatprep.subr.bf16.mxu0 %v6574_v0  ;;  %5575 = vmatprep.subr.bf16.mxu1 %v6574_v0  ;;  %v4461_v38 = vpop.permute.xlu0 %4460 }
 0x913   : > { %5556 = vmatmul.mubr.msk.bf16.vlgmr.msra.gmra.mrb[68].mxu0 %vm3705_vm14, %v4010_v58  ;;  %5566 = vmatmul.mubr.msk.bf16.vlgmr.msra.gmra.mrb[76].mxu1 %vm3705_vm14, %v4099_v11  ;;  %v4404_v58 = vsel %vm3687_vm12, %v4403_v36, %v4395_v61  ;;  %v4487_v11 = vsel %vm637_vm13, %v4486_v41, %v4458_v22 }
 0x914   : > { %5571 = vmatprep.mubr.msk.bf16.mxu0 %vm6583_vm7, %v6574_v0  ;;  %5577 = vmatprep.mubr.msk.bf16.mxu1 %vm6583_vm7, %v6574_v0 }
 0x915   : > { %v4467_v8 = vpop.permute.xlu0 %4466 }
 0x9da   : > { %v3898_v15 = vpop.f32.mrb[64].mxu0  ;;  %v3940_v42 = vpop.f32.mrb[72].mxu1 }
 0x9db   : > { %v8234_v44 = vmax.f32 %v3898_v15, %v3940_v42  ;;  %v5541_v39 = vpop.f32.mrb[65].mxu0  ;;  %v5547_v51 = vpop.f32.mrb[73].mxu1  ;;  %v4405_v15 = vpack.c.bf16 %v4404_v58, %v4404_v58  ;;  %v4488_v42 = vsel %vm3678_vm0, %v4487_v11, %v4461_v38 }
 0x9dc   : > { %v3901_v48 = vpop.f32.mrb[66].mxu0  ;;  %v3943_v43 = vpop.f32.mrb[74].mxu1  ;;  %v4489_v30 = vsel %vm851_vm6, %v4488_v42, %v4464_v32  ;;  %v4795_v42 = vld [vmem:[#allocation3 + $0x98] sm:$0x3] }
 0x9dd   : > { %v5542_v56 = vpop.f32.mrb[67].mxu0  ;;  %v5548_v26 = vpop.f32.mrb[75].mxu1  ;;  %v4490_v48 = vsel %vm3681_vm8, %v4489_v30, %v4467_v8 }
 0x9de   : > { %v4471_v39 = vpop.permute.xlu1 %4470  ;;  %v4478_v51 = vpop.permute.xlu0 %4477 }
 0x9df   : > { %v4491_v43 = vsel %vm3683_vm9, %v4490_v48, %v4471_v39  ;;  %v4823_v48 = vrot.slane %v4795_v42, 2 }
 0x9e0   : > { %v4492_v56 = vsel %vm3685_vm10, %v4491_v43, %v4478_v51  ;;  %v4817_v51 = vrot.slane %v4795_v42, 1 }
 0x9e2   : > { %v4484_v26 = vpop.permute.xlu1 %4483 }
 0x9e3   : > { %v4493_v50 = vsel %vm3687_vm12, %v4492_v56, %v4484_v26 }
 0x9e4   : > { %v4494_v21 = vpack.c.bf16 %v4493_v50, %v4493_v50 }
 0x9e6   : > { %v4048_v63 = vpop.f32.mrb[68].mxu0  ;;  %v4137_v62 = vpop.f32.mrb[76].mxu1 }
 0x9e7   : > { %v4054_v16 = vmul.f32 %v8178_v33, %v4048_v63  ;;  %v4143_v49 = vmul.f32 %v8178_v33, %v4137_v62  ;;  %v5557_v5 = vpop.f32.mrb[69].mxu0  ;;  %v5567_v4 = vpop.f32.mrb[77].mxu1 }
 0x9e8   : > { %v4051_v12 = vpop.f32.mrb[70].mxu0  ;;  %v4140_v45 = vpop.f32.mrb[78].mxu1 }
 0x9e9   : > { %v4055_v55 = vadd.f32 %v8183_v34, %v4054_v16  ;;  %v4144_v14 = vadd.f32 %v8183_v34, %v4143_v49  ;;  %v5558_v46 = vpop.f32.mrb[71].mxu0  ;;  %v5568_v35 = vpop.f32.mrb[79].mxu1 }
 0x9ea   : > { %v3948_v35 = vrot.slane %v8234_v44, 1 }
 0x9eb   : > { %v4056_v17 = vmax.f32 %v4055_v55, 0.0  ;;  %v4145_v18 = vmax.f32 %v4144_v14, 0.0 }
 0x9ed   : > { %v4146_v60 = vmax.f32 %v4056_v17, %v4145_v18  ;;  %v3956_v17 = vrot.slane %v8234_v44, 3  ;;  %v3952_v18 = vrot.slane %v8234_v44, 2 }
 0x9ef   : > { %v4147_v29 = vpack.c.bf16 %v4146_v60, %v4146_v60 }
 0x9f1   : > { %v4149_v20 = vsel %vm650_vm5, %v4147_v29, 0  ;;  %v4704_v29 = vld [vmem:[#allocation3 + $0x80] sm:$0xff] }
 0x9f2   : > { %5570 = vmatpush3.bf16.msra.mxu0 %v4149_v20  ;;  %5576 = vmatpush3.bf16.msra.mxu1 %v4149_v20  ;;  %v4705_v20 = vld [vmem:[#allocation3 + $0x88] sm:$0x3]  ;;  %v4726_v47 = vrot.slane %v4704_v29, 1  ;;  %v4732_v10 = vrot.slane %v4704_v29, 2 }
 0x9f3   : > { %5597 = vmatprep.subr.bf16.mxu1 %v6574_v0  ;;  %5581 = vmatprep.subr.bf16.mxu0 %v6574_v0  ;;  %v4733_v61 = vrot.slane %v4705_v20, 2  ;;  %v4727_v23 = vrot.slane %v4705_v20, 1 }
 0x9f5   : > { %5572 = vmatmul.mubr.msk.bf16.vlgmr.msra.gmra.mrb[72].mxu0 %vm637_vm13, %v7350_v53  ;;  %5578 = vmatmul.mubr.msk.bf16.vlgmr.msra.gmra.mrb[80].mxu1 %vm637_vm13, %v7352_v24  ;;  %v4734_v41 = vsel %vm544_vm3, %v4732_v10, %v4733_v61  ;;  %v4728_v32 = vsel %vm532_vm2, %v4726_v47, %v4727_v23 }
 0x9f6   : > { %5598 = vmatpush3.bf16.msra.mxu1 %v8123_v28  ;;  %5603 = vmatprep.mubr.msk.bf16.mxu1 %vm6583_vm7, %v6574_v0 }
 0x9f7   : > { %5599 = vmatprep.subr.bf16.mxu1 %v6574_v0  ;;  %5585 = vmatprep.mubr.msk.bf16.mxu0 %vm6583_vm7, %v6574_v0 }
 0x9f8   : > { %5582 = vmatpush3.bf16.msra.mxu0 %v6469_v7 }
 0x9f9   : > { %5583 = vmatprep.subr.bf16.mxu0 %v6574_v0 }
 0x9fa   : > { %5600 = vmatpush3.bf16.msra.mxu1 %v8140_v2 }
 0x9fb   : > { %5601 = vmatprep.subr.bf16.mxu1 %v6574_v0 }
 0x9fc   : > { %5584 = vmatpush3.bf16.msra.mxu0 %v6470_v59 }
 0x9fd   : > { %5589 = vmatprep.subr.bf16.mxu0 %v6574_v0 }
 0x9fe   : > { %5602 = vmatpush3.bf16.msra.mxu1 %v8160_v3 }
 0x9ff   : > { %5607 = vmatprep.subr.bf16.mxu1 %v6574_v0 }
 0xa01   : > { %5604 = vmatmul.mubr.msk.bf16.vlgmr.msra.gmra.mrb[84].mxu1 %vm3705_vm14, %v4405_v15  ;;  %v4794_v15 = vld [vmem:[#allocation3 + $0x90] sm:$0xff] }
 0xa02   : > { %5608 = vmatpush3.bf16.msra.mxu1 %v8123_v28  ;;  %5613 = vmatprep.mubr.msk.bf16.mxu1 %vm6583_vm7, %v6574_v0  ;;  %v4816_v39 = vrot.slane %v4794_v15, 1  ;;  %v4822_v30 = vrot.slane %v4794_v15, 2 }
 0xa03   : > { %5609 = vmatprep.subr.bf16.mxu1 %v6574_v0 }
 0xa04   : > { %v4818_v43 = vsel %vm532_vm2, %v4816_v39, %v4817_v51  ;;  %v6473_v39 = vld [vmem:[%s8511_s7 + $0x20] sm:$0xff]   ;;  %vm5051_vm2 = vcmask 253952  }
 0xa06   : > { %5610 = vmatpush3.bf16.msra.mxu1 %v8140_v2 }
 0xa07   : > { %5611 = vmatprep.subr.bf16.mxu1 %v6574_v0 }
 0xa0a   : > { %5612 = vmatpush3.bf16.msra.mxu1 %v8160_v3 }
 0xa0b   : > { %5637 = vmatprep.subr.bf16.mxu1 %v6574_v0 }
 0xa0d   : > { %5614 = vmatmul.mubr.msk.bf16.vlgmr.msra.gmra.mrb[88].mxu1 %vm3705_vm14, %v4494_v21 }
 0xa0e   : > { %5638 = vmatpush3.bf16.msra.mxu1 %v8123_v28  ;;  %5643 = vmatprep.mubr.msk.bf16.mxu1 %vm6583_vm7, %v6574_v0 }
 0xa0f   : > { %5639 = vmatprep.subr.bf16.mxu1 %v6574_v0 }
 0xa12   : > { %5640 = vmatpush3.bf16.msra.mxu1 %v8140_v2 }
 0xa13   : > { %5641 = vmatprep.subr.bf16.mxu1 %v6574_v0 }
 0xa16   : > { %5642 = vmatpush3.bf16.msra.mxu1 %v8160_v3 }
 0xa17   : > { %5647 = vmatprep.subr.bf16.mxu1 %v6574_v0 }
 0xac8   : > { %v4185_v63 = vpop.f32.mrb[72].mxu0  ;;  %v4225_v62 = vpop.f32.mrb[80].mxu1 }
 0xac9   : > { %v8300_v16 = vmax.f32 %v4185_v63, %v4225_v62  ;;  %v5573_v49 = vpop.f32.mrb[73].mxu0  ;;  %v5579_v5 = vpop.f32.mrb[81].mxu1  ;;  %v6471_v63 = vld [vmem:[%s8511_s7] sm:$0xff]  }
 0xaca   : > { %v4188_v4 = vpop.f32.mrb[74].mxu0  ;;  %v4228_v12 = vpop.f32.mrb[82].mxu1 }
 0xacb   : > { %v5574_v45 = vpop.f32.mrb[75].mxu0  ;;  %v4237_v55 = vrot.slane %v8300_v16, 2  ;;  %v4233_v14 = vrot.slane %v8300_v16, 1  ;;  %v5580_v46 = vpop.f32.mrb[83].mxu1  ;;  %v4241_v22 = vrot.slane %v8300_v16, 3 }
 0xacd   : > { %4238 = vrot.lane.b32.xlu1 %v4237_v55, %s6586_s18  ;;  %4234 = vrot.lane.b32.xlu0 %v4233_v14, %s6584_s28 }
 0xad1   : > { %3949 = vrot.lane.b32.xlu1 %v3948_v35, %s6584_s28  ;;  %4242 = vrot.lane.b32.xlu0 %v4241_v22, %s6588_s25 }
 0xad4   : > { %v4443_v60 = vpop.f32.mrb[84].mxu1 }
 0xad5   : > { %3957 = vrot.lane.b32.xlu1 %v3956_v17, %s6588_s25  ;;  %3953 = vrot.lane.b32.xlu0 %v3952_v18, %s6586_s18  ;;  %v5605_v1 = vpop.f32.mrb[85].mxu1  ;;  %v4449_v27 = vmul.f32 %v8178_v33, %v4443_v60 }
 0xad6   : > { %v4446_v19 = vpop.f32.mrb[86].mxu1 }
 0xad7   : > { %v5606_v25 = vpop.f32.mrb[87].mxu1 }
 0xad9   : > { %4709 = vrot.lane.b32.xlu1 %v8035_v37, %s6584_s28  ;;  %4706 = vrot.lane.b32.xlu0 %v8028_v54, %s6581_s26  ;;  %v4450_v37 = vadd.f32 %v8183_v34, %v4449_v27 }
 0xadb   : > { %v4451_v58 = vmax.f32 %v4450_v37, 0.0 }
 0xadd   : > { %4715 = vrot.lane.b32.xlu1 %v8104_v31, %s6586_s18  ;;  %4712 = vrot.lane.b32.xlu0 %v8092_v52, %s6585_s12 }
 0xae0   : > { %v4532_v57 = vpop.f32.mrb[88].mxu1 }
 0xae1   : > { %v4538_v9 = vmul.f32 %v8178_v33, %v4532_v57  ;;  %4722 = vrot.lane.b32.xlu1 %v4704_v29, %s6588_s25  ;;  %4718 = vrot.lane.b32.xlu0 %v8107_v6, %s6587_s20  ;;  %v5615_v54 = vpop.f32.mrb[89].mxu1 }
 0xae2   : > { %v4535_v13 = vpop.f32.mrb[90].mxu1 }
 0xae3   : > { %v4539_v38 = vadd.f32 %v8183_v34, %v4538_v9  ;;  %v5616_v36 = vpop.f32.mrb[91].mxu1 }
 0xae5   : > { %v4540_v11 = vmax.f32 %v4539_v38, 0.0  ;;  %4735 = vrot.lane.b32.xlu1 %v4734_v41, %s6590_s30  ;;  %4729 = vrot.lane.b32.xlu0 %v4728_v32, %s8521_s29 }
 0xae7   : > { %v4541_v8 = vmax.f32 %v4451_v58, %v4540_v11 }
 0xae9   : > { %4799 = vrot.lane.b32.xlu1 %v8107_v6, %s6584_s28  ;;  %4796 = vrot.lane.b32.xlu0 %v8104_v31, %s6581_s26  ;;  %v4824_v6 = vsel %vm544_vm3, %v4822_v30, %v4823_v48  ;;  %v4542_v18 = vpack.c.bf16 %v4541_v8, %v4541_v8 }
 0xaed   : > { %4805 = vrot.lane.b32.xlu1 %v4728_v32, %s6586_s18  ;;  %4802 = vrot.lane.b32.xlu0 %v4704_v29, %s6585_s12 }
 0xaf1   : > { %4808 = vrot.lane.b32.xlu0 %v4734_v41, %s6587_s20  ;;  %4812 = vrot.lane.b32.xlu1 %v4794_v15, %s6588_s25 }
 0xaf5   : > { %4819 = vrot.lane.b32.xlu0 %v4818_v43, %s8521_s29  ;;  %4825 = vrot.lane.b32.xlu1 %v4824_v6, %s6590_s30  ;;  %s351_s29 = scalar_lea.vmem [#allocation4], %s350_s11  ;;  %s8462_s30 = scalar_lea.hbm %s8514_s10, %s5197_s21 }
 0xaf6   : > { %s5066_s26 = sshll.u32 %s351_s29, 4  ;;  %s8464_s26 = int_to_ptr.vmem [resolvable:$true] %s5066_s26 }
 0xaf7   : > { %s6510_s27 = scalar_lea.vmem %s8464_s26, 16 }
 0xaf8   : > { %p6511_p11 = scmp.ne.s32.totalorder %s8464_s26, %s6510_s27 }
 0xafa   : > { %p6512_p12 = pnand %p6511_p11, %p6685_p5 }
 0xafc   : > { %p6513_p13 = pneg %p6512_p12 }
 0xb3f   : > { %v4239_v31 = vpop.permute.xlu1 %4238  ;;  %v4235_v56 = vpop.permute.xlu0 %4234 }
 0xb40   : > { %v4245_v26 = vsel %vm637_vm13, %v8300_v16, %v4235_v56  ;;  %v6472_v16 = vld [vmem:[%s8511_s7 + $0x8] sm:$0xff]  }
 0xb41   : > { %v4246_v21 = vsel %vm851_vm6, %v4245_v26, %v4239_v31 }
 0xb43   : > { %v3950_v50 = vpop.permute.xlu1 %3949  ;;  %v4243_v7 = vpop.permute.xlu0 %4242 }
 0xb44   : > { %v4247_v59 = vsel %vm3683_vm9, %v4246_v21, %v4243_v7  ;;  %v3960_v4 = vsel %vm637_vm13, %v8234_v44, %v3950_v50 }
 0xb45   : > { %v4248_v62 = vpack.c.bf16 %v4247_v59, %v4247_v59 }
 0xb47   : > { %v3958_v49 = vpop.permute.xlu1 %3957  ;;  %5586 = vmatmul.mubr.msk.bf16.vlgmr.msra.gmra.mrb[76].mxu0 %vm3687_vm12, %v4248_v62  ;;  %v3954_v5 = vpop.permute.xlu0 %3953 }
 0xb48   : > { %5590 = vmatpush3.bf16.msra.mxu0 %v6471_v63  ;;  %5593 = vmatprep.mubr.msk.bf16.mxu0 %vm6583_vm7, %v6574_v0  ;;  %v3961_v12 = vsel %vm851_vm6, %v3960_v4, %v3954_v5 }
 0xb49   : > { %5591 = vmatprep.subr.bf16.mxu0 %v6574_v0  ;;  %v3962_v46 = vsel %vm3683_vm9, %v3961_v12, %v3958_v49 }
 0xb4a   : > { %v3963_v44 = vpack.c.bf16 %v3962_v46, %v3962_v46 }
 0xb4b   : > { %v4710_v45 = vpop.permute.xlu1 %4709  ;;  %v4707_v55 = vpop.permute.xlu0 %4706 }
 0xb4c   : > { %v4738_v14 = vsel %vm483_vm4, %v8016_v40, %v4707_v55  ;;  %5592 = vmatpush3.bf16.msra.mxu0 %v6472_v16  ;;  %v4544_v40 = vsel %vm650_vm5, %v4542_v18, 0 }
 0xb4d   : > { %5617 = vmatprep.subr.bf16.mxu0 %v6574_v0  ;;  %v4739_v22 = vsel %vm637_vm13, %v4738_v14, %v4710_v45 }
 0xb4f   : > { %v4716_v35 = vpop.permute.xlu1 %4715  ;;  %v4713_v17 = vpop.permute.xlu0 %4712 }
 0xb50   : > { %v4740_v60 = vsel %vm3678_vm0, %v4739_v22, %v4713_v17 }
 0xb51   : > { %v4741_v19 = vsel %vm851_vm6, %v4740_v60, %v4716_v35 }
 0xb53   : > { %v4723_v1 = vpop.permute.xlu1 %4722  ;;  %5594 = vmatmul.mubr.msk.bf16.vlgmr.msra.gmra.mrb[76].mxu0 %vm3687_vm12, %v3963_v44  ;;  %v4719_v25 = vpop.permute.xlu0 %4718 }
 0xb54   : > { %v4742_v27 = vsel %vm3681_vm8, %v4741_v19, %v4719_v25  ;;  %5618 = vmatpush3.bf16.msra.mxu0 %v4544_v40  ;;  %5619 = vmatprep.mubr.msk.bf16.mxu0 %vm6583_vm7, %v6574_v0 }
 0xb55   : > { %5623 = vmatprep.subr.bf16.mxu0 %v6574_v0  ;;  %v4743_v20 = vsel %vm3683_vm9, %v4742_v27, %v4723_v1 }
 0xb57   : > { %v4736_v29 = vpop.permute.xlu1 %4735  ;;  %v4730_v57 = vpop.permute.xlu0 %4729 }
 0xb58   : > { %v4744_v47 = vsel %vm3685_vm10, %v4743_v20, %v4730_v57  ;;  %v6475_v20 = vld [vmem:[%s8511_s7 + $0x30] sm:$0xff]  }
 0xb59   : > { %v4745_v10 = vsel %vm3687_vm12, %v4744_v47, %v4736_v29 }
 0xb5a   : > { %v4746_v61 = vpack.c.bf16 %v4745_v10, %v4745_v10  ;;  %v6476_v10 = vld [vmem:[%s8511_s7 + $0x38] sm:$0xff]  }
 0xb5b   : > { %v4800_v23 = vpop.permute.xlu1 %4799  ;;  %v4797_v37 = vpop.permute.xlu0 %4796  ;;  %5620 = vmatmul.mubr.msk.bf16.vlgmr.msra.gmra.mrb[80].mxu0 %vm637_vm13, %v7350_v53 }
 0xb5c   : > { %v4828_v9 = vsel %vm483_vm4, %v8092_v52, %v4797_v37  ;;  %5624 = vmatpush3.bf16.msra.mxu0 %v4544_v40  ;;  %5644 = vmatmul.mubr.msk.bf16.vlgmr.msra.gmra.mrb[92].mxu1 %vm3705_vm14, %v4746_v61 }
 0xb5d   : > { %5648 = vmatpush3.bf16.msra.mxu1 %v8123_v28  ;;  %5625 = vmatprep.mubr.msk.bf16.mxu0 %vm6583_vm7, %v6574_v0  ;;  %v4829_v13 = vsel %vm637_vm13, %v4828_v9, %v4800_v23 }
 0xb5e   : > { %5649 = vmatprep.subr.bf16.mxu1 %v6574_v0  ;;  %5653 = vmatprep.mubr.msk.bf16.mxu1 %vm6583_vm7, %v6574_v0 }
 0xb5f   : > { %v4806_v54 = vpop.permute.xlu1 %4805  ;;  %v4803_v38 = vpop.permute.xlu0 %4802  ;;  %5629 = vmatprep.subr.bf16.mxu0 %v6574_v0 }
 0xb60   : > { %v4830_v52 = vsel %vm3678_vm0, %v4829_v13, %v4803_v38 }
 0xb61   : > { %5650 = vmatpush3.bf16.msra.mxu1 %v8140_v2  ;;  %v4831_v28 = vsel %vm851_vm6, %v4830_v52, %v4806_v54 }
 0xb62   : > { %5651 = vmatprep.subr.bf16.mxu1 %v6574_v0 }
 0xb63   : > { %v4809_v36 = vpop.permute.xlu0 %4808  ;;  %5626 = vmatmul.mubr.msk.bf16.vlgmr.msra.gmra.mrb[84].mxu0 %vm637_vm13, %v7352_v24  ;;  %v4813_v41 = vpop.permute.xlu1 %4812 }
 0xb64   : > { %v4832_v32 = vsel %vm3681_vm8, %v4831_v28, %v4809_v36  ;;  %5633 = vmatprep.mubr.msk.bf16.mxu0 %vm6583_vm7, %v6574_v0  ;;  %5630 = vmatpush3.bf16.msra.mxu0 %v6473_v39 }
 0xb65   : > { %5652 = vmatpush3.bf16.msra.mxu1 %v8160_v3  ;;  %v4833_v58 = vsel %vm3683_vm9, %v4832_v32, %v4813_v41  ;;  %5631 = vmatprep.subr.bf16.mxu0 %v6574_v0  ;;  %v6474_v3 = vld [vmem:[%s8511_s7 + $0x28] sm:$0xff]  }
 0xb67   : > { %v4820_v11 = vpop.permute.xlu0 %4819  ;;  %v4826_v2 = vpop.permute.xlu1 %4825 }
 0xb68   : > { %v4834_v8 = vsel %vm3685_vm10, %v4833_v58, %v4820_v11  ;;  %5632 = vmatpush3.bf16.msra.mxu0 %v6474_v3  ;;  %v5046_v11 = vld [vmem:[%s8512_s8] sm:$0x1] }
 0xb69   : > { %v4835_v15 = vsel %vm3687_vm12, %v4834_v8, %v4826_v2  ;;  %5657 = vmatprep.subr.bf16.mxu0 %v6574_v0  ;;  %v5048_v8 = vld [vmem:[%s8513_s9] sm:$0x1] }
 0xb6a   : > { %v4836_v42 = vpack.c.bf16 %v4835_v15, %v4835_v15 }
 0xb6c   : > { %5654 = vmatmul.mubr.msk.bf16.vlgmr.msra.gmra.mrb[96].mxu1 %vm3705_vm14, %v4836_v42 }
 0xc2e   : > { %v4580_v30 = vpop.f32.mrb[80].mxu0 }
 0xc2f   : > { %v4784_v51 = vpop.f32.mrb[92].mxu1  ;;  %v5621_v48 = vpop.f32.mrb[81].mxu0 }
 0xc30   : > { %v5645_v43 = vpop.f32.mrb[93].mxu1  ;;  %v4583_v6 = vpop.f32.mrb[82].mxu0  ;;  %v4790_v5 = vmul.f32 %v8178_v33, %v4784_v51 }
 0xc31   : > { %v4787_v31 = vpop.f32.mrb[94].mxu1  ;;  %v5622_v56 = vpop.f32.mrb[83].mxu0 }
 0xc32   : > { %v5646_v26 = vpop.f32.mrb[95].mxu1  ;;  %v4791_v12 = vadd.f32 %v8183_v34, %v4790_v5 }
 0xc34   : > { %v4792_v22 = vmax.f32 %v4791_v12, 0.0 }
 0xc36   : > { %v4620_v50 = vpop.f32.mrb[84].mxu0 }
 0xc37   : > { %v4626_v21 = vmax.f32 %v4580_v30, %v4620_v50  ;;  %v5627_v7 = vpop.f32.mrb[85].mxu0 }
 0xc38   : > { %v4623_v59 = vpop.f32.mrb[86].mxu0 }
 0xc39   : > { %v4632_v63 = vrot.slane %v4626_v21, 2  ;;  %v4628_v62 = vrot.slane %v4626_v21, 1  ;;  %v5628_v49 = vpop.f32.mrb[87].mxu0  ;;  %v4636_v16 = vrot.slane %v4626_v21, 3 }
 0xc3b   : > { %4633 = vrot.lane.b32.xlu1 %v4632_v63, %s6586_s18  ;;  %4629 = vrot.lane.b32.xlu0 %v4628_v62, %s6584_s28 }
 0xc3f   : > { %4637 = vrot.lane.b32.xlu0 %v4636_v16, %s6588_s25  ;;  %v4874_v4 = vpop.f32.mrb[96].mxu1 }
 0xc40   : > { %v4880_v45 = vmul.f32 %v8178_v33, %v4874_v4  ;;  %v5655_v55 = vpop.f32.mrb[97].mxu1 }
 0xc41   : > { %v4877_v14 = vpop.f32.mrb[98].mxu1 }
 0xc42   : > { %v4881_v46 = vadd.f32 %v8183_v34, %v4880_v45  ;;  %v5656_v35 = vpop.f32.mrb[99].mxu1 }
 0xc44   : > { %v4882_v17 = vmax.f32 %v4881_v46, 0.0 }
 0xc46   : > { %v4883_v18 = vmax.f32 %v4792_v22, %v4882_v17 }
 0xc48   : > { %v4884_v40 = vpack.c.bf16 %v4883_v18, %v4883_v18 }
 0xc4a   : > { %v4886_v33 = vsel %vm650_vm5, %v4884_v40, 0 }
 0xcad   : > { %v4630_v60 = vpop.permute.xlu0 %4629  ;;  %v4634_v44 = vpop.permute.xlu1 %4633 }
 0xcae   : > { %v4640_v1 = vsel %vm637_vm13, %v4626_v21, %v4630_v60 }
 0xcaf   : > { %v4641_v19 = vsel %vm851_vm6, %v4640_v1, %v4634_v44 }
 0xcb1   : > { %v4638_v25 = vpop.permute.xlu0 %4637 }
 0xcb2   : > { %v4642_v27 = vsel %vm3683_vm9, %v4641_v19, %v4638_v25 }
 0xcb3   : > { %v4643_v29 = vpack.c.bf16 %v4642_v27, %v4642_v27 }
 0xcb5   : > { %5634 = vmatmul.mubr.msk.bf16.vlgmr.msra.gmra.mrb[76].mxu0 %vm3687_vm12, %v4643_v29 }
 0xcb6   : > { %5658 = vmatpush3.bf16.msra.mxu0 %v4886_v33  ;;  %5659 = vmatprep.mubr.msk.bf16.mxu0 %vm6583_vm7, %v6574_v0 }
 0xcb7   : > { %5663 = vmatprep.subr.bf16.mxu0 %v6574_v0 }
 0xcbd   : > { %5660 = vmatmul.mubr.msk.bf16.vlgmr.msra.gmra.mrb[88].mxu0 %vm637_vm13, %v7350_v53 }
 0xcbe   : > { %5664 = vmatpush3.bf16.msra.mxu0 %v4886_v33  ;;  %5665 = vmatprep.mubr.msk.bf16.mxu0 %vm6583_vm7, %v6574_v0 }
 0xcbf   : > { %5669 = vmatprep.subr.bf16.mxu0 %v6574_v0 }
 0xcc5   : > { %5666 = vmatmul.mubr.msk.bf16.vlgmr.msra.gmra.mrb[92].mxu0 %vm637_vm13, %v7352_v24 }
 0xcc6   : > { %5673 = vmatprep.mubr.msk.bf16.mxu0 %vm6583_vm7, %v6574_v0  ;;  %5670 = vmatpush3.bf16.msra.mxu0 %v6475_v20 }
 0xcc7   : > { %5671 = vmatprep.subr.bf16.mxu0 %v6574_v0 }
 0xcca   : > { %5672 = vmatpush3.bf16.msra.mxu0 %v6476_v10 }
 0xd90   : > { %v4922_v34 = vpop.f32.mrb[88].mxu0 }
 0xd91   : > { %v5661_v57 = vpop.f32.mrb[89].mxu0 }
 0xd92   : > { %v4925_v47 = vpop.f32.mrb[90].mxu0 }
 0xd93   : > { %v5662_v53 = vpop.f32.mrb[91].mxu0 }
 0xd98   : > { %v4962_v24 = vpop.f32.mrb[92].mxu0 }
 0xd99   : > { %v4968_v61 = vmax.f32 %v4922_v34, %v4962_v24  ;;  %v5667_v23 = vpop.f32.mrb[93].mxu0 }
 0xd9a   : > { %v4965_v37 = vpop.f32.mrb[94].mxu0 }
 0xd9b   : > { %v4974_v9 = vrot.slane %v4968_v61, 2  ;;  %v4970_v54 = vrot.slane %v4968_v61, 1  ;;  %v5668_v13 = vpop.f32.mrb[95].mxu0  ;;  %v4978_v38 = vrot.slane %v4968_v61, 3 }
 0xd9d   : > { %4975 = vrot.lane.b32.xlu0 %v4974_v9, %s6586_s18  ;;  %4971 = vrot.lane.b32.xlu1 %v4970_v54, %s6584_s28  ;;  %s5054_s18 = scalar_lea.sflag [#allocation5], %s350_s11  ;;  %s6514_s28 = sshll.u32 %s6591_s17, 4  ;;  %s6515_s28 = int_to_ptr.vmem [resolvable:$false] %s6514_s28 }
 0xd9e   : > { %p6517_p0 = scmp.lt.s32.totalorder %s8464_s26, %s6515_s28 }
 0xda1   : > { %4979 = vrot.lane.b32.xlu1 %v4978_v38, %s6588_s25  ;;  %s6516_s25 = scalar_lea.vmem %s6515_s28, 32 }
 0xda2   : > { %p6518_p1 = scmp.lt.s32.totalorder %s6516_s25, %s6510_s27 }
 0xda4   : > { %p6519_p2 = por %p6518_p1, %p6517_p0 }
 0xda6   : > { %p6520_p3 = pnand %p6519_p2, %p6513_p13 }
 0xe0f   : > { %v4972_v0 = vpop.permute.xlu1 %4971  ;;  %v4976_v52 = vpop.permute.xlu0 %4975 }
 0xe10   : > { %v4982_v28 = vsel %vm637_vm13, %v4968_v61, %v4972_v0 }
 0xe11   : > { %v4983_v36 = vsel %vm851_vm6, %v4982_v28, %v4976_v52 }
 0xe13   : > { %v4980_v41 = vpop.permute.xlu1 %4979 }
 0xe14   : > { %v4984_v32 = vsel %vm3683_vm9, %v4983_v36, %v4980_v41 }
 0xe15   : > { %v4985_v58 = vpack.c.bf16 %v4984_v32, %v4984_v32 }
 0xe17   : > { %5674 = vmatmul.mubr.msk.bf16.vlgmr.msra.gmra.mrb[76].mxu0 %vm3687_vm12, %v4985_v58 }
 0xeea   : > { %v5039_v2 = vpop.f32.mrb[76].mxu0 }
 0xeeb   : > { %v5047_v15 = vmul.f32 %v5046_v11, %v5039_v2  ;;  %v5675_v42 = vpop.f32.mrb[77].mxu0 }
 0xeec   : > { %v5042_v39 = vpop.f32.mrb[78].mxu0 }
 0xeed   : > { %v5049_v30 = vadd.f32 %v5048_v8, %v5047_v15  ;;  %v5676_v3 = vpop.f32.mrb[79].mxu0 }
 0xeef   : > { %v5050_v51 = vmax.f32 %v5049_v30, 0.0 }
 0xef1   : > { %5052 = vst.msk [vmem:[%s351_s29] sm:$0x1] %vm5051_vm2, %v5050_v51 }
 0xef2   : > { %6523 = shalt.err (!%p6520_p3)
}
 0xef3   : > { %s6524_s11 = scalar_lea.hbm %s8462_s30, 16  ;;  %s6528_s12 = scalar_lea.hbm %s8514_s10, 32 }
 0xef4   : > { %p6525_p4 = scmp.ne.s32.totalorder %s8462_s30, %s6524_s11  ;;  %p6529_p9 = scmp.lt.u32.totalorder %s8462_s30, %s8514_s10 }
 0xef5   : > { %p6530_p10 = scmp.lt.u32.totalorder %s6528_s12, %s6524_s11  ;;  %p6532_p12 = scmp.lt.u32.totalorder %s6524_s11, %s8462_s30 }
 0xef6   : > { %p6526_p7 = pnand %p6525_p4, %p6685_p5 }
 0xef7   : > { %p6531_p11 = por %p6530_p10, %p6529_p9 }
 0xef8   : > { %p6527_p8 = pneg %p6526_p7 }
 0xef9   : > { %p6533_p13 = por %p6532_p12, %p6531_p11 }
 0xefb   : > { %p6534_p0 = pnand %p6533_p13, %p6527_p8 }
 0xefd   : > { %6537 = shalt.err (!%p6534_p0)
}
 0xefe   : > { %5689 = dma.vmem_to_hbm [thread:$0]  (%p6685_p5), %s8464_s26, 16, %s8462_s30, %s5054_s18  }
 0xeff PF: > { %p5695_p1 = scmp.ge.s32.totalorder %s6572_s16, 2  ;;  %s5078_s27 = sand.u32 1, %s6560_s13  }
 0xf00   : > { %s5079_s28 = scalar_lea.sflag [#allocation5], %s5078_s27 }
 0xf01   : > { %p5692_p2 = pnand %p5695_p1, %p6689_p6 }
 0xf03   : > { %6555 = dma.done.wait (!%p5692_p2), %s5079_s28, 16  }
 0xf04   : > { %6557 = vsyncadd (!%p5692_p2), %s5079_s28, 4294967280  ;;  %p20_p3 = scmp.ge.s32.totalorder %s6672_s19, 4   ;;  %s8522_s13 = smov %s6564_s14 }
 0xf05   : > { %s8523_s14 = smov %s6568_s15  ;;  %s8524_s15 = smov %s6683_s22 }
 0xf06   : > { %s8525_s16 = smov %s6672_s19  ;;  %22 = sbr.rel (!%p20_p3) target bundleno = 3 (0x3), region = 121 }
 0xf0d   :  { %5083 = vsyncpa [#allocation5], 1 }
 0xf0e   :  { %5085 = vsyncpa [#allocation5 + $0x1], 1 }

</bundles_post_ra>
